<compile_context>
chip_gen: v5e
topology: v5e:2x2
jax: 0.10.0
libtpu: 0.0.40
codegen_flags: <defaults>
</compile_context>

<pallas_src>
import functools

import jax
import jax.numpy as jnp
from jax.experimental import pallas as pl
from jax.experimental.pallas import tpu as pltpu


# ---------------------------------------------------------------------------
# Fused kernel: separable triplane bilinear sample + densities + EA raymarch
# ---------------------------------------------------------------------------
def _render_kernel(pd_ref, fxy_ref, fyz_ref, fxz_ref, out_ref,
                   acc_xy_ref, acc_yz_ref, acc_xz_ref, trans_ref, keep_ref,
                   *, hf, wf, c, tr, nt, n_blocks):
    nb = pl.program_id(2)

    @pl.when(nb == 0)
    def _init():
        acc_xy_ref[...] = jnp.zeros_like(acc_xy_ref)
        acc_yz_ref[...] = jnp.zeros_like(acc_yz_ref)
        acc_xz_ref[...] = jnp.zeros_like(acc_xz_ref)
        trans_ref[...] = jnp.ones_like(trans_ref)
        keep_ref[...] = jnp.ones_like(keep_ref)

    # Resident feature planes, pre-flattened in the wrapper to (C*Hf, Wf) so the
    # width contraction is a single MXU matmul with a tall M dimension.
    fxy = fxy_ref[0]
    fyz = fyz_ref[0]
    fxz = fxz_ref[0]

    # Grid-cell index fields at (K, 1); the lane broadcast happens inside tent(),
    # so no full (K, TR) iota / floor / div passes are ever materialized.
    jw = jax.lax.broadcasted_iota(jnp.int32, (wf, 1), 0).astype(jnp.float32)
    jh = jax.lax.broadcasted_iota(jnp.int32, (hf, 1), 0).astype(jnp.float32)

    def tent(coord, grid_idx, size):
        # align_corners=False unnormalize; zeros padding falls out of the tent support.
        i = ((coord + 1.0) * float(size) - 1.0) * 0.5                 # (1, TR)
        return jnp.maximum(1.0 - jnp.abs(i - grid_idx), 0.0)          # (K, TR)

    def sample(feat, th, tw):
        # Separable bilinear: MXU contracts width, VPU contracts height.
        #   feat: (C*Hf, Wf)   tw: (Wf, TR)   th: (Hf, TR)   ->   (C, TR) f32
        tmp = jnp.dot(feat, tw.astype(feat.dtype),
                      preferred_element_type=jnp.float32)             # (C*Hf, TR)
        # Layout-preserving split of the sublane dim when Hf % 8 == 0.
        tmp = tmp.reshape(c, hf, tr) * th[None, :, :]
        return tmp.sum(axis=1)                                        # (C, TR)

    # EA recurrence state is resident in VMEM scratch across the "arbitrary" grid
    # axis, but carried in registers across the Nt samples of this grid step.
    trans = trans_ref[...]
    keep = keep_ref[...]
    a_xy = acc_xy_ref[...]
    a_yz = acc_yz_ref[...]
    a_xz = acc_xz_ref[...]

    eps = 1e-10
    for s in range(nt):                       # static trip count -> fully unrolled
        pd = pd_ref[0, s]                     # (4, TR): rows = x, y, z, delta
        x = pd[0:1, :]
        y = pd[1:2, :]
        z = pd[2:3, :]
        delta = pd[3:4, :]

        tw_x = tent(x, jw, wf)                # width tents (shared by xy / yz planes)
        tw_y = tent(y, jw, wf)
        th_y = tent(y, jh, hf)                # height tents
        th_z = tent(z, jh, hf)

        sxy = sample(fxy, th_y, tw_x)         # grid_sample(feat_xy, grid=[x, y])
        syz = sample(fyz, th_z, tw_x)         # grid_sample(feat_yz, grid=[x, z])
        sxz = sample(fxz, th_z, tw_y)         # grid_sample(feat_xz, grid=[y, z])

        # densities: mean over planes of per-plane 1 - exp(-delta * relu(sigma_p))
        # (matches the reference _get_densities_and_colors exactly).
        dens = ((1.0 - jnp.exp(-delta * jnp.maximum(sxy[0:1, :], 0.0)))
                + (1.0 - jnp.exp(-delta * jnp.maximum(syz[0:1, :], 0.0)))
                + (1.0 - jnp.exp(-delta * jnp.maximum(sxz[0:1, :], 0.0)))) * (1.0 / 3.0)

        # EmissionAbsorption step (surface_thickness=1, eps=1e-10).
        w = dens * trans
        a_xy = a_xy + w * sxy
        a_yz = a_yz + w * syz
        a_xz = a_xz + w * sxz
        trans = trans * ((1.0 + eps) - dens)
        keep = keep * (1.0 - dens)

    acc_xy_ref[...] = a_xy
    acc_yz_ref[...] = a_yz
    acc_xz_ref[...] = a_xz
    trans_ref[...] = trans
    keep_ref[...] = keep

    @pl.when(nb == n_blocks - 1)
    def _flush():
        # single sublane concat per ray tile (not per sample)
        out_ref[0] = jnp.concatenate([a_xy, a_yz, a_xz, 1.0 - keep], axis=0)


# ---------------------------------------------------------------------------
# Generation-aware tiling helpers
# ---------------------------------------------------------------------------
def _vmem_capacity_bytes():
    try:
        info = pltpu.get_tpu_info()
        cap = getattr(info, "vmem_capacity_bytes", None)
        if cap:
            return int(cap)
    except Exception:
        pass
    return 64 << 20          # conservative default (v7x per-core VMEM)


def _pick_ray_tile(r_pad, c, hf, batch, vmem_cap):
    """Largest lane-dense ray tile that divides r_pad, keeps the (C*Hf, TR) f32
    sampling intermediate within budget, and leaves >= 2 parallel programs."""
    big = vmem_cap >= (96 << 20)              # v5e / v6e: 128 MiB; v7x: 64 MiB
    max_tile = 1024 if big else 512
    slab_budget = (16 << 20) if big else (8 << 20)
    by_budget = max(128, (slab_budget // max(c * hf * 4, 1)) // 128 * 128)
    tr = min(max_tile, by_budget, r_pad)
    tr = max(128, (tr // 128) * 128)
    while r_pad % tr != 0:
        tr -= 128
    # keep the two "parallel" grid axes >= 2 programs (v7x has 2 TensorCores)
    while tr > 128 and batch * (r_pad // tr) < 2:
        tr -= 128
        while r_pad % tr != 0:
            tr -= 128
    return tr


def _pick_sample_block(n, target=8):
    nt = max(1, min(n, target))
    while n % nt != 0:
        nt -= 1
    return nt


# ---------------------------------------------------------------------------
# pallas_call wrapper
# ---------------------------------------------------------------------------
def triplane_render_rays(points, deltas, feat_xy, feat_yz, feat_xz, *,
                         feat_dtype=jnp.bfloat16, sample_block=8):
    """points: (B, N, 3, R) normalized coords; deltas: (B, N, 1, R) f32 (1e10 sentinel
    on the last sample); feat_*: (B, C, Hf, Wf) NCHW.  Returns (B, 3C+1, R) f32
    rendered rays ([xy colors | yz colors | xz colors | opacity])."""
    B, N, _, R = points.shape
    _, C, Hf, Wf = feat_xy.shape
    assert feat_yz.shape == feat_xy.shape and feat_xz.shape == feat_xy.shape

    # merged [x, y, z, delta] rows -> one input DMA per grid step instead of two
    pd = jnp.concatenate([points.astype(jnp.float32),
                          deltas.astype(jnp.float32)], axis=2)        # (B, N, 4, R)

    # lane-dense rays: pad R up to a multiple of 128 (padded rays have delta=0, so
    # everything stays finite; their outputs are sliced off below)
    r_pad = max(128, -(-R // 128) * 128)
    if r_pad != R:
        pd = jnp.pad(pd, ((0, 0), (0, 0), (0, 0), (0, r_pad - R)))

    vmem_cap = _vmem_capacity_bytes()
    tr = _pick_ray_tile(r_pad, C, Hf, B, vmem_cap)
    nt = _pick_sample_block(N, sample_block)
    n_blocks = N // nt
    assert r_pad % tr == 0 and N % nt == 0

    # feature planes flattened to (C*Hf, Wf) for the separable width matmul
    feats = tuple(f.reshape(B, C * Hf, Wf).astype(feat_dtype)
                  for f in (feat_xy, feat_yz, feat_xz))

    kernel = functools.partial(_render_kernel, hf=Hf, wf=Wf, c=C, tr=tr,
                               nt=nt, n_blocks=n_blocks)

    # explicit VMEM budget: double-buffered IO + resident planes + in-kernel slabs
    pad8 = lambda v: -(-v // 8) * 8
    pad128 = lambda v: -(-v // 128) * 128
    fb = jnp.dtype(feat_dtype).itemsize
    est = (2 * nt * pad8(4) * tr * 4                       # points+deltas block
           + 3 * 2 * pad8(C * Hf) * pad128(Wf) * fb        # resident feature planes
           + 2 * pad8(3 * C + 1) * tr * 4                  # output block
           + (3 * pad8(C) + 2 * 8) * tr * 4                # EA accumulator scratch
           + (4 * pad8(max(Hf, Wf)) + 3 * pad8(C * Hf)) * tr * 4)   # tents + samples
    cap_limit = max(vmem_cap - (8 << 20), 32 << 20)
    vmem_limit = int(min(max(2 * est, 32 << 20), cap_limit))

    out = pl.pallas_call(
        kernel,
        out_shape=jax.ShapeDtypeStruct((B, 3 * C + 1, r_pad), jnp.float32),
        grid_spec=pltpu.PrefetchScalarGridSpec(
            num_scalar_prefetch=0,
            grid=(B, r_pad // tr, n_blocks),
            in_specs=[
                pl.BlockSpec((1, nt, 4, tr), lambda b, i, n: (b, n, 0, i)),
                pl.BlockSpec((1, C * Hf, Wf), lambda b, i, n: (b, 0, 0)),
                pl.BlockSpec((1, C * Hf, Wf), lambda b, i, n: (b, 0, 0)),
                pl.BlockSpec((1, C * Hf, Wf), lambda b, i, n: (b, 0, 0)),
            ],
            out_specs=pl.BlockSpec((1, 3 * C + 1, tr), lambda b, i, n: (b, 0, i)),
            scratch_shapes=[
                pltpu.VMEM((C, tr), jnp.float32),   # xy color accumulator
                pltpu.VMEM((C, tr), jnp.float32),   # yz color accumulator
                pltpu.VMEM((C, tr), jnp.float32),   # xz color accumulator
                pltpu.VMEM((1, tr), jnp.float32),   # transmittance (shifted cumprod)
                pltpu.VMEM((1, tr), jnp.float32),   # prod(1 - density) for opacity
            ],
        ),
        compiler_params=pltpu.CompilerParams(
            dimension_semantics=("parallel", "parallel", "arbitrary"),
            vmem_limit_bytes=vmem_limit),
    )(pd, *feats)
    return out[..., :R]


# ---------------------------------------------------------------------------
# Module wrapper (glue) mirroring TriplaneRender.forward
# ---------------------------------------------------------------------------
class TriplaneRenderPallas:
    def __init__(self, raymarcher, normalizer, raysampler=None,
                 feat_dtype=jnp.bfloat16):
        if not callable(raysampler):
            raise ValueError('"raysampler" has to be a "Callable" object.')
        if not callable(raymarcher):
            raise ValueError('"raymarcher" has to be a "Callable" object.')
        self.raysampler = raysampler
        self.normalizer = normalizer
        # EmissionAbsorption raymarcher semantics (surface_thickness=1, eps=1e-10)
        # are fused into the Pallas kernel; the argument is kept for API parity.
        self.raymarcher = raymarcher
        self.feat_dtype = feat_dtype

    def __call__(self, cameras, feat_xy, feat_yz, feat_xz,
                 density_noise_std: float = 0.0, **kwargs):
        origins, directions, lengths = self.raysampler(cameras=cameras, **kwargs)
        B, H, W, N = lengths.shape
        R = H * W
        D = origins.shape[-1]

        # ray_bundle_to_ray_points
        points = origins[..., None, :] + directions[..., None, :] * lengths[..., :, None]

        # normalize via the user callable on (B, 3, K), mirroring the torch module
        pts_b3p = jnp.transpose(points.reshape(B, -1, D), (0, 2, 1))     # (B, 3, R*N)
        pts_b3p = self.normalizer(pts_b3p)
        # lane-dense kernel layout: rays on the lane axis -> (B, N, 3, R)
        pts_kernel = jnp.transpose(pts_b3p.reshape(B, D, R, N), (0, 3, 1, 2))

        # deltas with the 1e10 sentinel of the reference _get_densities
        deltas = jnp.concatenate(
            [lengths[..., 1:] - lengths[..., :-1],
             jnp.full_like(lengths[..., :1], 1e10)], axis=-1)            # (B, H, W, N)
        deltas_kernel = jnp.transpose(deltas.reshape(B, R, N), (0, 2, 1))[:, :, None, :]

        # TODO(synk): density_noise_std > 0.0 (torch.randn_like noise) not implemented;
        # only the deterministic 0.0 path is supported.
        # TODO(synk): ray-point generation + normalization could be fused in-kernel,
        # but only if the user normalizer is a known affine map.
        rendered = triplane_render_rays(pts_kernel, deltas_kernel,
                                        feat_xy, feat_yz, feat_xz,
                                        feat_dtype=self.feat_dtype)      # (B, 3C+1, R)
        images = jnp.transpose(rendered, (0, 2, 1)).reshape(B, H, W, rendered.shape[1])
        return images, (origins, directions, lengths)


# ---------------------------------------------------------------------------
# Deterministic glue: raysampler / normalizer placeholders
# ---------------------------------------------------------------------------
def make_grid_raysampler(H, W, N, min_depth, max_depth):
    def raysampler(cameras, **kwargs):
        cam_pos = cameras["position"]                              # (B, 3)
        B = cam_pos.shape[0]
        ys = jnp.linspace(-1.0, 1.0, H)
        xs = jnp.linspace(-1.0, 1.0, W)
        gy, gx = jnp.meshgrid(ys, xs, indexing="ij")
        dirs = jnp.stack([gx * 0.4, gy * 0.4, -jnp.ones_like(gx)], axis=-1)
        directions = jnp.broadcast_to(dirs, (B, H, W, 3)).astype(jnp.float32)
        origins = jnp.broadcast_to(cam_pos[:, None, None, :], (B, H, W, 3))
        lengths = jnp.broadcast_to(
            jnp.linspace(min_depth, max_depth, N, dtype=jnp.float32), (B, H, W, N))
        return origins.astype(jnp.float32), directions, lengths.astype(jnp.float32)
    return raysampler


def make_normalizer(scale):
    # operates on (B, 3, K), mirroring the transpose dance in the torch module
    def normalizer(pts_b3k):
        return pts_b3k / scale
    return normalizer


# ---------------------------------------------------------------------------
# Pure-JAX reference (grid_sample bilinear/zeros/align_corners=False + EA raymarch)
# ---------------------------------------------------------------------------
def _grid_sample_2d(feat, gx, gy):
    Cc, Hf, Wf = feat.shape
    ix = ((gx + 1.0) * Wf - 1.0) * 0.5
    iy = ((gy + 1.0) * Hf - 1.0) * 0.5
    x0 = jnp.floor(ix); x1 = x0 + 1.0
    y0 = jnp.floor(iy); y1 = y0 + 1.0

    def gather(xi, yi):
        inb = ((xi >= 0) & (xi <= Wf - 1) & (yi >= 0) & (yi <= Hf - 1)).astype(feat.dtype)
        xc = jnp.clip(xi, 0, Wf - 1).astype(jnp.int32)
        yc = jnp.clip(yi, 0, Hf - 1).astype(jnp.int32)
        return feat[:, yc, xc] * inb[None, :]

    w00 = (x1 - ix) * (y1 - iy)
    w10 = (ix - x0) * (y1 - iy)
    w01 = (x1 - ix) * (iy - y0)
    w11 = (ix - x0) * (iy - y0)
    return (gather(x0, y0) * w00 + gather(x1, y0) * w10
            + gather(x0, y1) * w01 + gather(x1, y1) * w11)


def reference_forward(cameras, feat_xy, feat_yz, feat_xz, raysampler, normalizer):
    origins, directions, lengths = raysampler(cameras=cameras)
    B, H, W, N = lengths.shape
    points = origins[..., None, :] + directions[..., None, :] * lengths[..., :, None]
    pts = jnp.transpose(points.reshape(B, -1, 3), (0, 2, 1))
    pts = jnp.transpose(normalizer(pts), (0, 2, 1))                      # (B, P, 3)

    def per_batch(fxy, fyz, fxz, p):
        x, y, z = p[:, 0], p[:, 1], p[:, 2]
        sxy = _grid_sample_2d(fxy, x, y)
        syz = _grid_sample_2d(fyz, x, z)
        sxz = _grid_sample_2d(fxz, y, z)
        return jnp.concatenate([sxy, syz, sxz], axis=0)                  # (3C, P)

    feats = jax.vmap(per_batch)(feat_xy, feat_yz, feat_xz, pts)          # (B, 3C, P)
    C3 = feats.shape[1]
    C = C3 // 3
    feats = jnp.transpose(feats.reshape(B, C3, H, W, N), (0, 2, 3, 4, 1))

    deltas = jnp.concatenate([lengths[..., 1:] - lengths[..., :-1],
                              jnp.full_like(lengths[..., :1], 1e10)], axis=-1)
    raw = jnp.stack([feats[..., 0], feats[..., C], feats[..., 2 * C]], axis=-1)
    dens = (1.0 - jnp.exp(-deltas[..., None] * jnp.maximum(raw, 0.0))).mean(axis=-1)

    eps = 1e-10
    shifted = jnp.concatenate([jnp.ones_like(dens[..., :1]),
                               (1.0 + eps) - dens[..., :-1]], axis=-1)
    trans = jnp.cumprod(shifted, axis=-1)
    weights = dens * trans
    rendered = (weights[..., None] * feats).sum(axis=-2)
    opacity = 1.0 - jnp.prod(1.0 - dens, axis=-1, keepdims=True)
    return jnp.concatenate([rendered, opacity], axis=-1)                 # (B, H, W, 3C+1)


if __name__ == "__main__":
    B, C, Hf, Wf = 2, 4, 16, 16        # triplane: batch, channels, plane resolution
    H, W, N = 8, 8, 8                  # image height/width, samples per ray

    key = jax.random.PRNGKey(0)
    k1, k2, k3 = jax.random.split(key, 3)
    feat_xy = jax.random.normal(k1, (B, C, Hf, Wf), jnp.float32)
    feat_yz = jax.random.normal(k2, (B, C, Hf, Wf), jnp.float32)
    feat_xz = jax.random.normal(k3, (B, C, Hf, Wf), jnp.float32)
    cameras = {"position": jnp.array([[0.0, 0.0, 2.5],
                                      [0.3, -0.2, 2.0]], jnp.float32)}

    raysampler = make_grid_raysampler(H, W, N, 0.5, 3.5)
    normalizer = make_normalizer(2.5)

    # default (bf16 feature planes) performance path
    renderer = TriplaneRenderPallas(
        raymarcher=lambda **kw: None,            # fused into the Pallas kernel
        normalizer=normalizer, raysampler=raysampler)
    images, ray_bundle = renderer(cameras, feat_xy, feat_yz, feat_xz)
    images = jax.block_until_ready(images)
    assert images.shape == (B, H, W, 3 * C + 1)
    assert bool(jnp.all(jnp.isfinite(images)))

    # correctness check (f32 feature planes) against the pure-JAX reference.
    # Loose tolerance: TPU MXU f32 matmuls may execute with bf16 passes; structural
    # errors (wrong plane/channel mapping, wrong EA ordering) would be O(1).
    renderer32 = TriplaneRenderPallas(
        raymarcher=lambda **kw: None,
        normalizer=normalizer, raysampler=raysampler, feat_dtype=jnp.float32)
    images32, _ = renderer32(cameras, feat_xy, feat_yz, feat_xz)
    ref = reference_forward(cameras, feat_xy, feat_yz, feat_xz, raysampler, normalizer)
    images32, ref = jax.block_until_ready((images32, ref))
    err_max = float(jnp.max(jnp.abs(images32 - ref)))
    err_mean = float(jnp.mean(jnp.abs(images32 - ref)))
    assert err_max < 0.25 and err_mean < 0.05, (
        f"kernel/reference mismatch: max={err_max:.3e} mean={err_mean:.3e}")

    print("KERNEL_OK")
</pallas_src>

<mosaic_0001>
module attributes {stable_mosaic.version = 11 : i64} {
  func.func @_render_kernel(%arg0: i32, %arg1: i32, %arg2: i32, %arg3: memref<1x8x4x128xf32, #tpu.memory_space<vmem>>, %arg4: memref<1x64x16xbf16, #tpu.memory_space<vmem>>, %arg5: memref<1x64x16xbf16, #tpu.memory_space<vmem>>, %arg6: memref<1x64x16xbf16, #tpu.memory_space<vmem>>, %arg7: memref<1x13x128xf32, #tpu.memory_space<vmem>>, %arg8: memref<4x128xf32, #tpu.memory_space<vmem>>, %arg9: memref<4x128xf32, #tpu.memory_space<vmem>>, %arg10: memref<4x128xf32, #tpu.memory_space<vmem>>, %arg11: memref<1x128xf32, #tpu.memory_space<vmem>>, %arg12: memref<1x128xf32, #tpu.memory_space<vmem>>) attributes {dimension_semantics = [#tpu.dimension_semantics<parallel>, #tpu.dimension_semantics<parallel>, #tpu.dimension_semantics<arbitrary>], iteration_bounds = array<i64: 2, 1, 1>, scalar_prefetch = 0 : i64, scratch_operands = 5 : i64, tpu.core_type = #tpu.core_type<tc>, window_params = [{transform_indices = @transform_0, window_bounds = array<i64: 1, 8, 4, 128>}, {transform_indices = @transform_1, window_bounds = array<i64: 1, 64, 16>}, {transform_indices = @transform_2, window_bounds = array<i64: 1, 64, 16>}, {transform_indices = @transform_3, window_bounds = array<i64: 1, 64, 16>}, {transform_indices = @transform_4, window_bounds = array<i64: 1, 13, 128>}]} {
    %c0_i32 = arith.constant 0 : i32
    %0 = arith.cmpi eq, %arg2, %c0_i32 : i32
    %1 = arith.extui %0 : i1 to i32
    %c0_i32_0 = arith.constant 0 : i32
    %2 = arith.cmpi ne, %1, %c0_i32_0 : i32
    scf.if %2 {
      %cst_391 = arith.constant 0.000000e+00 : f32
      %1130 = vector.broadcast %cst_391 : f32 to vector<4x128xf32>
      %c0_392 = arith.constant 0 : index
      %c0_393 = arith.constant 0 : index
      %1131 = vector.load %arg8[%c0_392, %c0_393] : memref<4x128xf32, #tpu.memory_space<vmem>>, vector<4x128xf32>
      tpu.vector_store %arg8[%c0_392, %c0_393], %1130 {strides = array<i32>} : memref<4x128xf32, #tpu.memory_space<vmem>>, vector<4x128xf32>,
      %cst_394 = arith.constant 0.000000e+00 : f32
      %1132 = vector.broadcast %cst_394 : f32 to vector<4x128xf32>
      %c0_395 = arith.constant 0 : index
      %c0_396 = arith.constant 0 : index
      %1133 = vector.load %arg9[%c0_395, %c0_396] : memref<4x128xf32, #tpu.memory_space<vmem>>, vector<4x128xf32>
      tpu.vector_store %arg9[%c0_395, %c0_396], %1132 {strides = array<i32>} : memref<4x128xf32, #tpu.memory_space<vmem>>, vector<4x128xf32>,
      %cst_397 = arith.constant 0.000000e+00 : f32
      %1134 = vector.broadcast %cst_397 : f32 to vector<4x128xf32>
      %c0_398 = arith.constant 0 : index
      %c0_399 = arith.constant 0 : index
      %1135 = vector.load %arg10[%c0_398, %c0_399] : memref<4x128xf32, #tpu.memory_space<vmem>>, vector<4x128xf32>
      tpu.vector_store %arg10[%c0_398, %c0_399], %1134 {strides = array<i32>} : memref<4x128xf32, #tpu.memory_space<vmem>>, vector<4x128xf32>,
      %cst_400 = arith.constant 1.000000e+00 : f32
      %1136 = vector.broadcast %cst_400 : f32 to vector<1x128xf32>
      %c0_401 = arith.constant 0 : index
      %c0_402 = arith.constant 0 : index
      %1137 = vector.load %arg11[%c0_401, %c0_402] : memref<1x128xf32, #tpu.memory_space<vmem>>, vector<1x128xf32>
      tpu.vector_store %arg11[%c0_401, %c0_402], %1136 {strides = array<i32>} : memref<1x128xf32, #tpu.memory_space<vmem>>, vector<1x128xf32>,
      %cst_403 = arith.constant 1.000000e+00 : f32
      %1138 = vector.broadcast %cst_403 : f32 to vector<1x128xf32>
      %c0_404 = arith.constant 0 : index
      %c0_405 = arith.constant 0 : index
      %1139 = vector.load %arg12[%c0_404, %c0_405] : memref<1x128xf32, #tpu.memory_space<vmem>>, vector<1x128xf32>
      tpu.vector_store %arg12[%c0_404, %c0_405], %1138 {strides = array<i32>} : memref<1x128xf32, #tpu.memory_space<vmem>>, vector<1x128xf32>,
    } else {
    }
    %c0 = arith.constant 0 : index
    %c0_1 = arith.constant 0 : index
    %c0_2 = arith.constant 0 : index
    %3 = vector.load %arg4[%c0, %c0_1, %c0_2] : memref<1x64x16xbf16, #tpu.memory_space<vmem>>, vector<1x64x16xbf16>
    %4 = vector.shape_cast %3 : vector<1x64x16xbf16> to vector<64x16xbf16>
    %c0_3 = arith.constant 0 : index
    %c0_4 = arith.constant 0 : index
    %c0_5 = arith.constant 0 : index
    %5 = vector.load %arg5[%c0_3, %c0_4, %c0_5] : memref<1x64x16xbf16, #tpu.memory_space<vmem>>, vector<1x64x16xbf16>
    %6 = vector.shape_cast %5 : vector<1x64x16xbf16> to vector<64x16xbf16>
    %c0_6 = arith.constant 0 : index
    %c0_7 = arith.constant 0 : index
    %c0_8 = arith.constant 0 : index
    %7 = vector.load %arg6[%c0_6, %c0_7, %c0_8] : memref<1x64x16xbf16, #tpu.memory_space<vmem>>, vector<1x64x16xbf16>
    %8 = vector.shape_cast %7 : vector<1x64x16xbf16> to vector<64x16xbf16>
    %9 = tpu.iota {dimensions = array<i32: 0>} : vector<16x1xi32>
    %10 = arith.sitofp %9 : vector<16x1xi32> to vector<16x1xf32>
    %11 = tpu.iota {dimensions = array<i32: 0>} : vector<16x1xi32>
    %12 = arith.sitofp %11 : vector<16x1xi32> to vector<16x1xf32>
    %c0_9 = arith.constant 0 : index
    %c0_10 = arith.constant 0 : index
    %13 = vector.load %arg11[%c0_9, %c0_10] : memref<1x128xf32, #tpu.memory_space<vmem>>, vector<1x128xf32>
    %c0_11 = arith.constant 0 : index
    %c0_12 = arith.constant 0 : index
    %14 = vector.load %arg12[%c0_11, %c0_12] : memref<1x128xf32, #tpu.memory_space<vmem>>, vector<1x128xf32>
    %c0_13 = arith.constant 0 : index
    %c0_14 = arith.constant 0 : index
    %15 = vector.load %arg8[%c0_13, %c0_14] : memref<4x128xf32, #tpu.memory_space<vmem>>, vector<4x128xf32>
    %c0_15 = arith.constant 0 : index
    %c0_16 = arith.constant 0 : index
    %16 = vector.load %arg9[%c0_15, %c0_16] : memref<4x128xf32, #tpu.memory_space<vmem>>, vector<4x128xf32>
    %c0_17 = arith.constant 0 : index
    %c0_18 = arith.constant 0 : index
    %17 = vector.load %arg10[%c0_17, %c0_18] : memref<4x128xf32, #tpu.memory_space<vmem>>, vector<4x128xf32>
    %c0_19 = arith.constant 0 : index
    %c0_20 = arith.constant 0 : index
    %c0_21 = arith.constant 0 : index
    %c0_22 = arith.constant 0 : index
    %18 = vector.load %arg3[%c0_19, %c0_20, %c0_21, %c0_22] : memref<1x8x4x128xf32, #tpu.memory_space<vmem>>, vector<1x1x4x128xf32>
    %19 = vector.shape_cast %18 : vector<1x1x4x128xf32> to vector<4x128xf32>
    %20 = vector.extract_strided_slice %19 {offsets = [0, 0], sizes = [1, 128], strides = [1, 1]} : vector<4x128xf32> to vector<1x128xf32>
    %21 = vector.extract_strided_slice %19 {offsets = [1, 0], sizes = [1, 128], strides = [1, 1]} : vector<4x128xf32> to vector<1x128xf32>
    %22 = vector.extract_strided_slice %19 {offsets = [2, 0], sizes = [1, 128], strides = [1, 1]} : vector<4x128xf32> to vector<1x128xf32>
    %23 = vector.extract_strided_slice %19 {offsets = [3, 0], sizes = [1, 128], strides = [1, 1]} : vector<4x128xf32> to vector<1x128xf32>
    %cst = arith.constant 1.000000e+00 : f32
    %24 = vector.broadcast %cst : f32 to vector<1x128xf32>
    %25 = arith.addf %20, %24 : vector<1x128xf32>
    %cst_23 = arith.constant 1.600000e+01 : f32
    %26 = vector.broadcast %cst_23 : f32 to vector<1x128xf32>
    %27 = arith.mulf %25, %26 : vector<1x128xf32>
    %cst_24 = arith.constant 1.000000e+00 : f32
    %28 = vector.broadcast %cst_24 : f32 to vector<1x128xf32>
    %29 = arith.subf %27, %28 : vector<1x128xf32>
    %cst_25 = arith.constant 5.000000e-01 : f32
    %30 = vector.broadcast %cst_25 : f32 to vector<1x128xf32>
    %31 = arith.mulf %29, %30 : vector<1x128xf32>
    %32 = vector.broadcast %31 : vector<1x128xf32> to vector<16x128xf32>
    %33 = vector.broadcast %10 : vector<16x1xf32> to vector<16x128xf32>
    %34 = arith.subf %32, %33 : vector<16x128xf32>
    %35 = math.absf %34 : vector<16x128xf32>
    %cst_26 = arith.constant 1.000000e+00 : f32
    %36 = vector.broadcast %cst_26 : f32 to vector<16x128xf32>
    %37 = arith.subf %36, %35 : vector<16x128xf32>
    %cst_27 = arith.constant 0.000000e+00 : f32
    %38 = vector.broadcast %cst_27 : f32 to vector<16x128xf32>
    %39 = arith.maximumf %37, %38 : vector<16x128xf32>
    %cst_28 = arith.constant 1.000000e+00 : f32
    %40 = vector.broadcast %cst_28 : f32 to vector<1x128xf32>
    %41 = arith.addf %21, %40 : vector<1x128xf32>
    %cst_29 = arith.constant 1.600000e+01 : f32
    %42 = vector.broadcast %cst_29 : f32 to vector<1x128xf32>
    %43 = arith.mulf %41, %42 : vector<1x128xf32>
    %cst_30 = arith.constant 1.000000e+00 : f32
    %44 = vector.broadcast %cst_30 : f32 to vector<1x128xf32>
    %45 = arith.subf %43, %44 : vector<1x128xf32>
    %cst_31 = arith.constant 5.000000e-01 : f32
    %46 = vector.broadcast %cst_31 : f32 to vector<1x128xf32>
    %47 = arith.mulf %45, %46 : vector<1x128xf32>
    %48 = vector.broadcast %47 : vector<1x128xf32> to vector<16x128xf32>
    %49 = vector.broadcast %10 : vector<16x1xf32> to vector<16x128xf32>
    %50 = arith.subf %48, %49 : vector<16x128xf32>
    %51 = math.absf %50 : vector<16x128xf32>
    %cst_32 = arith.constant 1.000000e+00 : f32
    %52 = vector.broadcast %cst_32 : f32 to vector<16x128xf32>
    %53 = arith.subf %52, %51 : vector<16x128xf32>
    %cst_33 = arith.constant 0.000000e+00 : f32
    %54 = vector.broadcast %cst_33 : f32 to vector<16x128xf32>
    %55 = arith.maximumf %53, %54 : vector<16x128xf32>
    %cst_34 = arith.constant 1.000000e+00 : f32
    %56 = vector.broadcast %cst_34 : f32 to vector<1x128xf32>
    %57 = arith.addf %21, %56 : vector<1x128xf32>
    %cst_35 = arith.constant 1.600000e+01 : f32
    %58 = vector.broadcast %cst_35 : f32 to vector<1x128xf32>
    %59 = arith.mulf %57, %58 : vector<1x128xf32>
    %cst_36 = arith.constant 1.000000e+00 : f32
    %60 = vector.broadcast %cst_36 : f32 to vector<1x128xf32>
    %61 = arith.subf %59, %60 : vector<1x128xf32>
    %cst_37 = arith.constant 5.000000e-01 : f32
    %62 = vector.broadcast %cst_37 : f32 to vector<1x128xf32>
    %63 = arith.mulf %61, %62 : vector<1x128xf32>
    %64 = vector.broadcast %63 : vector<1x128xf32> to vector<16x128xf32>
    %65 = vector.broadcast %12 : vector<16x1xf32> to vector<16x128xf32>
    %66 = arith.subf %64, %65 : vector<16x128xf32>
    %67 = math.absf %66 : vector<16x128xf32>
    %cst_38 = arith.constant 1.000000e+00 : f32
    %68 = vector.broadcast %cst_38 : f32 to vector<16x128xf32>
    %69 = arith.subf %68, %67 : vector<16x128xf32>
    %cst_39 = arith.constant 0.000000e+00 : f32
    %70 = vector.broadcast %cst_39 : f32 to vector<16x128xf32>
    %71 = arith.maximumf %69, %70 : vector<16x128xf32>
    %cst_40 = arith.constant 1.000000e+00 : f32
    %72 = vector.broadcast %cst_40 : f32 to vector<1x128xf32>
    %73 = arith.addf %22, %72 : vector<1x128xf32>
    %cst_41 = arith.constant 1.600000e+01 : f32
    %74 = vector.broadcast %cst_41 : f32 to vector<1x128xf32>
    %75 = arith.mulf %73, %74 : vector<1x128xf32>
    %cst_42 = arith.constant 1.000000e+00 : f32
    %76 = vector.broadcast %cst_42 : f32 to vector<1x128xf32>
    %77 = arith.subf %75, %76 : vector<1x128xf32>
    %cst_43 = arith.constant 5.000000e-01 : f32
    %78 = vector.broadcast %cst_43 : f32 to vector<1x128xf32>
    %79 = arith.mulf %77, %78 : vector<1x128xf32>
    %80 = vector.broadcast %79 : vector<1x128xf32> to vector<16x128xf32>
    %81 = vector.broadcast %12 : vector<16x1xf32> to vector<16x128xf32>
    %82 = arith.subf %80, %81 : vector<16x128xf32>
    %83 = math.absf %82 : vector<16x128xf32>
    %cst_44 = arith.constant 1.000000e+00 : f32
    %84 = vector.broadcast %cst_44 : f32 to vector<16x128xf32>
    %85 = arith.subf %84, %83 : vector<16x128xf32>
    %cst_45 = arith.constant 0.000000e+00 : f32
    %86 = vector.broadcast %cst_45 : f32 to vector<16x128xf32>
    %87 = arith.maximumf %85, %86 : vector<16x128xf32>
    %88 = arith.truncf %39 : vector<16x128xf32> to vector<16x128xbf16>
    %cst_46 = arith.constant dense<0.000000e+00> : vector<64x128xf32>
    %89 = tpu.matmul %4, %88, %cst_46 {dimension_numbers = #tpu.dot_dimension_numbers<[1], [0], [0], [1], [0, 0, 1, 1], [], []>} : vector<64x16xbf16>, vector<16x128xbf16>, vector<64x128xf32> -> vector<64x128xf32>
    %90 = vector.shape_cast %89 : vector<64x128xf32> to vector<4x16x128xf32>
    %91 = vector.shape_cast %71 : vector<16x128xf32> to vector<1x16x128xf32>
    %92 = vector.broadcast %91 : vector<1x16x128xf32> to vector<4x16x128xf32>
    %93 = arith.mulf %90, %92 : vector<4x16x128xf32>
    %cst_47 = arith.constant dense<0.000000e+00> : vector<4x128xf32>
    %94 = vector.multi_reduction <add>, %93, %cst_47 [1] : vector<4x16x128xf32> to vector<4x128xf32>
    %95 = arith.truncf %39 : vector<16x128xf32> to vector<16x128xbf16>
    %cst_48 = arith.constant dense<0.000000e+00> : vector<64x128xf32>
    %96 = tpu.matmul %6, %95, %cst_48 {dimension_numbers = #tpu.dot_dimension_numbers<[1], [0], [0], [1], [0, 0, 1, 1], [], []>} : vector<64x16xbf16>, vector<16x128xbf16>, vector<64x128xf32> -> vector<64x128xf32>
    %97 = vector.shape_cast %96 : vector<64x128xf32> to vector<4x16x128xf32>
    %98 = vector.shape_cast %87 : vector<16x128xf32> to vector<1x16x128xf32>
    %99 = vector.broadcast %98 : vector<1x16x128xf32> to vector<4x16x128xf32>
    %100 = arith.mulf %97, %99 : vector<4x16x128xf32>
    %cst_49 = arith.constant dense<0.000000e+00> : vector<4x128xf32>
    %101 = vector.multi_reduction <add>, %100, %cst_49 [1] : vector<4x16x128xf32> to vector<4x128xf32>
    %102 = arith.truncf %55 : vector<16x128xf32> to vector<16x128xbf16>
    %cst_50 = arith.constant dense<0.000000e+00> : vector<64x128xf32>
    %103 = tpu.matmul %8, %102, %cst_50 {dimension_numbers = #tpu.dot_dimension_numbers<[1], [0], [0], [1], [0, 0, 1, 1], [], []>} : vector<64x16xbf16>, vector<16x128xbf16>, vector<64x128xf32> -> vector<64x128xf32>
    %104 = vector.shape_cast %103 : vector<64x128xf32> to vector<4x16x128xf32>
    %105 = vector.shape_cast %87 : vector<16x128xf32> to vector<1x16x128xf32>
    %106 = vector.broadcast %105 : vector<1x16x128xf32> to vector<4x16x128xf32>
    %107 = arith.mulf %104, %106 : vector<4x16x128xf32>
    %cst_51 = arith.constant dense<0.000000e+00> : vector<4x128xf32>
    %108 = vector.multi_reduction <add>, %107, %cst_51 [1] : vector<4x16x128xf32> to vector<4x128xf32>
    %cst_52 = arith.constant 0.000000e+00 : f32
    %109 = vector.broadcast %cst_52 : f32 to vector<1x128xf32>
    %110 = arith.subf %109, %23 : vector<1x128xf32>
    %111 = vector.extract_strided_slice %94 {offsets = [0, 0], sizes = [1, 128], strides = [1, 1]} : vector<4x128xf32> to vector<1x128xf32>
    %cst_53 = arith.constant 0.000000e+00 : f32
    %112 = vector.broadcast %cst_53 : f32 to vector<1x128xf32>
    %113 = arith.maximumf %111, %112 : vector<1x128xf32>
    %114 = arith.mulf %110, %113 : vector<1x128xf32>
    %115 = math.exp %114 : vector<1x128xf32>
    %cst_54 = arith.constant 1.000000e+00 : f32
    %116 = vector.broadcast %cst_54 : f32 to vector<1x128xf32>
    %117 = arith.subf %116, %115 : vector<1x128xf32>
    %cst_55 = arith.constant 0.000000e+00 : f32
    %118 = vector.broadcast %cst_55 : f32 to vector<1x128xf32>
    %119 = arith.subf %118, %23 : vector<1x128xf32>
    %120 = vector.extract_strided_slice %101 {offsets = [0, 0], sizes = [1, 128], strides = [1, 1]} : vector<4x128xf32> to vector<1x128xf32>
    %cst_56 = arith.constant 0.000000e+00 : f32
    %121 = vector.broadcast %cst_56 : f32 to vector<1x128xf32>
    %122 = arith.maximumf %120, %121 : vector<1x128xf32>
    %123 = arith.mulf %119, %122 : vector<1x128xf32>
    %124 = math.exp %123 : vector<1x128xf32>
    %cst_57 = arith.constant 1.000000e+00 : f32
    %125 = vector.broadcast %cst_57 : f32 to vector<1x128xf32>
    %126 = arith.subf %125, %124 : vector<1x128xf32>
    %127 = arith.addf %117, %126 : vector<1x128xf32>
    %cst_58 = arith.constant 0.000000e+00 : f32
    %128 = vector.broadcast %cst_58 : f32 to vector<1x128xf32>
    %129 = arith.subf %128, %23 : vector<1x128xf32>
    %130 = vector.extract_strided_slice %108 {offsets = [0, 0], sizes = [1, 128], strides = [1, 1]} : vector<4x128xf32> to vector<1x128xf32>
    %cst_59 = arith.constant 0.000000e+00 : f32
    %131 = vector.broadcast %cst_59 : f32 to vector<1x128xf32>
    %132 = arith.maximumf %130, %131 : vector<1x128xf32>
    %133 = arith.mulf %129, %132 : vector<1x128xf32>
    %134 = math.exp %133 : vector<1x128xf32>
    %cst_60 = arith.constant 1.000000e+00 : f32
    %135 = vector.broadcast %cst_60 : f32 to vector<1x128xf32>
    %136 = arith.subf %135, %134 : vector<1x128xf32>
    %137 = arith.addf %127, %136 : vector<1x128xf32>
    %cst_61 = arith.constant 0.333333343 : f32
    %138 = vector.broadcast %cst_61 : f32 to vector<1x128xf32>
    %139 = arith.mulf %137, %138 : vector<1x128xf32>
    %140 = arith.mulf %139, %13 : vector<1x128xf32>
    %141 = vector.broadcast %140 : vector<1x128xf32> to vector<4x128xf32>
    %142 = arith.mulf %141, %94 : vector<4x128xf32>
    %143 = arith.addf %15, %142 : vector<4x128xf32>
    %144 = vector.broadcast %140 : vector<1x128xf32> to vector<4x128xf32>
    %145 = arith.mulf %144, %101 : vector<4x128xf32>
    %146 = arith.addf %16, %145 : vector<4x128xf32>
    %147 = vector.broadcast %140 : vector<1x128xf32> to vector<4x128xf32>
    %148 = arith.mulf %147, %108 : vector<4x128xf32>
    %149 = arith.addf %17, %148 : vector<4x128xf32>
    %cst_62 = arith.constant 1.000000e+00 : f32
    %150 = vector.broadcast %cst_62 : f32 to vector<1x128xf32>
    %151 = arith.subf %150, %139 : vector<1x128xf32>
    %152 = arith.mulf %13, %151 : vector<1x128xf32>
    %cst_63 = arith.constant 1.000000e+00 : f32
    %153 = vector.broadcast %cst_63 : f32 to vector<1x128xf32>
    %154 = arith.subf %153, %139 : vector<1x128xf32>
    %155 = arith.mulf %14, %154 : vector<1x128xf32>
    %c0_64 = arith.constant 0 : index
    %c1 = arith.constant 1 : index
    %c0_65 = arith.constant 0 : index
    %c0_66 = arith.constant 0 : index
    %156 = vector.load %arg3[%c0_64, %c1, %c0_65, %c0_66] : memref<1x8x4x128xf32, #tpu.memory_space<vmem>>, vector<1x1x4x128xf32>
    %157 = vector.shape_cast %156 : vector<1x1x4x128xf32> to vector<4x128xf32>
    %158 = vector.extract_strided_slice %157 {offsets = [0, 0], sizes = [1, 128], strides = [1, 1]} : vector<4x128xf32> to vector<1x128xf32>
    %159 = vector.extract_strided_slice %157 {offsets = [1, 0], sizes = [1, 128], strides = [1, 1]} : vector<4x128xf32> to vector<1x128xf32>
    %160 = vector.extract_strided_slice %157 {offsets = [2, 0], sizes = [1, 128], strides = [1, 1]} : vector<4x128xf32> to vector<1x128xf32>
    %161 = vector.extract_strided_slice %157 {offsets = [3, 0], sizes = [1, 128], strides = [1, 1]} : vector<4x128xf32> to vector<1x128xf32>
    %cst_67 = arith.constant 1.000000e+00 : f32
    %162 = vector.broadcast %cst_67 : f32 to vector<1x128xf32>
    %163 = arith.addf %158, %162 : vector<1x128xf32>
    %cst_68 = arith.constant 1.600000e+01 : f32
    %164 = vector.broadcast %cst_68 : f32 to vector<1x128xf32>
    %165 = arith.mulf %163, %164 : vector<1x128xf32>
    %cst_69 = arith.constant 1.000000e+00 : f32
    %166 = vector.broadcast %cst_69 : f32 to vector<1x128xf32>
    %167 = arith.subf %165, %166 : vector<1x128xf32>
    %cst_70 = arith.constant 5.000000e-01 : f32
    %168 = vector.broadcast %cst_70 : f32 to vector<1x128xf32>
    %169 = arith.mulf %167, %168 : vector<1x128xf32>
    %170 = vector.broadcast %169 : vector<1x128xf32> to vector<16x128xf32>
    %171 = vector.broadcast %10 : vector<16x1xf32> to vector<16x128xf32>
    %172 = arith.subf %170, %171 : vector<16x128xf32>
    %173 = math.absf %172 : vector<16x128xf32>
    %cst_71 = arith.constant 1.000000e+00 : f32
    %174 = vector.broadcast %cst_71 : f32 to vector<16x128xf32>
    %175 = arith.subf %174, %173 : vector<16x128xf32>
    %cst_72 = arith.constant 0.000000e+00 : f32
    %176 = vector.broadcast %cst_72 : f32 to vector<16x128xf32>
    %177 = arith.maximumf %175, %176 : vector<16x128xf32>
    %cst_73 = arith.constant 1.000000e+00 : f32
    %178 = vector.broadcast %cst_73 : f32 to vector<1x128xf32>
    %179 = arith.addf %159, %178 : vector<1x128xf32>
    %cst_74 = arith.constant 1.600000e+01 : f32
    %180 = vector.broadcast %cst_74 : f32 to vector<1x128xf32>
    %181 = arith.mulf %179, %180 : vector<1x128xf32>
    %cst_75 = arith.constant 1.000000e+00 : f32
    %182 = vector.broadcast %cst_75 : f32 to vector<1x128xf32>
    %183 = arith.subf %181, %182 : vector<1x128xf32>
    %cst_76 = arith.constant 5.000000e-01 : f32
    %184 = vector.broadcast %cst_76 : f32 to vector<1x128xf32>
    %185 = arith.mulf %183, %184 : vector<1x128xf32>
    %186 = vector.broadcast %185 : vector<1x128xf32> to vector<16x128xf32>
    %187 = vector.broadcast %10 : vector<16x1xf32> to vector<16x128xf32>
    %188 = arith.subf %186, %187 : vector<16x128xf32>
    %189 = math.absf %188 : vector<16x128xf32>
    %cst_77 = arith.constant 1.000000e+00 : f32
    %190 = vector.broadcast %cst_77 : f32 to vector<16x128xf32>
    %191 = arith.subf %190, %189 : vector<16x128xf32>
    %cst_78 = arith.constant 0.000000e+00 : f32
    %192 = vector.broadcast %cst_78 : f32 to vector<16x128xf32>
    %193 = arith.maximumf %191, %192 : vector<16x128xf32>
    %cst_79 = arith.constant 1.000000e+00 : f32
    %194 = vector.broadcast %cst_79 : f32 to vector<1x128xf32>
    %195 = arith.addf %159, %194 : vector<1x128xf32>
    %cst_80 = arith.constant 1.600000e+01 : f32
    %196 = vector.broadcast %cst_80 : f32 to vector<1x128xf32>
    %197 = arith.mulf %195, %196 : vector<1x128xf32>
    %cst_81 = arith.constant 1.000000e+00 : f32
    %198 = vector.broadcast %cst_81 : f32 to vector<1x128xf32>
    %199 = arith.subf %197, %198 : vector<1x128xf32>
    %cst_82 = arith.constant 5.000000e-01 : f32
    %200 = vector.broadcast %cst_82 : f32 to vector<1x128xf32>
    %201 = arith.mulf %199, %200 : vector<1x128xf32>
    %202 = vector.broadcast %201 : vector<1x128xf32> to vector<16x128xf32>
    %203 = vector.broadcast %12 : vector<16x1xf32> to vector<16x128xf32>
    %204 = arith.subf %202, %203 : vector<16x128xf32>
    %205 = math.absf %204 : vector<16x128xf32>
    %cst_83 = arith.constant 1.000000e+00 : f32
    %206 = vector.broadcast %cst_83 : f32 to vector<16x128xf32>
    %207 = arith.subf %206, %205 : vector<16x128xf32>
    %cst_84 = arith.constant 0.000000e+00 : f32
    %208 = vector.broadcast %cst_84 : f32 to vector<16x128xf32>
    %209 = arith.maximumf %207, %208 : vector<16x128xf32>
    %cst_85 = arith.constant 1.000000e+00 : f32
    %210 = vector.broadcast %cst_85 : f32 to vector<1x128xf32>
    %211 = arith.addf %160, %210 : vector<1x128xf32>
    %cst_86 = arith.constant 1.600000e+01 : f32
    %212 = vector.broadcast %cst_86 : f32 to vector<1x128xf32>
    %213 = arith.mulf %211, %212 : vector<1x128xf32>
    %cst_87 = arith.constant 1.000000e+00 : f32
    %214 = vector.broadcast %cst_87 : f32 to vector<1x128xf32>
    %215 = arith.subf %213, %214 : vector<1x128xf32>
    %cst_88 = arith.constant 5.000000e-01 : f32
    %216 = vector.broadcast %cst_88 : f32 to vector<1x128xf32>
    %217 = arith.mulf %215, %216 : vector<1x128xf32>
    %218 = vector.broadcast %217 : vector<1x128xf32> to vector<16x128xf32>
    %219 = vector.broadcast %12 : vector<16x1xf32> to vector<16x128xf32>
    %220 = arith.subf %218, %219 : vector<16x128xf32>
    %221 = math.absf %220 : vector<16x128xf32>
    %cst_89 = arith.constant 1.000000e+00 : f32
    %222 = vector.broadcast %cst_89 : f32 to vector<16x128xf32>
    %223 = arith.subf %222, %221 : vector<16x128xf32>
    %cst_90 = arith.constant 0.000000e+00 : f32
    %224 = vector.broadcast %cst_90 : f32 to vector<16x128xf32>
    %225 = arith.maximumf %223, %224 : vector<16x128xf32>
    %226 = arith.truncf %177 : vector<16x128xf32> to vector<16x128xbf16>
    %cst_91 = arith.constant dense<0.000000e+00> : vector<64x128xf32>
    %227 = tpu.matmul %4, %226, %cst_91 {dimension_numbers = #tpu.dot_dimension_numbers<[1], [0], [0], [1], [0, 0, 1, 1], [], []>} : vector<64x16xbf16>, vector<16x128xbf16>, vector<64x128xf32> -> vector<64x128xf32>
    %228 = vector.shape_cast %227 : vector<64x128xf32> to vector<4x16x128xf32>
    %229 = vector.shape_cast %209 : vector<16x128xf32> to vector<1x16x128xf32>
    %230 = vector.broadcast %229 : vector<1x16x128xf32> to vector<4x16x128xf32>
    %231 = arith.mulf %228, %230 : vector<4x16x128xf32>
    %cst_92 = arith.constant dense<0.000000e+00> : vector<4x128xf32>
    %232 = vector.multi_reduction <add>, %231, %cst_92 [1] : vector<4x16x128xf32> to vector<4x128xf32>
    %233 = arith.truncf %177 : vector<16x128xf32> to vector<16x128xbf16>
    %cst_93 = arith.constant dense<0.000000e+00> : vector<64x128xf32>
    %234 = tpu.matmul %6, %233, %cst_93 {dimension_numbers = #tpu.dot_dimension_numbers<[1], [0], [0], [1], [0, 0, 1, 1], [], []>} : vector<64x16xbf16>, vector<16x128xbf16>, vector<64x128xf32> -> vector<64x128xf32>
    %235 = vector.shape_cast %234 : vector<64x128xf32> to vector<4x16x128xf32>
    %236 = vector.shape_cast %225 : vector<16x128xf32> to vector<1x16x128xf32>
    %237 = vector.broadcast %236 : vector<1x16x128xf32> to vector<4x16x128xf32>
    %238 = arith.mulf %235, %237 : vector<4x16x128xf32>
    %cst_94 = arith.constant dense<0.000000e+00> : vector<4x128xf32>
    %239 = vector.multi_reduction <add>, %238, %cst_94 [1] : vector<4x16x128xf32> to vector<4x128xf32>
    %240 = arith.truncf %193 : vector<16x128xf32> to vector<16x128xbf16>
    %cst_95 = arith.constant dense<0.000000e+00> : vector<64x128xf32>
    %241 = tpu.matmul %8, %240, %cst_95 {dimension_numbers = #tpu.dot_dimension_numbers<[1], [0], [0], [1], [0, 0, 1, 1], [], []>} : vector<64x16xbf16>, vector<16x128xbf16>, vector<64x128xf32> -> vector<64x128xf32>
    %242 = vector.shape_cast %241 : vector<64x128xf32> to vector<4x16x128xf32>
    %243 = vector.shape_cast %225 : vector<16x128xf32> to vector<1x16x128xf32>
    %244 = vector.broadcast %243 : vector<1x16x128xf32> to vector<4x16x128xf32>
    %245 = arith.mulf %242, %244 : vector<4x16x128xf32>
    %cst_96 = arith.constant dense<0.000000e+00> : vector<4x128xf32>
    %246 = vector.multi_reduction <add>, %245, %cst_96 [1] : vector<4x16x128xf32> to vector<4x128xf32>
    %cst_97 = arith.constant 0.000000e+00 : f32
    %247 = vector.broadcast %cst_97 : f32 to vector<1x128xf32>
    %248 = arith.subf %247, %161 : vector<1x128xf32>
    %249 = vector.extract_strided_slice %232 {offsets = [0, 0], sizes = [1, 128], strides = [1, 1]} : vector<4x128xf32> to vector<1x128xf32>
    %cst_98 = arith.constant 0.000000e+00 : f32
    %250 = vector.broadcast %cst_98 : f32 to vector<1x128xf32>
    %251 = arith.maximumf %249, %250 : vector<1x128xf32>
    %252 = arith.mulf %248, %251 : vector<1x128xf32>
    %253 = math.exp %252 : vector<1x128xf32>
    %cst_99 = arith.constant 1.000000e+00 : f32
    %254 = vector.broadcast %cst_99 : f32 to vector<1x128xf32>
    %255 = arith.subf %254, %253 : vector<1x128xf32>
    %cst_100 = arith.constant 0.000000e+00 : f32
    %256 = vector.broadcast %cst_100 : f32 to vector<1x128xf32>
    %257 = arith.subf %256, %161 : vector<1x128xf32>
    %258 = vector.extract_strided_slice %239 {offsets = [0, 0], sizes = [1, 128], strides = [1, 1]} : vector<4x128xf32> to vector<1x128xf32>
    %cst_101 = arith.constant 0.000000e+00 : f32
    %259 = vector.broadcast %cst_101 : f32 to vector<1x128xf32>
    %260 = arith.maximumf %258, %259 : vector<1x128xf32>
    %261 = arith.mulf %257, %260 : vector<1x128xf32>
    %262 = math.exp %261 : vector<1x128xf32>
    %cst_102 = arith.constant 1.000000e+00 : f32
    %263 = vector.broadcast %cst_102 : f32 to vector<1x128xf32>
    %264 = arith.subf %263, %262 : vector<1x128xf32>
    %265 = arith.addf %255, %264 : vector<1x128xf32>
    %cst_103 = arith.constant 0.000000e+00 : f32
    %266 = vector.broadcast %cst_103 : f32 to vector<1x128xf32>
    %267 = arith.subf %266, %161 : vector<1x128xf32>
    %268 = vector.extract_strided_slice %246 {offsets = [0, 0], sizes = [1, 128], strides = [1, 1]} : vector<4x128xf32> to vector<1x128xf32>
    %cst_104 = arith.constant 0.000000e+00 : f32
    %269 = vector.broadcast %cst_104 : f32 to vector<1x128xf32>
    %270 = arith.maximumf %268, %269 : vector<1x128xf32>
    %271 = arith.mulf %267, %270 : vector<1x128xf32>
    %272 = math.exp %271 : vector<1x128xf32>
    %cst_105 = arith.constant 1.000000e+00 : f32
    %273 = vector.broadcast %cst_105 : f32 to vector<1x128xf32>
    %274 = arith.subf %273, %272 : vector<1x128xf32>
    %275 = arith.addf %265, %274 : vector<1x128xf32>
    %cst_106 = arith.constant 0.333333343 : f32
    %276 = vector.broadcast %cst_106 : f32 to vector<1x128xf32>
    %277 = arith.mulf %275, %276 : vector<1x128xf32>
    %278 = arith.mulf %277, %152 : vector<1x128xf32>
    %279 = vector.broadcast %278 : vector<1x128xf32> to vector<4x128xf32>
    %280 = arith.mulf %279, %232 : vector<4x128xf32>
    %281 = arith.addf %143, %280 : vector<4x128xf32>
    %282 = vector.broadcast %278 : vector<1x128xf32> to vector<4x128xf32>
    %283 = arith.mulf %282, %239 : vector<4x128xf32>
    %284 = arith.addf %146, %283 : vector<4x128xf32>
    %285 = vector.broadcast %278 : vector<1x128xf32> to vector<4x128xf32>
    %286 = arith.mulf %285, %246 : vector<4x128xf32>
    %287 = arith.addf %149, %286 : vector<4x128xf32>
    %cst_107 = arith.constant 1.000000e+00 : f32
    %288 = vector.broadcast %cst_107 : f32 to vector<1x128xf32>
    %289 = arith.subf %288, %277 : vector<1x128xf32>
    %290 = arith.mulf %152, %289 : vector<1x128xf32>
    %cst_108 = arith.constant 1.000000e+00 : f32
    %291 = vector.broadcast %cst_108 : f32 to vector<1x128xf32>
    %292 = arith.subf %291, %277 : vector<1x128xf32>
    %293 = arith.mulf %155, %292 : vector<1x128xf32>
    %c0_109 = arith.constant 0 : index
    %c2 = arith.constant 2 : index
    %c0_110 = arith.constant 0 : index
    %c0_111 = arith.constant 0 : index
    %294 = vector.load %arg3[%c0_109, %c2, %c0_110, %c0_111] : memref<1x8x4x128xf32, #tpu.memory_space<vmem>>, vector<1x1x4x128xf32>
    %295 = vector.shape_cast %294 : vector<1x1x4x128xf32> to vector<4x128xf32>
    %296 = vector.extract_strided_slice %295 {offsets = [0, 0], sizes = [1, 128], strides = [1, 1]} : vector<4x128xf32> to vector<1x128xf32>
    %297 = vector.extract_strided_slice %295 {offsets = [1, 0], sizes = [1, 128], strides = [1, 1]} : vector<4x128xf32> to vector<1x128xf32>
    %298 = vector.extract_strided_slice %295 {offsets = [2, 0], sizes = [1, 128], strides = [1, 1]} : vector<4x128xf32> to vector<1x128xf32>
    %299 = vector.extract_strided_slice %295 {offsets = [3, 0], sizes = [1, 128], strides = [1, 1]} : vector<4x128xf32> to vector<1x128xf32>
    %cst_112 = arith.constant 1.000000e+00 : f32
    %300 = vector.broadcast %cst_112 : f32 to vector<1x128xf32>
    %301 = arith.addf %296, %300 : vector<1x128xf32>
    %cst_113 = arith.constant 1.600000e+01 : f32
    %302 = vector.broadcast %cst_113 : f32 to vector<1x128xf32>
    %303 = arith.mulf %301, %302 : vector<1x128xf32>
    %cst_114 = arith.constant 1.000000e+00 : f32
    %304 = vector.broadcast %cst_114 : f32 to vector<1x128xf32>
    %305 = arith.subf %303, %304 : vector<1x128xf32>
    %cst_115 = arith.constant 5.000000e-01 : f32
    %306 = vector.broadcast %cst_115 : f32 to vector<1x128xf32>
    %307 = arith.mulf %305, %306 : vector<1x128xf32>
    %308 = vector.broadcast %307 : vector<1x128xf32> to vector<16x128xf32>
    %309 = vector.broadcast %10 : vector<16x1xf32> to vector<16x128xf32>
    %310 = arith.subf %308, %309 : vector<16x128xf32>
    %311 = math.absf %310 : vector<16x128xf32>
    %cst_116 = arith.constant 1.000000e+00 : f32
    %312 = vector.broadcast %cst_116 : f32 to vector<16x128xf32>
    %313 = arith.subf %312, %311 : vector<16x128xf32>
    %cst_117 = arith.constant 0.000000e+00 : f32
    %314 = vector.broadcast %cst_117 : f32 to vector<16x128xf32>
    %315 = arith.maximumf %313, %314 : vector<16x128xf32>
    %cst_118 = arith.constant 1.000000e+00 : f32
    %316 = vector.broadcast %cst_118 : f32 to vector<1x128xf32>
    %317 = arith.addf %297, %316 : vector<1x128xf32>
    %cst_119 = arith.constant 1.600000e+01 : f32
    %318 = vector.broadcast %cst_119 : f32 to vector<1x128xf32>
    %319 = arith.mulf %317, %318 : vector<1x128xf32>
    %cst_120 = arith.constant 1.000000e+00 : f32
    %320 = vector.broadcast %cst_120 : f32 to vector<1x128xf32>
    %321 = arith.subf %319, %320 : vector<1x128xf32>
    %cst_121 = arith.constant 5.000000e-01 : f32
    %322 = vector.broadcast %cst_121 : f32 to vector<1x128xf32>
    %323 = arith.mulf %321, %322 : vector<1x128xf32>
    %324 = vector.broadcast %323 : vector<1x128xf32> to vector<16x128xf32>
    %325 = vector.broadcast %10 : vector<16x1xf32> to vector<16x128xf32>
    %326 = arith.subf %324, %325 : vector<16x128xf32>
    %327 = math.absf %326 : vector<16x128xf32>
    %cst_122 = arith.constant 1.000000e+00 : f32
    %328 = vector.broadcast %cst_122 : f32 to vector<16x128xf32>
    %329 = arith.subf %328, %327 : vector<16x128xf32>
    %cst_123 = arith.constant 0.000000e+00 : f32
    %330 = vector.broadcast %cst_123 : f32 to vector<16x128xf32>
    %331 = arith.maximumf %329, %330 : vector<16x128xf32>
    %cst_124 = arith.constant 1.000000e+00 : f32
    %332 = vector.broadcast %cst_124 : f32 to vector<1x128xf32>
    %333 = arith.addf %297, %332 : vector<1x128xf32>
    %cst_125 = arith.constant 1.600000e+01 : f32
    %334 = vector.broadcast %cst_125 : f32 to vector<1x128xf32>
    %335 = arith.mulf %333, %334 : vector<1x128xf32>
    %cst_126 = arith.constant 1.000000e+00 : f32
    %336 = vector.broadcast %cst_126 : f32 to vector<1x128xf32>
    %337 = arith.subf %335, %336 : vector<1x128xf32>
    %cst_127 = arith.constant 5.000000e-01 : f32
    %338 = vector.broadcast %cst_127 : f32 to vector<1x128xf32>
    %339 = arith.mulf %337, %338 : vector<1x128xf32>
    %340 = vector.broadcast %339 : vector<1x128xf32> to vector<16x128xf32>
    %341 = vector.broadcast %12 : vector<16x1xf32> to vector<16x128xf32>
    %342 = arith.subf %340, %341 : vector<16x128xf32>
    %343 = math.absf %342 : vector<16x128xf32>
    %cst_128 = arith.constant 1.000000e+00 : f32
    %344 = vector.broadcast %cst_128 : f32 to vector<16x128xf32>
    %345 = arith.subf %344, %343 : vector<16x128xf32>
    %cst_129 = arith.constant 0.000000e+00 : f32
    %346 = vector.broadcast %cst_129 : f32 to vector<16x128xf32>
    %347 = arith.maximumf %345, %346 : vector<16x128xf32>
    %cst_130 = arith.constant 1.000000e+00 : f32
    %348 = vector.broadcast %cst_130 : f32 to vector<1x128xf32>
    %349 = arith.addf %298, %348 : vector<1x128xf32>
    %cst_131 = arith.constant 1.600000e+01 : f32
    %350 = vector.broadcast %cst_131 : f32 to vector<1x128xf32>
    %351 = arith.mulf %349, %350 : vector<1x128xf32>
    %cst_132 = arith.constant 1.000000e+00 : f32
    %352 = vector.broadcast %cst_132 : f32 to vector<1x128xf32>
    %353 = arith.subf %351, %352 : vector<1x128xf32>
    %cst_133 = arith.constant 5.000000e-01 : f32
    %354 = vector.broadcast %cst_133 : f32 to vector<1x128xf32>
    %355 = arith.mulf %353, %354 : vector<1x128xf32>
    %356 = vector.broadcast %355 : vector<1x128xf32> to vector<16x128xf32>
    %357 = vector.broadcast %12 : vector<16x1xf32> to vector<16x128xf32>
    %358 = arith.subf %356, %357 : vector<16x128xf32>
    %359 = math.absf %358 : vector<16x128xf32>
    %cst_134 = arith.constant 1.000000e+00 : f32
    %360 = vector.broadcast %cst_134 : f32 to vector<16x128xf32>
    %361 = arith.subf %360, %359 : vector<16x128xf32>
    %cst_135 = arith.constant 0.000000e+00 : f32
    %362 = vector.broadcast %cst_135 : f32 to vector<16x128xf32>
    %363 = arith.maximumf %361, %362 : vector<16x128xf32>
    %364 = arith.truncf %315 : vector<16x128xf32> to vector<16x128xbf16>
    %cst_136 = arith.constant dense<0.000000e+00> : vector<64x128xf32>
    %365 = tpu.matmul %4, %364, %cst_136 {dimension_numbers = #tpu.dot_dimension_numbers<[1], [0], [0], [1], [0, 0, 1, 1], [], []>} : vector<64x16xbf16>, vector<16x128xbf16>, vector<64x128xf32> -> vector<64x128xf32>
    %366 = vector.shape_cast %365 : vector<64x128xf32> to vector<4x16x128xf32>
    %367 = vector.shape_cast %347 : vector<16x128xf32> to vector<1x16x128xf32>
    %368 = vector.broadcast %367 : vector<1x16x128xf32> to vector<4x16x128xf32>
    %369 = arith.mulf %366, %368 : vector<4x16x128xf32>
    %cst_137 = arith.constant dense<0.000000e+00> : vector<4x128xf32>
    %370 = vector.multi_reduction <add>, %369, %cst_137 [1] : vector<4x16x128xf32> to vector<4x128xf32>
    %371 = arith.truncf %315 : vector<16x128xf32> to vector<16x128xbf16>
    %cst_138 = arith.constant dense<0.000000e+00> : vector<64x128xf32>
    %372 = tpu.matmul %6, %371, %cst_138 {dimension_numbers = #tpu.dot_dimension_numbers<[1], [0], [0], [1], [0, 0, 1, 1], [], []>} : vector<64x16xbf16>, vector<16x128xbf16>, vector<64x128xf32> -> vector<64x128xf32>
    %373 = vector.shape_cast %372 : vector<64x128xf32> to vector<4x16x128xf32>
    %374 = vector.shape_cast %363 : vector<16x128xf32> to vector<1x16x128xf32>
    %375 = vector.broadcast %374 : vector<1x16x128xf32> to vector<4x16x128xf32>
    %376 = arith.mulf %373, %375 : vector<4x16x128xf32>
    %cst_139 = arith.constant dense<0.000000e+00> : vector<4x128xf32>
    %377 = vector.multi_reduction <add>, %376, %cst_139 [1] : vector<4x16x128xf32> to vector<4x128xf32>
    %378 = arith.truncf %331 : vector<16x128xf32> to vector<16x128xbf16>
    %cst_140 = arith.constant dense<0.000000e+00> : vector<64x128xf32>
    %379 = tpu.matmul %8, %378, %cst_140 {dimension_numbers = #tpu.dot_dimension_numbers<[1], [0], [0], [1], [0, 0, 1, 1], [], []>} : vector<64x16xbf16>, vector<16x128xbf16>, vector<64x128xf32> -> vector<64x128xf32>
    %380 = vector.shape_cast %379 : vector<64x128xf32> to vector<4x16x128xf32>
    %381 = vector.shape_cast %363 : vector<16x128xf32> to vector<1x16x128xf32>
    %382 = vector.broadcast %381 : vector<1x16x128xf32> to vector<4x16x128xf32>
    %383 = arith.mulf %380, %382 : vector<4x16x128xf32>
    %cst_141 = arith.constant dense<0.000000e+00> : vector<4x128xf32>
    %384 = vector.multi_reduction <add>, %383, %cst_141 [1] : vector<4x16x128xf32> to vector<4x128xf32>
    %cst_142 = arith.constant 0.000000e+00 : f32
    %385 = vector.broadcast %cst_142 : f32 to vector<1x128xf32>
    %386 = arith.subf %385, %299 : vector<1x128xf32>
    %387 = vector.extract_strided_slice %370 {offsets = [0, 0], sizes = [1, 128], strides = [1, 1]} : vector<4x128xf32> to vector<1x128xf32>
    %cst_143 = arith.constant 0.000000e+00 : f32
    %388 = vector.broadcast %cst_143 : f32 to vector<1x128xf32>
    %389 = arith.maximumf %387, %388 : vector<1x128xf32>
    %390 = arith.mulf %386, %389 : vector<1x128xf32>
    %391 = math.exp %390 : vector<1x128xf32>
    %cst_144 = arith.constant 1.000000e+00 : f32
    %392 = vector.broadcast %cst_144 : f32 to vector<1x128xf32>
    %393 = arith.subf %392, %391 : vector<1x128xf32>
    %cst_145 = arith.constant 0.000000e+00 : f32
    %394 = vector.broadcast %cst_145 : f32 to vector<1x128xf32>
    %395 = arith.subf %394, %299 : vector<1x128xf32>
    %396 = vector.extract_strided_slice %377 {offsets = [0, 0], sizes = [1, 128], strides = [1, 1]} : vector<4x128xf32> to vector<1x128xf32>
    %cst_146 = arith.constant 0.000000e+00 : f32
    %397 = vector.broadcast %cst_146 : f32 to vector<1x128xf32>
    %398 = arith.maximumf %396, %397 : vector<1x128xf32>
    %399 = arith.mulf %395, %398 : vector<1x128xf32>
    %400 = math.exp %399 : vector<1x128xf32>
    %cst_147 = arith.constant 1.000000e+00 : f32
    %401 = vector.broadcast %cst_147 : f32 to vector<1x128xf32>
    %402 = arith.subf %401, %400 : vector<1x128xf32>
    %403 = arith.addf %393, %402 : vector<1x128xf32>
    %cst_148 = arith.constant 0.000000e+00 : f32
    %404 = vector.broadcast %cst_148 : f32 to vector<1x128xf32>
    %405 = arith.subf %404, %299 : vector<1x128xf32>
    %406 = vector.extract_strided_slice %384 {offsets = [0, 0], sizes = [1, 128], strides = [1, 1]} : vector<4x128xf32> to vector<1x128xf32>
    %cst_149 = arith.constant 0.000000e+00 : f32
    %407 = vector.broadcast %cst_149 : f32 to vector<1x128xf32>
    %408 = arith.maximumf %406, %407 : vector<1x128xf32>
    %409 = arith.mulf %405, %408 : vector<1x128xf32>
    %410 = math.exp %409 : vector<1x128xf32>
    %cst_150 = arith.constant 1.000000e+00 : f32
    %411 = vector.broadcast %cst_150 : f32 to vector<1x128xf32>
    %412 = arith.subf %411, %410 : vector<1x128xf32>
    %413 = arith.addf %403, %412 : vector<1x128xf32>
    %cst_151 = arith.constant 0.333333343 : f32
    %414 = vector.broadcast %cst_151 : f32 to vector<1x128xf32>
    %415 = arith.mulf %413, %414 : vector<1x128xf32>
    %416 = arith.mulf %415, %290 : vector<1x128xf32>
    %417 = vector.broadcast %416 : vector<1x128xf32> to vector<4x128xf32>
    %418 = arith.mulf %417, %370 : vector<4x128xf32>
    %419 = arith.addf %281, %418 : vector<4x128xf32>
    %420 = vector.broadcast %416 : vector<1x128xf32> to vector<4x128xf32>
    %421 = arith.mulf %420, %377 : vector<4x128xf32>
    %422 = arith.addf %284, %421 : vector<4x128xf32>
    %423 = vector.broadcast %416 : vector<1x128xf32> to vector<4x128xf32>
    %424 = arith.mulf %423, %384 : vector<4x128xf32>
    %425 = arith.addf %287, %424 : vector<4x128xf32>
    %cst_152 = arith.constant 1.000000e+00 : f32
    %426 = vector.broadcast %cst_152 : f32 to vector<1x128xf32>
    %427 = arith.subf %426, %415 : vector<1x128xf32>
    %428 = arith.mulf %290, %427 : vector<1x128xf32>
    %cst_153 = arith.constant 1.000000e+00 : f32
    %429 = vector.broadcast %cst_153 : f32 to vector<1x128xf32>
    %430 = arith.subf %429, %415 : vector<1x128xf32>
    %431 = arith.mulf %293, %430 : vector<1x128xf32>
    %c0_154 = arith.constant 0 : index
    %c3 = arith.constant 3 : index
    %c0_155 = arith.constant 0 : index
    %c0_156 = arith.constant 0 : index
    %432 = vector.load %arg3[%c0_154, %c3, %c0_155, %c0_156] : memref<1x8x4x128xf32, #tpu.memory_space<vmem>>, vector<1x1x4x128xf32>
    %433 = vector.shape_cast %432 : vector<1x1x4x128xf32> to vector<4x128xf32>
    %434 = vector.extract_strided_slice %433 {offsets = [0, 0], sizes = [1, 128], strides = [1, 1]} : vector<4x128xf32> to vector<1x128xf32>
    %435 = vector.extract_strided_slice %433 {offsets = [1, 0], sizes = [1, 128], strides = [1, 1]} : vector<4x128xf32> to vector<1x128xf32>
    %436 = vector.extract_strided_slice %433 {offsets = [2, 0], sizes = [1, 128], strides = [1, 1]} : vector<4x128xf32> to vector<1x128xf32>
    %437 = vector.extract_strided_slice %433 {offsets = [3, 0], sizes = [1, 128], strides = [1, 1]} : vector<4x128xf32> to vector<1x128xf32>
    %cst_157 = arith.constant 1.000000e+00 : f32
    %438 = vector.broadcast %cst_157 : f32 to vector<1x128xf32>
    %439 = arith.addf %434, %438 : vector<1x128xf32>
    %cst_158 = arith.constant 1.600000e+01 : f32
    %440 = vector.broadcast %cst_158 : f32 to vector<1x128xf32>
    %441 = arith.mulf %439, %440 : vector<1x128xf32>
    %cst_159 = arith.constant 1.000000e+00 : f32
    %442 = vector.broadcast %cst_159 : f32 to vector<1x128xf32>
    %443 = arith.subf %441, %442 : vector<1x128xf32>
    %cst_160 = arith.constant 5.000000e-01 : f32
    %444 = vector.broadcast %cst_160 : f32 to vector<1x128xf32>
    %445 = arith.mulf %443, %444 : vector<1x128xf32>
    %446 = vector.broadcast %445 : vector<1x128xf32> to vector<16x128xf32>
    %447 = vector.broadcast %10 : vector<16x1xf32> to vector<16x128xf32>
    %448 = arith.subf %446, %447 : vector<16x128xf32>
    %449 = math.absf %448 : vector<16x128xf32>
    %cst_161 = arith.constant 1.000000e+00 : f32
    %450 = vector.broadcast %cst_161 : f32 to vector<16x128xf32>
    %451 = arith.subf %450, %449 : vector<16x128xf32>
    %cst_162 = arith.constant 0.000000e+00 : f32
    %452 = vector.broadcast %cst_162 : f32 to vector<16x128xf32>
    %453 = arith.maximumf %451, %452 : vector<16x128xf32>
    %cst_163 = arith.constant 1.000000e+00 : f32
    %454 = vector.broadcast %cst_163 : f32 to vector<1x128xf32>
    %455 = arith.addf %435, %454 : vector<1x128xf32>
    %cst_164 = arith.constant 1.600000e+01 : f32
    %456 = vector.broadcast %cst_164 : f32 to vector<1x128xf32>
    %457 = arith.mulf %455, %456 : vector<1x128xf32>
    %cst_165 = arith.constant 1.000000e+00 : f32
    %458 = vector.broadcast %cst_165 : f32 to vector<1x128xf32>
    %459 = arith.subf %457, %458 : vector<1x128xf32>
    %cst_166 = arith.constant 5.000000e-01 : f32
    %460 = vector.broadcast %cst_166 : f32 to vector<1x128xf32>
    %461 = arith.mulf %459, %460 : vector<1x128xf32>
    %462 = vector.broadcast %461 : vector<1x128xf32> to vector<16x128xf32>
    %463 = vector.broadcast %10 : vector<16x1xf32> to vector<16x128xf32>
    %464 = arith.subf %462, %463 : vector<16x128xf32>
    %465 = math.absf %464 : vector<16x128xf32>
    %cst_167 = arith.constant 1.000000e+00 : f32
    %466 = vector.broadcast %cst_167 : f32 to vector<16x128xf32>
    %467 = arith.subf %466, %465 : vector<16x128xf32>
    %cst_168 = arith.constant 0.000000e+00 : f32
    %468 = vector.broadcast %cst_168 : f32 to vector<16x128xf32>
    %469 = arith.maximumf %467, %468 : vector<16x128xf32>
    %cst_169 = arith.constant 1.000000e+00 : f32
    %470 = vector.broadcast %cst_169 : f32 to vector<1x128xf32>
    %471 = arith.addf %435, %470 : vector<1x128xf32>
    %cst_170 = arith.constant 1.600000e+01 : f32
    %472 = vector.broadcast %cst_170 : f32 to vector<1x128xf32>
    %473 = arith.mulf %471, %472 : vector<1x128xf32>
    %cst_171 = arith.constant 1.000000e+00 : f32
    %474 = vector.broadcast %cst_171 : f32 to vector<1x128xf32>
    %475 = arith.subf %473, %474 : vector<1x128xf32>
    %cst_172 = arith.constant 5.000000e-01 : f32
    %476 = vector.broadcast %cst_172 : f32 to vector<1x128xf32>
    %477 = arith.mulf %475, %476 : vector<1x128xf32>
    %478 = vector.broadcast %477 : vector<1x128xf32> to vector<16x128xf32>
    %479 = vector.broadcast %12 : vector<16x1xf32> to vector<16x128xf32>
    %480 = arith.subf %478, %479 : vector<16x128xf32>
    %481 = math.absf %480 : vector<16x128xf32>
    %cst_173 = arith.constant 1.000000e+00 : f32
    %482 = vector.broadcast %cst_173 : f32 to vector<16x128xf32>
    %483 = arith.subf %482, %481 : vector<16x128xf32>
    %cst_174 = arith.constant 0.000000e+00 : f32
    %484 = vector.broadcast %cst_174 : f32 to vector<16x128xf32>
    %485 = arith.maximumf %483, %484 : vector<16x128xf32>
    %cst_175 = arith.constant 1.000000e+00 : f32
    %486 = vector.broadcast %cst_175 : f32 to vector<1x128xf32>
    %487 = arith.addf %436, %486 : vector<1x128xf32>
    %cst_176 = arith.constant 1.600000e+01 : f32
    %488 = vector.broadcast %cst_176 : f32 to vector<1x128xf32>
    %489 = arith.mulf %487, %488 : vector<1x128xf32>
    %cst_177 = arith.constant 1.000000e+00 : f32
    %490 = vector.broadcast %cst_177 : f32 to vector<1x128xf32>
    %491 = arith.subf %489, %490 : vector<1x128xf32>
    %cst_178 = arith.constant 5.000000e-01 : f32
    %492 = vector.broadcast %cst_178 : f32 to vector<1x128xf32>
    %493 = arith.mulf %491, %492 : vector<1x128xf32>
    %494 = vector.broadcast %493 : vector<1x128xf32> to vector<16x128xf32>
    %495 = vector.broadcast %12 : vector<16x1xf32> to vector<16x128xf32>
    %496 = arith.subf %494, %495 : vector<16x128xf32>
    %497 = math.absf %496 : vector<16x128xf32>
    %cst_179 = arith.constant 1.000000e+00 : f32
    %498 = vector.broadcast %cst_179 : f32 to vector<16x128xf32>
    %499 = arith.subf %498, %497 : vector<16x128xf32>
    %cst_180 = arith.constant 0.000000e+00 : f32
    %500 = vector.broadcast %cst_180 : f32 to vector<16x128xf32>
    %501 = arith.maximumf %499, %500 : vector<16x128xf32>
    %502 = arith.truncf %453 : vector<16x128xf32> to vector<16x128xbf16>
    %cst_181 = arith.constant dense<0.000000e+00> : vector<64x128xf32>
    %503 = tpu.matmul %4, %502, %cst_181 {dimension_numbers = #tpu.dot_dimension_numbers<[1], [0], [0], [1], [0, 0, 1, 1], [], []>} : vector<64x16xbf16>, vector<16x128xbf16>, vector<64x128xf32> -> vector<64x128xf32>
    %504 = vector.shape_cast %503 : vector<64x128xf32> to vector<4x16x128xf32>
    %505 = vector.shape_cast %485 : vector<16x128xf32> to vector<1x16x128xf32>
    %506 = vector.broadcast %505 : vector<1x16x128xf32> to vector<4x16x128xf32>
    %507 = arith.mulf %504, %506 : vector<4x16x128xf32>
    %cst_182 = arith.constant dense<0.000000e+00> : vector<4x128xf32>
    %508 = vector.multi_reduction <add>, %507, %cst_182 [1] : vector<4x16x128xf32> to vector<4x128xf32>
    %509 = arith.truncf %453 : vector<16x128xf32> to vector<16x128xbf16>
    %cst_183 = arith.constant dense<0.000000e+00> : vector<64x128xf32>
    %510 = tpu.matmul %6, %509, %cst_183 {dimension_numbers = #tpu.dot_dimension_numbers<[1], [0], [0], [1], [0, 0, 1, 1], [], []>} : vector<64x16xbf16>, vector<16x128xbf16>, vector<64x128xf32> -> vector<64x128xf32>
    %511 = vector.shape_cast %510 : vector<64x128xf32> to vector<4x16x128xf32>
    %512 = vector.shape_cast %501 : vector<16x128xf32> to vector<1x16x128xf32>
    %513 = vector.broadcast %512 : vector<1x16x128xf32> to vector<4x16x128xf32>
    %514 = arith.mulf %511, %513 : vector<4x16x128xf32>
    %cst_184 = arith.constant dense<0.000000e+00> : vector<4x128xf32>
    %515 = vector.multi_reduction <add>, %514, %cst_184 [1] : vector<4x16x128xf32> to vector<4x128xf32>
    %516 = arith.truncf %469 : vector<16x128xf32> to vector<16x128xbf16>
    %cst_185 = arith.constant dense<0.000000e+00> : vector<64x128xf32>
    %517 = tpu.matmul %8, %516, %cst_185 {dimension_numbers = #tpu.dot_dimension_numbers<[1], [0], [0], [1], [0, 0, 1, 1], [], []>} : vector<64x16xbf16>, vector<16x128xbf16>, vector<64x128xf32> -> vector<64x128xf32>
    %518 = vector.shape_cast %517 : vector<64x128xf32> to vector<4x16x128xf32>
    %519 = vector.shape_cast %501 : vector<16x128xf32> to vector<1x16x128xf32>
    %520 = vector.broadcast %519 : vector<1x16x128xf32> to vector<4x16x128xf32>
    %521 = arith.mulf %518, %520 : vector<4x16x128xf32>
    %cst_186 = arith.constant dense<0.000000e+00> : vector<4x128xf32>
    %522 = vector.multi_reduction <add>, %521, %cst_186 [1] : vector<4x16x128xf32> to vector<4x128xf32>
    %cst_187 = arith.constant 0.000000e+00 : f32
    %523 = vector.broadcast %cst_187 : f32 to vector<1x128xf32>
    %524 = arith.subf %523, %437 : vector<1x128xf32>
    %525 = vector.extract_strided_slice %508 {offsets = [0, 0], sizes = [1, 128], strides = [1, 1]} : vector<4x128xf32> to vector<1x128xf32>
    %cst_188 = arith.constant 0.000000e+00 : f32
    %526 = vector.broadcast %cst_188 : f32 to vector<1x128xf32>
    %527 = arith.maximumf %525, %526 : vector<1x128xf32>
    %528 = arith.mulf %524, %527 : vector<1x128xf32>
    %529 = math.exp %528 : vector<1x128xf32>
    %cst_189 = arith.constant 1.000000e+00 : f32
    %530 = vector.broadcast %cst_189 : f32 to vector<1x128xf32>
    %531 = arith.subf %530, %529 : vector<1x128xf32>
    %cst_190 = arith.constant 0.000000e+00 : f32
    %532 = vector.broadcast %cst_190 : f32 to vector<1x128xf32>
    %533 = arith.subf %532, %437 : vector<1x128xf32>
    %534 = vector.extract_strided_slice %515 {offsets = [0, 0], sizes = [1, 128], strides = [1, 1]} : vector<4x128xf32> to vector<1x128xf32>
    %cst_191 = arith.constant 0.000000e+00 : f32
    %535 = vector.broadcast %cst_191 : f32 to vector<1x128xf32>
    %536 = arith.maximumf %534, %535 : vector<1x128xf32>
    %537 = arith.mulf %533, %536 : vector<1x128xf32>
    %538 = math.exp %537 : vector<1x128xf32>
    %cst_192 = arith.constant 1.000000e+00 : f32
    %539 = vector.broadcast %cst_192 : f32 to vector<1x128xf32>
    %540 = arith.subf %539, %538 : vector<1x128xf32>
    %541 = arith.addf %531, %540 : vector<1x128xf32>
    %cst_193 = arith.constant 0.000000e+00 : f32
    %542 = vector.broadcast %cst_193 : f32 to vector<1x128xf32>
    %543 = arith.subf %542, %437 : vector<1x128xf32>
    %544 = vector.extract_strided_slice %522 {offsets = [0, 0], sizes = [1, 128], strides = [1, 1]} : vector<4x128xf32> to vector<1x128xf32>
    %cst_194 = arith.constant 0.000000e+00 : f32
    %545 = vector.broadcast %cst_194 : f32 to vector<1x128xf32>
    %546 = arith.maximumf %544, %545 : vector<1x128xf32>
    %547 = arith.mulf %543, %546 : vector<1x128xf32>
    %548 = math.exp %547 : vector<1x128xf32>
    %cst_195 = arith.constant 1.000000e+00 : f32
    %549 = vector.broadcast %cst_195 : f32 to vector<1x128xf32>
    %550 = arith.subf %549, %548 : vector<1x128xf32>
    %551 = arith.addf %541, %550 : vector<1x128xf32>
    %cst_196 = arith.constant 0.333333343 : f32
    %552 = vector.broadcast %cst_196 : f32 to vector<1x128xf32>
    %553 = arith.mulf %551, %552 : vector<1x128xf32>
    %554 = arith.mulf %553, %428 : vector<1x128xf32>
    %555 = vector.broadcast %554 : vector<1x128xf32> to vector<4x128xf32>
    %556 = arith.mulf %555, %508 : vector<4x128xf32>
    %557 = arith.addf %419, %556 : vector<4x128xf32>
    %558 = vector.broadcast %554 : vector<1x128xf32> to vector<4x128xf32>
    %559 = arith.mulf %558, %515 : vector<4x128xf32>
    %560 = arith.addf %422, %559 : vector<4x128xf32>
    %561 = vector.broadcast %554 : vector<1x128xf32> to vector<4x128xf32>
    %562 = arith.mulf %561, %522 : vector<4x128xf32>
    %563 = arith.addf %425, %562 : vector<4x128xf32>
    %cst_197 = arith.constant 1.000000e+00 : f32
    %564 = vector.broadcast %cst_197 : f32 to vector<1x128xf32>
    %565 = arith.subf %564, %553 : vector<1x128xf32>
    %566 = arith.mulf %428, %565 : vector<1x128xf32>
    %cst_198 = arith.constant 1.000000e+00 : f32
    %567 = vector.broadcast %cst_198 : f32 to vector<1x128xf32>
    %568 = arith.subf %567, %553 : vector<1x128xf32>
    %569 = arith.mulf %431, %568 : vector<1x128xf32>
    %c0_199 = arith.constant 0 : index
    %c4 = arith.constant 4 : index
    %c0_200 = arith.constant 0 : index
    %c0_201 = arith.constant 0 : index
    %570 = vector.load %arg3[%c0_199, %c4, %c0_200, %c0_201] : memref<1x8x4x128xf32, #tpu.memory_space<vmem>>, vector<1x1x4x128xf32>
    %571 = vector.shape_cast %570 : vector<1x1x4x128xf32> to vector<4x128xf32>
    %572 = vector.extract_strided_slice %571 {offsets = [0, 0], sizes = [1, 128], strides = [1, 1]} : vector<4x128xf32> to vector<1x128xf32>
    %573 = vector.extract_strided_slice %571 {offsets = [1, 0], sizes = [1, 128], strides = [1, 1]} : vector<4x128xf32> to vector<1x128xf32>
    %574 = vector.extract_strided_slice %571 {offsets = [2, 0], sizes = [1, 128], strides = [1, 1]} : vector<4x128xf32> to vector<1x128xf32>
    %575 = vector.extract_strided_slice %571 {offsets = [3, 0], sizes = [1, 128], strides = [1, 1]} : vector<4x128xf32> to vector<1x128xf32>
    %cst_202 = arith.constant 1.000000e+00 : f32
    %576 = vector.broadcast %cst_202 : f32 to vector<1x128xf32>
    %577 = arith.addf %572, %576 : vector<1x128xf32>
    %cst_203 = arith.constant 1.600000e+01 : f32
    %578 = vector.broadcast %cst_203 : f32 to vector<1x128xf32>
    %579 = arith.mulf %577, %578 : vector<1x128xf32>
    %cst_204 = arith.constant 1.000000e+00 : f32
    %580 = vector.broadcast %cst_204 : f32 to vector<1x128xf32>
    %581 = arith.subf %579, %580 : vector<1x128xf32>
    %cst_205 = arith.constant 5.000000e-01 : f32
    %582 = vector.broadcast %cst_205 : f32 to vector<1x128xf32>
    %583 = arith.mulf %581, %582 : vector<1x128xf32>
    %584 = vector.broadcast %583 : vector<1x128xf32> to vector<16x128xf32>
    %585 = vector.broadcast %10 : vector<16x1xf32> to vector<16x128xf32>
    %586 = arith.subf %584, %585 : vector<16x128xf32>
    %587 = math.absf %586 : vector<16x128xf32>
    %cst_206 = arith.constant 1.000000e+00 : f32
    %588 = vector.broadcast %cst_206 : f32 to vector<16x128xf32>
    %589 = arith.subf %588, %587 : vector<16x128xf32>
    %cst_207 = arith.constant 0.000000e+00 : f32
    %590 = vector.broadcast %cst_207 : f32 to vector<16x128xf32>
    %591 = arith.maximumf %589, %590 : vector<16x128xf32>
    %cst_208 = arith.constant 1.000000e+00 : f32
    %592 = vector.broadcast %cst_208 : f32 to vector<1x128xf32>
    %593 = arith.addf %573, %592 : vector<1x128xf32>
    %cst_209 = arith.constant 1.600000e+01 : f32
    %594 = vector.broadcast %cst_209 : f32 to vector<1x128xf32>
    %595 = arith.mulf %593, %594 : vector<1x128xf32>
    %cst_210 = arith.constant 1.000000e+00 : f32
    %596 = vector.broadcast %cst_210 : f32 to vector<1x128xf32>
    %597 = arith.subf %595, %596 : vector<1x128xf32>
    %cst_211 = arith.constant 5.000000e-01 : f32
    %598 = vector.broadcast %cst_211 : f32 to vector<1x128xf32>
    %599 = arith.mulf %597, %598 : vector<1x128xf32>
    %600 = vector.broadcast %599 : vector<1x128xf32> to vector<16x128xf32>
    %601 = vector.broadcast %10 : vector<16x1xf32> to vector<16x128xf32>
    %602 = arith.subf %600, %601 : vector<16x128xf32>
    %603 = math.absf %602 : vector<16x128xf32>
    %cst_212 = arith.constant 1.000000e+00 : f32
    %604 = vector.broadcast %cst_212 : f32 to vector<16x128xf32>
    %605 = arith.subf %604, %603 : vector<16x128xf32>
    %cst_213 = arith.constant 0.000000e+00 : f32
    %606 = vector.broadcast %cst_213 : f32 to vector<16x128xf32>
    %607 = arith.maximumf %605, %606 : vector<16x128xf32>
    %cst_214 = arith.constant 1.000000e+00 : f32
    %608 = vector.broadcast %cst_214 : f32 to vector<1x128xf32>
    %609 = arith.addf %573, %608 : vector<1x128xf32>
    %cst_215 = arith.constant 1.600000e+01 : f32
    %610 = vector.broadcast %cst_215 : f32 to vector<1x128xf32>
    %611 = arith.mulf %609, %610 : vector<1x128xf32>
    %cst_216 = arith.constant 1.000000e+00 : f32
    %612 = vector.broadcast %cst_216 : f32 to vector<1x128xf32>
    %613 = arith.subf %611, %612 : vector<1x128xf32>
    %cst_217 = arith.constant 5.000000e-01 : f32
    %614 = vector.broadcast %cst_217 : f32 to vector<1x128xf32>
    %615 = arith.mulf %613, %614 : vector<1x128xf32>
    %616 = vector.broadcast %615 : vector<1x128xf32> to vector<16x128xf32>
    %617 = vector.broadcast %12 : vector<16x1xf32> to vector<16x128xf32>
    %618 = arith.subf %616, %617 : vector<16x128xf32>
    %619 = math.absf %618 : vector<16x128xf32>
    %cst_218 = arith.constant 1.000000e+00 : f32
    %620 = vector.broadcast %cst_218 : f32 to vector<16x128xf32>
    %621 = arith.subf %620, %619 : vector<16x128xf32>
    %cst_219 = arith.constant 0.000000e+00 : f32
    %622 = vector.broadcast %cst_219 : f32 to vector<16x128xf32>
    %623 = arith.maximumf %621, %622 : vector<16x128xf32>
    %cst_220 = arith.constant 1.000000e+00 : f32
    %624 = vector.broadcast %cst_220 : f32 to vector<1x128xf32>
    %625 = arith.addf %574, %624 : vector<1x128xf32>
    %cst_221 = arith.constant 1.600000e+01 : f32
    %626 = vector.broadcast %cst_221 : f32 to vector<1x128xf32>
    %627 = arith.mulf %625, %626 : vector<1x128xf32>
    %cst_222 = arith.constant 1.000000e+00 : f32
    %628 = vector.broadcast %cst_222 : f32 to vector<1x128xf32>
    %629 = arith.subf %627, %628 : vector<1x128xf32>
    %cst_223 = arith.constant 5.000000e-01 : f32
    %630 = vector.broadcast %cst_223 : f32 to vector<1x128xf32>
    %631 = arith.mulf %629, %630 : vector<1x128xf32>
    %632 = vector.broadcast %631 : vector<1x128xf32> to vector<16x128xf32>
    %633 = vector.broadcast %12 : vector<16x1xf32> to vector<16x128xf32>
    %634 = arith.subf %632, %633 : vector<16x128xf32>
    %635 = math.absf %634 : vector<16x128xf32>
    %cst_224 = arith.constant 1.000000e+00 : f32
    %636 = vector.broadcast %cst_224 : f32 to vector<16x128xf32>
    %637 = arith.subf %636, %635 : vector<16x128xf32>
    %cst_225 = arith.constant 0.000000e+00 : f32
    %638 = vector.broadcast %cst_225 : f32 to vector<16x128xf32>
    %639 = arith.maximumf %637, %638 : vector<16x128xf32>
    %640 = arith.truncf %591 : vector<16x128xf32> to vector<16x128xbf16>
    %cst_226 = arith.constant dense<0.000000e+00> : vector<64x128xf32>
    %641 = tpu.matmul %4, %640, %cst_226 {dimension_numbers = #tpu.dot_dimension_numbers<[1], [0], [0], [1], [0, 0, 1, 1], [], []>} : vector<64x16xbf16>, vector<16x128xbf16>, vector<64x128xf32> -> vector<64x128xf32>
    %642 = vector.shape_cast %641 : vector<64x128xf32> to vector<4x16x128xf32>
    %643 = vector.shape_cast %623 : vector<16x128xf32> to vector<1x16x128xf32>
    %644 = vector.broadcast %643 : vector<1x16x128xf32> to vector<4x16x128xf32>
    %645 = arith.mulf %642, %644 : vector<4x16x128xf32>
    %cst_227 = arith.constant dense<0.000000e+00> : vector<4x128xf32>
    %646 = vector.multi_reduction <add>, %645, %cst_227 [1] : vector<4x16x128xf32> to vector<4x128xf32>
    %647 = arith.truncf %591 : vector<16x128xf32> to vector<16x128xbf16>
    %cst_228 = arith.constant dense<0.000000e+00> : vector<64x128xf32>
    %648 = tpu.matmul %6, %647, %cst_228 {dimension_numbers = #tpu.dot_dimension_numbers<[1], [0], [0], [1], [0, 0, 1, 1], [], []>} : vector<64x16xbf16>, vector<16x128xbf16>, vector<64x128xf32> -> vector<64x128xf32>
    %649 = vector.shape_cast %648 : vector<64x128xf32> to vector<4x16x128xf32>
    %650 = vector.shape_cast %639 : vector<16x128xf32> to vector<1x16x128xf32>
    %651 = vector.broadcast %650 : vector<1x16x128xf32> to vector<4x16x128xf32>
    %652 = arith.mulf %649, %651 : vector<4x16x128xf32>
    %cst_229 = arith.constant dense<0.000000e+00> : vector<4x128xf32>
    %653 = vector.multi_reduction <add>, %652, %cst_229 [1] : vector<4x16x128xf32> to vector<4x128xf32>
    %654 = arith.truncf %607 : vector<16x128xf32> to vector<16x128xbf16>
    %cst_230 = arith.constant dense<0.000000e+00> : vector<64x128xf32>
    %655 = tpu.matmul %8, %654, %cst_230 {dimension_numbers = #tpu.dot_dimension_numbers<[1], [0], [0], [1], [0, 0, 1, 1], [], []>} : vector<64x16xbf16>, vector<16x128xbf16>, vector<64x128xf32> -> vector<64x128xf32>
    %656 = vector.shape_cast %655 : vector<64x128xf32> to vector<4x16x128xf32>
    %657 = vector.shape_cast %639 : vector<16x128xf32> to vector<1x16x128xf32>
    %658 = vector.broadcast %657 : vector<1x16x128xf32> to vector<4x16x128xf32>
    %659 = arith.mulf %656, %658 : vector<4x16x128xf32>
    %cst_231 = arith.constant dense<0.000000e+00> : vector<4x128xf32>
    %660 = vector.multi_reduction <add>, %659, %cst_231 [1] : vector<4x16x128xf32> to vector<4x128xf32>
    %cst_232 = arith.constant 0.000000e+00 : f32
    %661 = vector.broadcast %cst_232 : f32 to vector<1x128xf32>
    %662 = arith.subf %661, %575 : vector<1x128xf32>
    %663 = vector.extract_strided_slice %646 {offsets = [0, 0], sizes = [1, 128], strides = [1, 1]} : vector<4x128xf32> to vector<1x128xf32>
    %cst_233 = arith.constant 0.000000e+00 : f32
    %664 = vector.broadcast %cst_233 : f32 to vector<1x128xf32>
    %665 = arith.maximumf %663, %664 : vector<1x128xf32>
    %666 = arith.mulf %662, %665 : vector<1x128xf32>
    %667 = math.exp %666 : vector<1x128xf32>
    %cst_234 = arith.constant 1.000000e+00 : f32
    %668 = vector.broadcast %cst_234 : f32 to vector<1x128xf32>
    %669 = arith.subf %668, %667 : vector<1x128xf32>
    %cst_235 = arith.constant 0.000000e+00 : f32
    %670 = vector.broadcast %cst_235 : f32 to vector<1x128xf32>
    %671 = arith.subf %670, %575 : vector<1x128xf32>
    %672 = vector.extract_strided_slice %653 {offsets = [0, 0], sizes = [1, 128], strides = [1, 1]} : vector<4x128xf32> to vector<1x128xf32>
    %cst_236 = arith.constant 0.000000e+00 : f32
    %673 = vector.broadcast %cst_236 : f32 to vector<1x128xf32>
    %674 = arith.maximumf %672, %673 : vector<1x128xf32>
    %675 = arith.mulf %671, %674 : vector<1x128xf32>
    %676 = math.exp %675 : vector<1x128xf32>
    %cst_237 = arith.constant 1.000000e+00 : f32
    %677 = vector.broadcast %cst_237 : f32 to vector<1x128xf32>
    %678 = arith.subf %677, %676 : vector<1x128xf32>
    %679 = arith.addf %669, %678 : vector<1x128xf32>
    %cst_238 = arith.constant 0.000000e+00 : f32
    %680 = vector.broadcast %cst_238 : f32 to vector<1x128xf32>
    %681 = arith.subf %680, %575 : vector<1x128xf32>
    %682 = vector.extract_strided_slice %660 {offsets = [0, 0], sizes = [1, 128], strides = [1, 1]} : vector<4x128xf32> to vector<1x128xf32>
    %cst_239 = arith.constant 0.000000e+00 : f32
    %683 = vector.broadcast %cst_239 : f32 to vector<1x128xf32>
    %684 = arith.maximumf %682, %683 : vector<1x128xf32>
    %685 = arith.mulf %681, %684 : vector<1x128xf32>
    %686 = math.exp %685 : vector<1x128xf32>
    %cst_240 = arith.constant 1.000000e+00 : f32
    %687 = vector.broadcast %cst_240 : f32 to vector<1x128xf32>
    %688 = arith.subf %687, %686 : vector<1x128xf32>
    %689 = arith.addf %679, %688 : vector<1x128xf32>
    %cst_241 = arith.constant 0.333333343 : f32
    %690 = vector.broadcast %cst_241 : f32 to vector<1x128xf32>
    %691 = arith.mulf %689, %690 : vector<1x128xf32>
    %692 = arith.mulf %691, %566 : vector<1x128xf32>
    %693 = vector.broadcast %692 : vector<1x128xf32> to vector<4x128xf32>
    %694 = arith.mulf %693, %646 : vector<4x128xf32>
    %695 = arith.addf %557, %694 : vector<4x128xf32>
    %696 = vector.broadcast %692 : vector<1x128xf32> to vector<4x128xf32>
    %697 = arith.mulf %696, %653 : vector<4x128xf32>
    %698 = arith.addf %560, %697 : vector<4x128xf32>
    %699 = vector.broadcast %692 : vector<1x128xf32> to vector<4x128xf32>
    %700 = arith.mulf %699, %660 : vector<4x128xf32>
    %701 = arith.addf %563, %700 : vector<4x128xf32>
    %cst_242 = arith.constant 1.000000e+00 : f32
    %702 = vector.broadcast %cst_242 : f32 to vector<1x128xf32>
    %703 = arith.subf %702, %691 : vector<1x128xf32>
    %704 = arith.mulf %566, %703 : vector<1x128xf32>
    %cst_243 = arith.constant 1.000000e+00 : f32
    %705 = vector.broadcast %cst_243 : f32 to vector<1x128xf32>
    %706 = arith.subf %705, %691 : vector<1x128xf32>
    %707 = arith.mulf %569, %706 : vector<1x128xf32>
    %c0_244 = arith.constant 0 : index
    %c5 = arith.constant 5 : index
    %c0_245 = arith.constant 0 : index
    %c0_246 = arith.constant 0 : index
    %708 = vector.load %arg3[%c0_244, %c5, %c0_245, %c0_246] : memref<1x8x4x128xf32, #tpu.memory_space<vmem>>, vector<1x1x4x128xf32>
    %709 = vector.shape_cast %708 : vector<1x1x4x128xf32> to vector<4x128xf32>
    %710 = vector.extract_strided_slice %709 {offsets = [0, 0], sizes = [1, 128], strides = [1, 1]} : vector<4x128xf32> to vector<1x128xf32>
    %711 = vector.extract_strided_slice %709 {offsets = [1, 0], sizes = [1, 128], strides = [1, 1]} : vector<4x128xf32> to vector<1x128xf32>
    %712 = vector.extract_strided_slice %709 {offsets = [2, 0], sizes = [1, 128], strides = [1, 1]} : vector<4x128xf32> to vector<1x128xf32>
    %713 = vector.extract_strided_slice %709 {offsets = [3, 0], sizes = [1, 128], strides = [1, 1]} : vector<4x128xf32> to vector<1x128xf32>
    %cst_247 = arith.constant 1.000000e+00 : f32
    %714 = vector.broadcast %cst_247 : f32 to vector<1x128xf32>
    %715 = arith.addf %710, %714 : vector<1x128xf32>
    %cst_248 = arith.constant 1.600000e+01 : f32
    %716 = vector.broadcast %cst_248 : f32 to vector<1x128xf32>
    %717 = arith.mulf %715, %716 : vector<1x128xf32>
    %cst_249 = arith.constant 1.000000e+00 : f32
    %718 = vector.broadcast %cst_249 : f32 to vector<1x128xf32>
    %719 = arith.subf %717, %718 : vector<1x128xf32>
    %cst_250 = arith.constant 5.000000e-01 : f32
    %720 = vector.broadcast %cst_250 : f32 to vector<1x128xf32>
    %721 = arith.mulf %719, %720 : vector<1x128xf32>
    %722 = vector.broadcast %721 : vector<1x128xf32> to vector<16x128xf32>
    %723 = vector.broadcast %10 : vector<16x1xf32> to vector<16x128xf32>
    %724 = arith.subf %722, %723 : vector<16x128xf32>
    %725 = math.absf %724 : vector<16x128xf32>
    %cst_251 = arith.constant 1.000000e+00 : f32
    %726 = vector.broadcast %cst_251 : f32 to vector<16x128xf32>
    %727 = arith.subf %726, %725 : vector<16x128xf32>
    %cst_252 = arith.constant 0.000000e+00 : f32
    %728 = vector.broadcast %cst_252 : f32 to vector<16x128xf32>
    %729 = arith.maximumf %727, %728 : vector<16x128xf32>
    %cst_253 = arith.constant 1.000000e+00 : f32
    %730 = vector.broadcast %cst_253 : f32 to vector<1x128xf32>
    %731 = arith.addf %711, %730 : vector<1x128xf32>
    %cst_254 = arith.constant 1.600000e+01 : f32
    %732 = vector.broadcast %cst_254 : f32 to vector<1x128xf32>
    %733 = arith.mulf %731, %732 : vector<1x128xf32>
    %cst_255 = arith.constant 1.000000e+00 : f32
    %734 = vector.broadcast %cst_255 : f32 to vector<1x128xf32>
    %735 = arith.subf %733, %734 : vector<1x128xf32>
    %cst_256 = arith.constant 5.000000e-01 : f32
    %736 = vector.broadcast %cst_256 : f32 to vector<1x128xf32>
    %737 = arith.mulf %735, %736 : vector<1x128xf32>
    %738 = vector.broadcast %737 : vector<1x128xf32> to vector<16x128xf32>
    %739 = vector.broadcast %10 : vector<16x1xf32> to vector<16x128xf32>
    %740 = arith.subf %738, %739 : vector<16x128xf32>
    %741 = math.absf %740 : vector<16x128xf32>
    %cst_257 = arith.constant 1.000000e+00 : f32
    %742 = vector.broadcast %cst_257 : f32 to vector<16x128xf32>
    %743 = arith.subf %742, %741 : vector<16x128xf32>
    %cst_258 = arith.constant 0.000000e+00 : f32
    %744 = vector.broadcast %cst_258 : f32 to vector<16x128xf32>
    %745 = arith.maximumf %743, %744 : vector<16x128xf32>
    %cst_259 = arith.constant 1.000000e+00 : f32
    %746 = vector.broadcast %cst_259 : f32 to vector<1x128xf32>
    %747 = arith.addf %711, %746 : vector<1x128xf32>
    %cst_260 = arith.constant 1.600000e+01 : f32
    %748 = vector.broadcast %cst_260 : f32 to vector<1x128xf32>
    %749 = arith.mulf %747, %748 : vector<1x128xf32>
    %cst_261 = arith.constant 1.000000e+00 : f32
    %750 = vector.broadcast %cst_261 : f32 to vector<1x128xf32>
    %751 = arith.subf %749, %750 : vector<1x128xf32>
    %cst_262 = arith.constant 5.000000e-01 : f32
    %752 = vector.broadcast %cst_262 : f32 to vector<1x128xf32>
    %753 = arith.mulf %751, %752 : vector<1x128xf32>
    %754 = vector.broadcast %753 : vector<1x128xf32> to vector<16x128xf32>
    %755 = vector.broadcast %12 : vector<16x1xf32> to vector<16x128xf32>
    %756 = arith.subf %754, %755 : vector<16x128xf32>
    %757 = math.absf %756 : vector<16x128xf32>
    %cst_263 = arith.constant 1.000000e+00 : f32
    %758 = vector.broadcast %cst_263 : f32 to vector<16x128xf32>
    %759 = arith.subf %758, %757 : vector<16x128xf32>
    %cst_264 = arith.constant 0.000000e+00 : f32
    %760 = vector.broadcast %cst_264 : f32 to vector<16x128xf32>
    %761 = arith.maximumf %759, %760 : vector<16x128xf32>
    %cst_265 = arith.constant 1.000000e+00 : f32
    %762 = vector.broadcast %cst_265 : f32 to vector<1x128xf32>
    %763 = arith.addf %712, %762 : vector<1x128xf32>
    %cst_266 = arith.constant 1.600000e+01 : f32
    %764 = vector.broadcast %cst_266 : f32 to vector<1x128xf32>
    %765 = arith.mulf %763, %764 : vector<1x128xf32>
    %cst_267 = arith.constant 1.000000e+00 : f32
    %766 = vector.broadcast %cst_267 : f32 to vector<1x128xf32>
    %767 = arith.subf %765, %766 : vector<1x128xf32>
    %cst_268 = arith.constant 5.000000e-01 : f32
    %768 = vector.broadcast %cst_268 : f32 to vector<1x128xf32>
    %769 = arith.mulf %767, %768 : vector<1x128xf32>
    %770 = vector.broadcast %769 : vector<1x128xf32> to vector<16x128xf32>
    %771 = vector.broadcast %12 : vector<16x1xf32> to vector<16x128xf32>
    %772 = arith.subf %770, %771 : vector<16x128xf32>
    %773 = math.absf %772 : vector<16x128xf32>
    %cst_269 = arith.constant 1.000000e+00 : f32
    %774 = vector.broadcast %cst_269 : f32 to vector<16x128xf32>
    %775 = arith.subf %774, %773 : vector<16x128xf32>
    %cst_270 = arith.constant 0.000000e+00 : f32
    %776 = vector.broadcast %cst_270 : f32 to vector<16x128xf32>
    %777 = arith.maximumf %775, %776 : vector<16x128xf32>
    %778 = arith.truncf %729 : vector<16x128xf32> to vector<16x128xbf16>
    %cst_271 = arith.constant dense<0.000000e+00> : vector<64x128xf32>
    %779 = tpu.matmul %4, %778, %cst_271 {dimension_numbers = #tpu.dot_dimension_numbers<[1], [0], [0], [1], [0, 0, 1, 1], [], []>} : vector<64x16xbf16>, vector<16x128xbf16>, vector<64x128xf32> -> vector<64x128xf32>
    %780 = vector.shape_cast %779 : vector<64x128xf32> to vector<4x16x128xf32>
    %781 = vector.shape_cast %761 : vector<16x128xf32> to vector<1x16x128xf32>
    %782 = vector.broadcast %781 : vector<1x16x128xf32> to vector<4x16x128xf32>
    %783 = arith.mulf %780, %782 : vector<4x16x128xf32>
    %cst_272 = arith.constant dense<0.000000e+00> : vector<4x128xf32>
    %784 = vector.multi_reduction <add>, %783, %cst_272 [1] : vector<4x16x128xf32> to vector<4x128xf32>
    %785 = arith.truncf %729 : vector<16x128xf32> to vector<16x128xbf16>
    %cst_273 = arith.constant dense<0.000000e+00> : vector<64x128xf32>
    %786 = tpu.matmul %6, %785, %cst_273 {dimension_numbers = #tpu.dot_dimension_numbers<[1], [0], [0], [1], [0, 0, 1, 1], [], []>} : vector<64x16xbf16>, vector<16x128xbf16>, vector<64x128xf32> -> vector<64x128xf32>
    %787 = vector.shape_cast %786 : vector<64x128xf32> to vector<4x16x128xf32>
    %788 = vector.shape_cast %777 : vector<16x128xf32> to vector<1x16x128xf32>
    %789 = vector.broadcast %788 : vector<1x16x128xf32> to vector<4x16x128xf32>
    %790 = arith.mulf %787, %789 : vector<4x16x128xf32>
    %cst_274 = arith.constant dense<0.000000e+00> : vector<4x128xf32>
    %791 = vector.multi_reduction <add>, %790, %cst_274 [1] : vector<4x16x128xf32> to vector<4x128xf32>
    %792 = arith.truncf %745 : vector<16x128xf32> to vector<16x128xbf16>
    %cst_275 = arith.constant dense<0.000000e+00> : vector<64x128xf32>
    %793 = tpu.matmul %8, %792, %cst_275 {dimension_numbers = #tpu.dot_dimension_numbers<[1], [0], [0], [1], [0, 0, 1, 1], [], []>} : vector<64x16xbf16>, vector<16x128xbf16>, vector<64x128xf32> -> vector<64x128xf32>
    %794 = vector.shape_cast %793 : vector<64x128xf32> to vector<4x16x128xf32>
    %795 = vector.shape_cast %777 : vector<16x128xf32> to vector<1x16x128xf32>
    %796 = vector.broadcast %795 : vector<1x16x128xf32> to vector<4x16x128xf32>
    %797 = arith.mulf %794, %796 : vector<4x16x128xf32>
    %cst_276 = arith.constant dense<0.000000e+00> : vector<4x128xf32>
    %798 = vector.multi_reduction <add>, %797, %cst_276 [1] : vector<4x16x128xf32> to vector<4x128xf32>
    %cst_277 = arith.constant 0.000000e+00 : f32
    %799 = vector.broadcast %cst_277 : f32 to vector<1x128xf32>
    %800 = arith.subf %799, %713 : vector<1x128xf32>
    %801 = vector.extract_strided_slice %784 {offsets = [0, 0], sizes = [1, 128], strides = [1, 1]} : vector<4x128xf32> to vector<1x128xf32>
    %cst_278 = arith.constant 0.000000e+00 : f32
    %802 = vector.broadcast %cst_278 : f32 to vector<1x128xf32>
    %803 = arith.maximumf %801, %802 : vector<1x128xf32>
    %804 = arith.mulf %800, %803 : vector<1x128xf32>
    %805 = math.exp %804 : vector<1x128xf32>
    %cst_279 = arith.constant 1.000000e+00 : f32
    %806 = vector.broadcast %cst_279 : f32 to vector<1x128xf32>
    %807 = arith.subf %806, %805 : vector<1x128xf32>
    %cst_280 = arith.constant 0.000000e+00 : f32
    %808 = vector.broadcast %cst_280 : f32 to vector<1x128xf32>
    %809 = arith.subf %808, %713 : vector<1x128xf32>
    %810 = vector.extract_strided_slice %791 {offsets = [0, 0], sizes = [1, 128], strides = [1, 1]} : vector<4x128xf32> to vector<1x128xf32>
    %cst_281 = arith.constant 0.000000e+00 : f32
    %811 = vector.broadcast %cst_281 : f32 to vector<1x128xf32>
    %812 = arith.maximumf %810, %811 : vector<1x128xf32>
    %813 = arith.mulf %809, %812 : vector<1x128xf32>
    %814 = math.exp %813 : vector<1x128xf32>
    %cst_282 = arith.constant 1.000000e+00 : f32
    %815 = vector.broadcast %cst_282 : f32 to vector<1x128xf32>
    %816 = arith.subf %815, %814 : vector<1x128xf32>
    %817 = arith.addf %807, %816 : vector<1x128xf32>
    %cst_283 = arith.constant 0.000000e+00 : f32
    %818 = vector.broadcast %cst_283 : f32 to vector<1x128xf32>
    %819 = arith.subf %818, %713 : vector<1x128xf32>
    %820 = vector.extract_strided_slice %798 {offsets = [0, 0], sizes = [1, 128], strides = [1, 1]} : vector<4x128xf32> to vector<1x128xf32>
    %cst_284 = arith.constant 0.000000e+00 : f32
    %821 = vector.broadcast %cst_284 : f32 to vector<1x128xf32>
    %822 = arith.maximumf %820, %821 : vector<1x128xf32>
    %823 = arith.mulf %819, %822 : vector<1x128xf32>
    %824 = math.exp %823 : vector<1x128xf32>
    %cst_285 = arith.constant 1.000000e+00 : f32
    %825 = vector.broadcast %cst_285 : f32 to vector<1x128xf32>
    %826 = arith.subf %825, %824 : vector<1x128xf32>
    %827 = arith.addf %817, %826 : vector<1x128xf32>
    %cst_286 = arith.constant 0.333333343 : f32
    %828 = vector.broadcast %cst_286 : f32 to vector<1x128xf32>
    %829 = arith.mulf %827, %828 : vector<1x128xf32>
    %830 = arith.mulf %829, %704 : vector<1x128xf32>
    %831 = vector.broadcast %830 : vector<1x128xf32> to vector<4x128xf32>
    %832 = arith.mulf %831, %784 : vector<4x128xf32>
    %833 = arith.addf %695, %832 : vector<4x128xf32>
    %834 = vector.broadcast %830 : vector<1x128xf32> to vector<4x128xf32>
    %835 = arith.mulf %834, %791 : vector<4x128xf32>
    %836 = arith.addf %698, %835 : vector<4x128xf32>
    %837 = vector.broadcast %830 : vector<1x128xf32> to vector<4x128xf32>
    %838 = arith.mulf %837, %798 : vector<4x128xf32>
    %839 = arith.addf %701, %838 : vector<4x128xf32>
    %cst_287 = arith.constant 1.000000e+00 : f32
    %840 = vector.broadcast %cst_287 : f32 to vector<1x128xf32>
    %841 = arith.subf %840, %829 : vector<1x128xf32>
    %842 = arith.mulf %704, %841 : vector<1x128xf32>
    %cst_288 = arith.constant 1.000000e+00 : f32
    %843 = vector.broadcast %cst_288 : f32 to vector<1x128xf32>
    %844 = arith.subf %843, %829 : vector<1x128xf32>
    %845 = arith.mulf %707, %844 : vector<1x128xf32>
    %c0_289 = arith.constant 0 : index
    %c6 = arith.constant 6 : index
    %c0_290 = arith.constant 0 : index
    %c0_291 = arith.constant 0 : index
    %846 = vector.load %arg3[%c0_289, %c6, %c0_290, %c0_291] : memref<1x8x4x128xf32, #tpu.memory_space<vmem>>, vector<1x1x4x128xf32>
    %847 = vector.shape_cast %846 : vector<1x1x4x128xf32> to vector<4x128xf32>
    %848 = vector.extract_strided_slice %847 {offsets = [0, 0], sizes = [1, 128], strides = [1, 1]} : vector<4x128xf32> to vector<1x128xf32>
    %849 = vector.extract_strided_slice %847 {offsets = [1, 0], sizes = [1, 128], strides = [1, 1]} : vector<4x128xf32> to vector<1x128xf32>
    %850 = vector.extract_strided_slice %847 {offsets = [2, 0], sizes = [1, 128], strides = [1, 1]} : vector<4x128xf32> to vector<1x128xf32>
    %851 = vector.extract_strided_slice %847 {offsets = [3, 0], sizes = [1, 128], strides = [1, 1]} : vector<4x128xf32> to vector<1x128xf32>
    %cst_292 = arith.constant 1.000000e+00 : f32
    %852 = vector.broadcast %cst_292 : f32 to vector<1x128xf32>
    %853 = arith.addf %848, %852 : vector<1x128xf32>
    %cst_293 = arith.constant 1.600000e+01 : f32
    %854 = vector.broadcast %cst_293 : f32 to vector<1x128xf32>
    %855 = arith.mulf %853, %854 : vector<1x128xf32>
    %cst_294 = arith.constant 1.000000e+00 : f32
    %856 = vector.broadcast %cst_294 : f32 to vector<1x128xf32>
    %857 = arith.subf %855, %856 : vector<1x128xf32>
    %cst_295 = arith.constant 5.000000e-01 : f32
    %858 = vector.broadcast %cst_295 : f32 to vector<1x128xf32>
    %859 = arith.mulf %857, %858 : vector<1x128xf32>
    %860 = vector.broadcast %859 : vector<1x128xf32> to vector<16x128xf32>
    %861 = vector.broadcast %10 : vector<16x1xf32> to vector<16x128xf32>
    %862 = arith.subf %860, %861 : vector<16x128xf32>
    %863 = math.absf %862 : vector<16x128xf32>
    %cst_296 = arith.constant 1.000000e+00 : f32
    %864 = vector.broadcast %cst_296 : f32 to vector<16x128xf32>
    %865 = arith.subf %864, %863 : vector<16x128xf32>
    %cst_297 = arith.constant 0.000000e+00 : f32
    %866 = vector.broadcast %cst_297 : f32 to vector<16x128xf32>
    %867 = arith.maximumf %865, %866 : vector<16x128xf32>
    %cst_298 = arith.constant 1.000000e+00 : f32
    %868 = vector.broadcast %cst_298 : f32 to vector<1x128xf32>
    %869 = arith.addf %849, %868 : vector<1x128xf32>
    %cst_299 = arith.constant 1.600000e+01 : f32
    %870 = vector.broadcast %cst_299 : f32 to vector<1x128xf32>
    %871 = arith.mulf %869, %870 : vector<1x128xf32>
    %cst_300 = arith.constant 1.000000e+00 : f32
    %872 = vector.broadcast %cst_300 : f32 to vector<1x128xf32>
    %873 = arith.subf %871, %872 : vector<1x128xf32>
    %cst_301 = arith.constant 5.000000e-01 : f32
    %874 = vector.broadcast %cst_301 : f32 to vector<1x128xf32>
    %875 = arith.mulf %873, %874 : vector<1x128xf32>
    %876 = vector.broadcast %875 : vector<1x128xf32> to vector<16x128xf32>
    %877 = vector.broadcast %10 : vector<16x1xf32> to vector<16x128xf32>
    %878 = arith.subf %876, %877 : vector<16x128xf32>
    %879 = math.absf %878 : vector<16x128xf32>
    %cst_302 = arith.constant 1.000000e+00 : f32
    %880 = vector.broadcast %cst_302 : f32 to vector<16x128xf32>
    %881 = arith.subf %880, %879 : vector<16x128xf32>
    %cst_303 = arith.constant 0.000000e+00 : f32
    %882 = vector.broadcast %cst_303 : f32 to vector<16x128xf32>
    %883 = arith.maximumf %881, %882 : vector<16x128xf32>
    %cst_304 = arith.constant 1.000000e+00 : f32
    %884 = vector.broadcast %cst_304 : f32 to vector<1x128xf32>
    %885 = arith.addf %849, %884 : vector<1x128xf32>
    %cst_305 = arith.constant 1.600000e+01 : f32
    %886 = vector.broadcast %cst_305 : f32 to vector<1x128xf32>
    %887 = arith.mulf %885, %886 : vector<1x128xf32>
    %cst_306 = arith.constant 1.000000e+00 : f32
    %888 = vector.broadcast %cst_306 : f32 to vector<1x128xf32>
    %889 = arith.subf %887, %888 : vector<1x128xf32>
    %cst_307 = arith.constant 5.000000e-01 : f32
    %890 = vector.broadcast %cst_307 : f32 to vector<1x128xf32>
    %891 = arith.mulf %889, %890 : vector<1x128xf32>
    %892 = vector.broadcast %891 : vector<1x128xf32> to vector<16x128xf32>
    %893 = vector.broadcast %12 : vector<16x1xf32> to vector<16x128xf32>
    %894 = arith.subf %892, %893 : vector<16x128xf32>
    %895 = math.absf %894 : vector<16x128xf32>
    %cst_308 = arith.constant 1.000000e+00 : f32
    %896 = vector.broadcast %cst_308 : f32 to vector<16x128xf32>
    %897 = arith.subf %896, %895 : vector<16x128xf32>
    %cst_309 = arith.constant 0.000000e+00 : f32
    %898 = vector.broadcast %cst_309 : f32 to vector<16x128xf32>
    %899 = arith.maximumf %897, %898 : vector<16x128xf32>
    %cst_310 = arith.constant 1.000000e+00 : f32
    %900 = vector.broadcast %cst_310 : f32 to vector<1x128xf32>
    %901 = arith.addf %850, %900 : vector<1x128xf32>
    %cst_311 = arith.constant 1.600000e+01 : f32
    %902 = vector.broadcast %cst_311 : f32 to vector<1x128xf32>
    %903 = arith.mulf %901, %902 : vector<1x128xf32>
    %cst_312 = arith.constant 1.000000e+00 : f32
    %904 = vector.broadcast %cst_312 : f32 to vector<1x128xf32>
    %905 = arith.subf %903, %904 : vector<1x128xf32>
    %cst_313 = arith.constant 5.000000e-01 : f32
    %906 = vector.broadcast %cst_313 : f32 to vector<1x128xf32>
    %907 = arith.mulf %905, %906 : vector<1x128xf32>
    %908 = vector.broadcast %907 : vector<1x128xf32> to vector<16x128xf32>
    %909 = vector.broadcast %12 : vector<16x1xf32> to vector<16x128xf32>
    %910 = arith.subf %908, %909 : vector<16x128xf32>
    %911 = math.absf %910 : vector<16x128xf32>
    %cst_314 = arith.constant 1.000000e+00 : f32
    %912 = vector.broadcast %cst_314 : f32 to vector<16x128xf32>
    %913 = arith.subf %912, %911 : vector<16x128xf32>
    %cst_315 = arith.constant 0.000000e+00 : f32
    %914 = vector.broadcast %cst_315 : f32 to vector<16x128xf32>
    %915 = arith.maximumf %913, %914 : vector<16x128xf32>
    %916 = arith.truncf %867 : vector<16x128xf32> to vector<16x128xbf16>
    %cst_316 = arith.constant dense<0.000000e+00> : vector<64x128xf32>
    %917 = tpu.matmul %4, %916, %cst_316 {dimension_numbers = #tpu.dot_dimension_numbers<[1], [0], [0], [1], [0, 0, 1, 1], [], []>} : vector<64x16xbf16>, vector<16x128xbf16>, vector<64x128xf32> -> vector<64x128xf32>
    %918 = vector.shape_cast %917 : vector<64x128xf32> to vector<4x16x128xf32>
    %919 = vector.shape_cast %899 : vector<16x128xf32> to vector<1x16x128xf32>
    %920 = vector.broadcast %919 : vector<1x16x128xf32> to vector<4x16x128xf32>
    %921 = arith.mulf %918, %920 : vector<4x16x128xf32>
    %cst_317 = arith.constant dense<0.000000e+00> : vector<4x128xf32>
    %922 = vector.multi_reduction <add>, %921, %cst_317 [1] : vector<4x16x128xf32> to vector<4x128xf32>
    %923 = arith.truncf %867 : vector<16x128xf32> to vector<16x128xbf16>
    %cst_318 = arith.constant dense<0.000000e+00> : vector<64x128xf32>
    %924 = tpu.matmul %6, %923, %cst_318 {dimension_numbers = #tpu.dot_dimension_numbers<[1], [0], [0], [1], [0, 0, 1, 1], [], []>} : vector<64x16xbf16>, vector<16x128xbf16>, vector<64x128xf32> -> vector<64x128xf32>
    %925 = vector.shape_cast %924 : vector<64x128xf32> to vector<4x16x128xf32>
    %926 = vector.shape_cast %915 : vector<16x128xf32> to vector<1x16x128xf32>
    %927 = vector.broadcast %926 : vector<1x16x128xf32> to vector<4x16x128xf32>
    %928 = arith.mulf %925, %927 : vector<4x16x128xf32>
    %cst_319 = arith.constant dense<0.000000e+00> : vector<4x128xf32>
    %929 = vector.multi_reduction <add>, %928, %cst_319 [1] : vector<4x16x128xf32> to vector<4x128xf32>
    %930 = arith.truncf %883 : vector<16x128xf32> to vector<16x128xbf16>
    %cst_320 = arith.constant dense<0.000000e+00> : vector<64x128xf32>
    %931 = tpu.matmul %8, %930, %cst_320 {dimension_numbers = #tpu.dot_dimension_numbers<[1], [0], [0], [1], [0, 0, 1, 1], [], []>} : vector<64x16xbf16>, vector<16x128xbf16>, vector<64x128xf32> -> vector<64x128xf32>
    %932 = vector.shape_cast %931 : vector<64x128xf32> to vector<4x16x128xf32>
    %933 = vector.shape_cast %915 : vector<16x128xf32> to vector<1x16x128xf32>
    %934 = vector.broadcast %933 : vector<1x16x128xf32> to vector<4x16x128xf32>
    %935 = arith.mulf %932, %934 : vector<4x16x128xf32>
    %cst_321 = arith.constant dense<0.000000e+00> : vector<4x128xf32>
    %936 = vector.multi_reduction <add>, %935, %cst_321 [1] : vector<4x16x128xf32> to vector<4x128xf32>
    %cst_322 = arith.constant 0.000000e+00 : f32
    %937 = vector.broadcast %cst_322 : f32 to vector<1x128xf32>
    %938 = arith.subf %937, %851 : vector<1x128xf32>
    %939 = vector.extract_strided_slice %922 {offsets = [0, 0], sizes = [1, 128], strides = [1, 1]} : vector<4x128xf32> to vector<1x128xf32>
    %cst_323 = arith.constant 0.000000e+00 : f32
    %940 = vector.broadcast %cst_323 : f32 to vector<1x128xf32>
    %941 = arith.maximumf %939, %940 : vector<1x128xf32>
    %942 = arith.mulf %938, %941 : vector<1x128xf32>
    %943 = math.exp %942 : vector<1x128xf32>
    %cst_324 = arith.constant 1.000000e+00 : f32
    %944 = vector.broadcast %cst_324 : f32 to vector<1x128xf32>
    %945 = arith.subf %944, %943 : vector<1x128xf32>
    %cst_325 = arith.constant 0.000000e+00 : f32
    %946 = vector.broadcast %cst_325 : f32 to vector<1x128xf32>
    %947 = arith.subf %946, %851 : vector<1x128xf32>
    %948 = vector.extract_strided_slice %929 {offsets = [0, 0], sizes = [1, 128], strides = [1, 1]} : vector<4x128xf32> to vector<1x128xf32>
    %cst_326 = arith.constant 0.000000e+00 : f32
    %949 = vector.broadcast %cst_326 : f32 to vector<1x128xf32>
    %950 = arith.maximumf %948, %949 : vector<1x128xf32>
    %951 = arith.mulf %947, %950 : vector<1x128xf32>
    %952 = math.exp %951 : vector<1x128xf32>
    %cst_327 = arith.constant 1.000000e+00 : f32
    %953 = vector.broadcast %cst_327 : f32 to vector<1x128xf32>
    %954 = arith.subf %953, %952 : vector<1x128xf32>
    %955 = arith.addf %945, %954 : vector<1x128xf32>
    %cst_328 = arith.constant 0.000000e+00 : f32
    %956 = vector.broadcast %cst_328 : f32 to vector<1x128xf32>
    %957 = arith.subf %956, %851 : vector<1x128xf32>
    %958 = vector.extract_strided_slice %936 {offsets = [0, 0], sizes = [1, 128], strides = [1, 1]} : vector<4x128xf32> to vector<1x128xf32>
    %cst_329 = arith.constant 0.000000e+00 : f32
    %959 = vector.broadcast %cst_329 : f32 to vector<1x128xf32>
    %960 = arith.maximumf %958, %959 : vector<1x128xf32>
    %961 = arith.mulf %957, %960 : vector<1x128xf32>
    %962 = math.exp %961 : vector<1x128xf32>
    %cst_330 = arith.constant 1.000000e+00 : f32
    %963 = vector.broadcast %cst_330 : f32 to vector<1x128xf32>
    %964 = arith.subf %963, %962 : vector<1x128xf32>
    %965 = arith.addf %955, %964 : vector<1x128xf32>
    %cst_331 = arith.constant 0.333333343 : f32
    %966 = vector.broadcast %cst_331 : f32 to vector<1x128xf32>
    %967 = arith.mulf %965, %966 : vector<1x128xf32>
    %968 = arith.mulf %967, %842 : vector<1x128xf32>
    %969 = vector.broadcast %968 : vector<1x128xf32> to vector<4x128xf32>
    %970 = arith.mulf %969, %922 : vector<4x128xf32>
    %971 = arith.addf %833, %970 : vector<4x128xf32>
    %972 = vector.broadcast %968 : vector<1x128xf32> to vector<4x128xf32>
    %973 = arith.mulf %972, %929 : vector<4x128xf32>
    %974 = arith.addf %836, %973 : vector<4x128xf32>
    %975 = vector.broadcast %968 : vector<1x128xf32> to vector<4x128xf32>
    %976 = arith.mulf %975, %936 : vector<4x128xf32>
    %977 = arith.addf %839, %976 : vector<4x128xf32>
    %cst_332 = arith.constant 1.000000e+00 : f32
    %978 = vector.broadcast %cst_332 : f32 to vector<1x128xf32>
    %979 = arith.subf %978, %967 : vector<1x128xf32>
    %980 = arith.mulf %842, %979 : vector<1x128xf32>
    %cst_333 = arith.constant 1.000000e+00 : f32
    %981 = vector.broadcast %cst_333 : f32 to vector<1x128xf32>
    %982 = arith.subf %981, %967 : vector<1x128xf32>
    %983 = arith.mulf %845, %982 : vector<1x128xf32>
    %c0_334 = arith.constant 0 : index
    %c7 = arith.constant 7 : index
    %c0_335 = arith.constant 0 : index
    %c0_336 = arith.constant 0 : index
    %984 = vector.load %arg3[%c0_334, %c7, %c0_335, %c0_336] : memref<1x8x4x128xf32, #tpu.memory_space<vmem>>, vector<1x1x4x128xf32>
    %985 = vector.shape_cast %984 : vector<1x1x4x128xf32> to vector<4x128xf32>
    %986 = vector.extract_strided_slice %985 {offsets = [0, 0], sizes = [1, 128], strides = [1, 1]} : vector<4x128xf32> to vector<1x128xf32>
    %987 = vector.extract_strided_slice %985 {offsets = [1, 0], sizes = [1, 128], strides = [1, 1]} : vector<4x128xf32> to vector<1x128xf32>
    %988 = vector.extract_strided_slice %985 {offsets = [2, 0], sizes = [1, 128], strides = [1, 1]} : vector<4x128xf32> to vector<1x128xf32>
    %989 = vector.extract_strided_slice %985 {offsets = [3, 0], sizes = [1, 128], strides = [1, 1]} : vector<4x128xf32> to vector<1x128xf32>
    %cst_337 = arith.constant 1.000000e+00 : f32
    %990 = vector.broadcast %cst_337 : f32 to vector<1x128xf32>
    %991 = arith.addf %986, %990 : vector<1x128xf32>
    %cst_338 = arith.constant 1.600000e+01 : f32
    %992 = vector.broadcast %cst_338 : f32 to vector<1x128xf32>
    %993 = arith.mulf %991, %992 : vector<1x128xf32>
    %cst_339 = arith.constant 1.000000e+00 : f32
    %994 = vector.broadcast %cst_339 : f32 to vector<1x128xf32>
    %995 = arith.subf %993, %994 : vector<1x128xf32>
    %cst_340 = arith.constant 5.000000e-01 : f32
    %996 = vector.broadcast %cst_340 : f32 to vector<1x128xf32>
    %997 = arith.mulf %995, %996 : vector<1x128xf32>
    %998 = vector.broadcast %997 : vector<1x128xf32> to vector<16x128xf32>
    %999 = vector.broadcast %10 : vector<16x1xf32> to vector<16x128xf32>
    %1000 = arith.subf %998, %999 : vector<16x128xf32>
    %1001 = math.absf %1000 : vector<16x128xf32>
    %cst_341 = arith.constant 1.000000e+00 : f32
    %1002 = vector.broadcast %cst_341 : f32 to vector<16x128xf32>
    %1003 = arith.subf %1002, %1001 : vector<16x128xf32>
    %cst_342 = arith.constant 0.000000e+00 : f32
    %1004 = vector.broadcast %cst_342 : f32 to vector<16x128xf32>
    %1005 = arith.maximumf %1003, %1004 : vector<16x128xf32>
    %cst_343 = arith.constant 1.000000e+00 : f32
    %1006 = vector.broadcast %cst_343 : f32 to vector<1x128xf32>
    %1007 = arith.addf %987, %1006 : vector<1x128xf32>
    %cst_344 = arith.constant 1.600000e+01 : f32
    %1008 = vector.broadcast %cst_344 : f32 to vector<1x128xf32>
    %1009 = arith.mulf %1007, %1008 : vector<1x128xf32>
    %cst_345 = arith.constant 1.000000e+00 : f32
    %1010 = vector.broadcast %cst_345 : f32 to vector<1x128xf32>
    %1011 = arith.subf %1009, %1010 : vector<1x128xf32>
    %cst_346 = arith.constant 5.000000e-01 : f32
    %1012 = vector.broadcast %cst_346 : f32 to vector<1x128xf32>
    %1013 = arith.mulf %1011, %1012 : vector<1x128xf32>
    %1014 = vector.broadcast %1013 : vector<1x128xf32> to vector<16x128xf32>
    %1015 = vector.broadcast %10 : vector<16x1xf32> to vector<16x128xf32>
    %1016 = arith.subf %1014, %1015 : vector<16x128xf32>
    %1017 = math.absf %1016 : vector<16x128xf32>
    %cst_347 = arith.constant 1.000000e+00 : f32
    %1018 = vector.broadcast %cst_347 : f32 to vector<16x128xf32>
    %1019 = arith.subf %1018, %1017 : vector<16x128xf32>
    %cst_348 = arith.constant 0.000000e+00 : f32
    %1020 = vector.broadcast %cst_348 : f32 to vector<16x128xf32>
    %1021 = arith.maximumf %1019, %1020 : vector<16x128xf32>
    %cst_349 = arith.constant 1.000000e+00 : f32
    %1022 = vector.broadcast %cst_349 : f32 to vector<1x128xf32>
    %1023 = arith.addf %987, %1022 : vector<1x128xf32>
    %cst_350 = arith.constant 1.600000e+01 : f32
    %1024 = vector.broadcast %cst_350 : f32 to vector<1x128xf32>
    %1025 = arith.mulf %1023, %1024 : vector<1x128xf32>
    %cst_351 = arith.constant 1.000000e+00 : f32
    %1026 = vector.broadcast %cst_351 : f32 to vector<1x128xf32>
    %1027 = arith.subf %1025, %1026 : vector<1x128xf32>
    %cst_352 = arith.constant 5.000000e-01 : f32
    %1028 = vector.broadcast %cst_352 : f32 to vector<1x128xf32>
    %1029 = arith.mulf %1027, %1028 : vector<1x128xf32>
    %1030 = vector.broadcast %1029 : vector<1x128xf32> to vector<16x128xf32>
    %1031 = vector.broadcast %12 : vector<16x1xf32> to vector<16x128xf32>
    %1032 = arith.subf %1030, %1031 : vector<16x128xf32>
    %1033 = math.absf %1032 : vector<16x128xf32>
    %cst_353 = arith.constant 1.000000e+00 : f32
    %1034 = vector.broadcast %cst_353 : f32 to vector<16x128xf32>
    %1035 = arith.subf %1034, %1033 : vector<16x128xf32>
    %cst_354 = arith.constant 0.000000e+00 : f32
    %1036 = vector.broadcast %cst_354 : f32 to vector<16x128xf32>
    %1037 = arith.maximumf %1035, %1036 : vector<16x128xf32>
    %cst_355 = arith.constant 1.000000e+00 : f32
    %1038 = vector.broadcast %cst_355 : f32 to vector<1x128xf32>
    %1039 = arith.addf %988, %1038 : vector<1x128xf32>
    %cst_356 = arith.constant 1.600000e+01 : f32
    %1040 = vector.broadcast %cst_356 : f32 to vector<1x128xf32>
    %1041 = arith.mulf %1039, %1040 : vector<1x128xf32>
    %cst_357 = arith.constant 1.000000e+00 : f32
    %1042 = vector.broadcast %cst_357 : f32 to vector<1x128xf32>
    %1043 = arith.subf %1041, %1042 : vector<1x128xf32>
    %cst_358 = arith.constant 5.000000e-01 : f32
    %1044 = vector.broadcast %cst_358 : f32 to vector<1x128xf32>
    %1045 = arith.mulf %1043, %1044 : vector<1x128xf32>
    %1046 = vector.broadcast %1045 : vector<1x128xf32> to vector<16x128xf32>
    %1047 = vector.broadcast %12 : vector<16x1xf32> to vector<16x128xf32>
    %1048 = arith.subf %1046, %1047 : vector<16x128xf32>
    %1049 = math.absf %1048 : vector<16x128xf32>
    %cst_359 = arith.constant 1.000000e+00 : f32
    %1050 = vector.broadcast %cst_359 : f32 to vector<16x128xf32>
    %1051 = arith.subf %1050, %1049 : vector<16x128xf32>
    %cst_360 = arith.constant 0.000000e+00 : f32
    %1052 = vector.broadcast %cst_360 : f32 to vector<16x128xf32>
    %1053 = arith.maximumf %1051, %1052 : vector<16x128xf32>
    %1054 = arith.truncf %1005 : vector<16x128xf32> to vector<16x128xbf16>
    %cst_361 = arith.constant dense<0.000000e+00> : vector<64x128xf32>
    %1055 = tpu.matmul %4, %1054, %cst_361 {dimension_numbers = #tpu.dot_dimension_numbers<[1], [0], [0], [1], [0, 0, 1, 1], [], []>} : vector<64x16xbf16>, vector<16x128xbf16>, vector<64x128xf32> -> vector<64x128xf32>
    %1056 = vector.shape_cast %1055 : vector<64x128xf32> to vector<4x16x128xf32>
    %1057 = vector.shape_cast %1037 : vector<16x128xf32> to vector<1x16x128xf32>
    %1058 = vector.broadcast %1057 : vector<1x16x128xf32> to vector<4x16x128xf32>
    %1059 = arith.mulf %1056, %1058 : vector<4x16x128xf32>
    %cst_362 = arith.constant dense<0.000000e+00> : vector<4x128xf32>
    %1060 = vector.multi_reduction <add>, %1059, %cst_362 [1] : vector<4x16x128xf32> to vector<4x128xf32>
    %1061 = arith.truncf %1005 : vector<16x128xf32> to vector<16x128xbf16>
    %cst_363 = arith.constant dense<0.000000e+00> : vector<64x128xf32>
    %1062 = tpu.matmul %6, %1061, %cst_363 {dimension_numbers = #tpu.dot_dimension_numbers<[1], [0], [0], [1], [0, 0, 1, 1], [], []>} : vector<64x16xbf16>, vector<16x128xbf16>, vector<64x128xf32> -> vector<64x128xf32>
    %1063 = vector.shape_cast %1062 : vector<64x128xf32> to vector<4x16x128xf32>
    %1064 = vector.shape_cast %1053 : vector<16x128xf32> to vector<1x16x128xf32>
    %1065 = vector.broadcast %1064 : vector<1x16x128xf32> to vector<4x16x128xf32>
    %1066 = arith.mulf %1063, %1065 : vector<4x16x128xf32>
    %cst_364 = arith.constant dense<0.000000e+00> : vector<4x128xf32>
    %1067 = vector.multi_reduction <add>, %1066, %cst_364 [1] : vector<4x16x128xf32> to vector<4x128xf32>
    %1068 = arith.truncf %1021 : vector<16x128xf32> to vector<16x128xbf16>
    %cst_365 = arith.constant dense<0.000000e+00> : vector<64x128xf32>
    %1069 = tpu.matmul %8, %1068, %cst_365 {dimension_numbers = #tpu.dot_dimension_numbers<[1], [0], [0], [1], [0, 0, 1, 1], [], []>} : vector<64x16xbf16>, vector<16x128xbf16>, vector<64x128xf32> -> vector<64x128xf32>
    %1070 = vector.shape_cast %1069 : vector<64x128xf32> to vector<4x16x128xf32>
    %1071 = vector.shape_cast %1053 : vector<16x128xf32> to vector<1x16x128xf32>
    %1072 = vector.broadcast %1071 : vector<1x16x128xf32> to vector<4x16x128xf32>
    %1073 = arith.mulf %1070, %1072 : vector<4x16x128xf32>
    %cst_366 = arith.constant dense<0.000000e+00> : vector<4x128xf32>
    %1074 = vector.multi_reduction <add>, %1073, %cst_366 [1] : vector<4x16x128xf32> to vector<4x128xf32>
    %cst_367 = arith.constant 0.000000e+00 : f32
    %1075 = vector.broadcast %cst_367 : f32 to vector<1x128xf32>
    %1076 = arith.subf %1075, %989 : vector<1x128xf32>
    %1077 = vector.extract_strided_slice %1060 {offsets = [0, 0], sizes = [1, 128], strides = [1, 1]} : vector<4x128xf32> to vector<1x128xf32>
    %cst_368 = arith.constant 0.000000e+00 : f32
    %1078 = vector.broadcast %cst_368 : f32 to vector<1x128xf32>
    %1079 = arith.maximumf %1077, %1078 : vector<1x128xf32>
    %1080 = arith.mulf %1076, %1079 : vector<1x128xf32>
    %1081 = math.exp %1080 : vector<1x128xf32>
    %cst_369 = arith.constant 1.000000e+00 : f32
    %1082 = vector.broadcast %cst_369 : f32 to vector<1x128xf32>
    %1083 = arith.subf %1082, %1081 : vector<1x128xf32>
    %cst_370 = arith.constant 0.000000e+00 : f32
    %1084 = vector.broadcast %cst_370 : f32 to vector<1x128xf32>
    %1085 = arith.subf %1084, %989 : vector<1x128xf32>
    %1086 = vector.extract_strided_slice %1067 {offsets = [0, 0], sizes = [1, 128], strides = [1, 1]} : vector<4x128xf32> to vector<1x128xf32>
    %cst_371 = arith.constant 0.000000e+00 : f32
    %1087 = vector.broadcast %cst_371 : f32 to vector<1x128xf32>
    %1088 = arith.maximumf %1086, %1087 : vector<1x128xf32>
    %1089 = arith.mulf %1085, %1088 : vector<1x128xf32>
    %1090 = math.exp %1089 : vector<1x128xf32>
    %cst_372 = arith.constant 1.000000e+00 : f32
    %1091 = vector.broadcast %cst_372 : f32 to vector<1x128xf32>
    %1092 = arith.subf %1091, %1090 : vector<1x128xf32>
    %1093 = arith.addf %1083, %1092 : vector<1x128xf32>
    %cst_373 = arith.constant 0.000000e+00 : f32
    %1094 = vector.broadcast %cst_373 : f32 to vector<1x128xf32>
    %1095 = arith.subf %1094, %989 : vector<1x128xf32>
    %1096 = vector.extract_strided_slice %1074 {offsets = [0, 0], sizes = [1, 128], strides = [1, 1]} : vector<4x128xf32> to vector<1x128xf32>
    %cst_374 = arith.constant 0.000000e+00 : f32
    %1097 = vector.broadcast %cst_374 : f32 to vector<1x128xf32>
    %1098 = arith.maximumf %1096, %1097 : vector<1x128xf32>
    %1099 = arith.mulf %1095, %1098 : vector<1x128xf32>
    %1100 = math.exp %1099 : vector<1x128xf32>
    %cst_375 = arith.constant 1.000000e+00 : f32
    %1101 = vector.broadcast %cst_375 : f32 to vector<1x128xf32>
    %1102 = arith.subf %1101, %1100 : vector<1x128xf32>
    %1103 = arith.addf %1093, %1102 : vector<1x128xf32>
    %cst_376 = arith.constant 0.333333343 : f32
    %1104 = vector.broadcast %cst_376 : f32 to vector<1x128xf32>
    %1105 = arith.mulf %1103, %1104 : vector<1x128xf32>
    %1106 = arith.mulf %1105, %980 : vector<1x128xf32>
    %1107 = vector.broadcast %1106 : vector<1x128xf32> to vector<4x128xf32>
    %1108 = arith.mulf %1107, %1060 : vector<4x128xf32>
    %1109 = arith.addf %971, %1108 : vector<4x128xf32>
    %1110 = vector.broadcast %1106 : vector<1x128xf32> to vector<4x128xf32>
    %1111 = arith.mulf %1110, %1067 : vector<4x128xf32>
    %1112 = arith.addf %974, %1111 : vector<4x128xf32>
    %1113 = vector.broadcast %1106 : vector<1x128xf32> to vector<4x128xf32>
    %1114 = arith.mulf %1113, %1074 : vector<4x128xf32>
    %1115 = arith.addf %977, %1114 : vector<4x128xf32>
    %cst_377 = arith.constant 1.000000e+00 : f32
    %1116 = vector.broadcast %cst_377 : f32 to vector<1x128xf32>
    %1117 = arith.subf %1116, %1105 : vector<1x128xf32>
    %1118 = arith.mulf %980, %1117 : vector<1x128xf32>
    %cst_378 = arith.constant 1.000000e+00 : f32
    %1119 = vector.broadcast %cst_378 : f32 to vector<1x128xf32>
    %1120 = arith.subf %1119, %1105 : vector<1x128xf32>
    %1121 = arith.mulf %983, %1120 : vector<1x128xf32>
    %c0_379 = arith.constant 0 : index
    %c0_380 = arith.constant 0 : index
    %1122 = vector.load %arg8[%c0_379, %c0_380] : memref<4x128xf32, #tpu.memory_space<vmem>>, vector<4x128xf32>
    tpu.vector_store %arg8[%c0_379, %c0_380], %1109 {strides = array<i32>} : memref<4x128xf32, #tpu.memory_space<vmem>>, vector<4x128xf32>,
    %c0_381 = arith.constant 0 : index
    %c0_382 = arith.constant 0 : index
    %1123 = vector.load %arg9[%c0_381, %c0_382] : memref<4x128xf32, #tpu.memory_space<vmem>>, vector<4x128xf32>
    tpu.vector_store %arg9[%c0_381, %c0_382], %1112 {strides = array<i32>} : memref<4x128xf32, #tpu.memory_space<vmem>>, vector<4x128xf32>,
    %c0_383 = arith.constant 0 : index
    %c0_384 = arith.constant 0 : index
    %1124 = vector.load %arg10[%c0_383, %c0_384] : memref<4x128xf32, #tpu.memory_space<vmem>>, vector<4x128xf32>
    tpu.vector_store %arg10[%c0_383, %c0_384], %1115 {strides = array<i32>} : memref<4x128xf32, #tpu.memory_space<vmem>>, vector<4x128xf32>,
    %c0_385 = arith.constant 0 : index
    %c0_386 = arith.constant 0 : index
    %1125 = vector.load %arg11[%c0_385, %c0_386] : memref<1x128xf32, #tpu.memory_space<vmem>>, vector<1x128xf32>
    tpu.vector_store %arg11[%c0_385, %c0_386], %1118 {strides = array<i32>} : memref<1x128xf32, #tpu.memory_space<vmem>>, vector<1x128xf32>,
    %c0_387 = arith.constant 0 : index
    %c0_388 = arith.constant 0 : index
    %1126 = vector.load %arg12[%c0_387, %c0_388] : memref<1x128xf32, #tpu.memory_space<vmem>>, vector<1x128xf32>
    tpu.vector_store %arg12[%c0_387, %c0_388], %1121 {strides = array<i32>} : memref<1x128xf32, #tpu.memory_space<vmem>>, vector<1x128xf32>,
    %c0_i32_389 = arith.constant 0 : i32
    %1127 = arith.cmpi eq, %arg2, %c0_i32_389 : i32
    %1128 = arith.extui %1127 : i1 to i32
    %c0_i32_390 = arith.constant 0 : i32
    %1129 = arith.cmpi ne, %1128, %c0_i32_390 : i32
    scf.if %1129 {
      %cst_391 = arith.constant 1.000000e+00 : f32
      %1130 = vector.broadcast %cst_391 : f32 to vector<1x128xf32>
      %1131 = arith.subf %1130, %1121 : vector<1x128xf32>
      %1132 = tpu.concatenate %1109, %1112, %1115, %1131 in 0 : vector<4x128xf32>, vector<4x128xf32>, vector<4x128xf32>, vector<1x128xf32> -> vector<13x128xf32>
      %c0_392 = arith.constant 0 : index
      %c0_393 = arith.constant 0 : index
      %c0_394 = arith.constant 0 : index
      %1133 = vector.load %arg7[%c0_392, %c0_393, %c0_394] : memref<1x13x128xf32, #tpu.memory_space<vmem>>, vector<1x13x128xf32>
      %1134 = vector.shape_cast %1133 : vector<1x13x128xf32> to vector<13x128xf32>
      %1135 = vector.shape_cast %1132 : vector<13x128xf32> to vector<1x13x128xf32>
      tpu.vector_store %arg7[%c0_392, %c0_393, %c0_394], %1135 {strides = array<i32>} : memref<1x13x128xf32, #tpu.memory_space<vmem>>, vector<1x13x128xf32>,
    } else {
    }
    return
  }
  func.func @transform_0(%arg0: i32, %arg1: i32, %arg2: i32) -> (i32, i32, i32, i32) {
    %c0_i32 = arith.constant 0 : i32
    %c0_i32_0 = arith.constant 0 : i32
    return %arg0, %arg2, %c0_i32, %arg1 : i32, i32, i32, i32
  }
  func.func @transform_1(%arg0: i32, %arg1: i32, %arg2: i32) -> (i32, i32, i32) {
    %c0_i32 = arith.constant 0 : i32
    %c0_i32_0 = arith.constant 0 : i32
    %c0_i32_1 = arith.constant 0 : i32
    return %arg0, %c0_i32, %c0_i32_0 : i32, i32, i32
  }
  func.func @transform_2(%arg0: i32, %arg1: i32, %arg2: i32) -> (i32, i32, i32) {
    %c0_i32 = arith.constant 0 : i32
    %c0_i32_0 = arith.constant 0 : i32
    %c0_i32_1 = arith.constant 0 : i32
    return %arg0, %c0_i32, %c0_i32_0 : i32, i32, i32
  }
  func.func @transform_3(%arg0: i32, %arg1: i32, %arg2: i32) -> (i32, i32, i32) {
    %c0_i32 = arith.constant 0 : i32
    %c0_i32_0 = arith.constant 0 : i32
    %c0_i32_1 = arith.constant 0 : i32
    return %arg0, %c0_i32, %c0_i32_0 : i32, i32, i32
  }
  func.func @transform_4(%arg0: i32, %arg1: i32, %arg2: i32) -> (i32, i32, i32) {
    %c0_i32 = arith.constant 0 : i32
    %c0_i32_0 = arith.constant 0 : i32
    return %arg0, %c0_i32, %arg1 : i32, i32, i32
  }
}

</mosaic_0001>

<bundles_post_ra>
// kernel: tpu_custom_call.1
= control target key start
LH: loop header
LB: loop body
LE: loop exit
PB: predicated region body
PF: predicated region fallthrough
CT: control target
= control target key end

     0   :  { %s3310_s15 = smov 0   ;;  %s3312_s16 = smov 0   ;;  %s4510_s0 = inlined_call_operand.vmem [shape: f32[2,8,4,128], index: 0, kind: input, shape index: {}]   ;;  %s4511_s1 = inlined_call_operand.vmem [shape: bf16[2,64,16], index: 1, kind: input, shape index: {}]   ;;  %s4512_s2 = inlined_call_operand.vmem [shape: bf16[2,64,16], index: 2, kind: input, shape index: {}]   ;;  %s4513_s3 = inlined_call_operand.vmem [shape: bf16[2,64,16], index: 3, kind: input, shape index: {}]   ;;  %s4514_s4 = inlined_call_operand.vmem [shape: f32[2,13,128], index: 4, kind: output, shape index: {}]  }
   0x1   :  { %s3314_s17 = smov 0  }
   0x2 LB: > { %s33_s18 = sadd.s32 1, %s3277_s16  ;;  %p2972_p0 = scmp.ge.s32.totalorder %s3281_s17, 1  ;;  %s3281_s17 = sphi %s3314_s17, %s14_s17   ;;  %s3277_s16 = sphi %s3312_s16, %s4536_s16   ;;  %s3273_s15 = sphi %s3310_s15, %s4535_s15  }
   0x3   : > { %p35_p1 = scmp.ge.s32.totalorder %s33_s18, 2  ;;  %p225_p2 = scmp.lt.s32.totalorder %s3281_s17, 3 }
   0x5   : > { %s4538_s18 = smov (%p35_p1, %s33_s18), 0  ;;  %p226_p3 = pnand %p2972_p0, %p225_p2 }
   0x7   : > { %229 = sbr.rel (%p226_p3) target bundleno = 575 (0x23f), region = 36 }
   0xc   : > { %p277_p4 = scmp.lt.s32.totalorder %s3273_s15, 1  ;;  %v346_v0 = vlaneseq  ;;  %vm409_vm0 = vcmask 130048   ;;  %vm710_vm1 = vcmask 1041409   ;;  %vm712_vm2 = vcmask 1042434  }
   0xd   : > { %vm714_vm3 = vcmask 1043459   ;;  %vm2838_vm4 = vcmask 1043456  }
   0xe   : > { %s4540_s15 = smov (!%p277_p4, %s3273_s15), 1  ;;  %v347_v1 = vshrl.u32 %v346_v0, 7 }
   0xf   : > { %s3331_s19 = sshll.u32 %s4540_s15, 5  ;;  %s3148_s6 = sshll.u32 %s4540_s15, 4 }
  0x10   : > { %s3337_s22 = scalar_lea.vmem %s4510_s0, %s3331_s19  ;;  %v348_v7 = vadd.s32 8, %v347_v1  ;;  %v3348_v13 = vcvt.s32.f32 %v347_v1  ;;  %s3371_s25 = scalar_lea.vmem %s4511_s1, %s3331_s19 }
  0x11   : > { %v3340_v2 = vld [vmem:[%s3337_s22] sm:$0xf]  ;;  %v3343_v3 = vld [vmem:[%s3337_s22 + $0x4] sm:$0xf]  ;;  %v3058_v6 = vld [vmem:[%s3337_s22 + $0x8] sm:$0xf]  ;;  %s3378_s28 = scalar_lea.vmem %s4512_s2, %s3331_s19  ;;  %s3384_s5 = scalar_lea.vmem %s4513_s3, %s3331_s19 }
  0x12   : > { %v357_v4 = vadd.f32 1.0, %v3340_v2  ;;  %v753_v5 = vadd.f32 1.0, %v3343_v3  ;;  %v1049_v10 = vadd.f32 1.0, %v3058_v6  ;;  %v3350_v14 = vcvt.s32.f32 %v348_v7  ;;  %v3393_v50 = vld [vmem:[%s3371_s25] sm:$0xff]  ;;  %s311_s9 = scalar_lea.vmem %s4514_s4, %s3148_s6 }
  0x13   : > { %v3397_v52 = vld [vmem:[%s3378_s28] sm:$0xff] }
  0x14   : > { %v358_v8 = vmul.f32 16.0, %v357_v4  ;;  %v754_v9 = vmul.f32 16.0, %v753_v5  ;;  %v1050_v17 = vmul.f32 16.0, %v1049_v10  ;;  %v3400_v53 = vld [vmem:[%s3384_s5] sm:$0xff] }
  0x16   : > { %v2983_v11 = vadd.f32 -1.0, %v358_v8  ;;  %v3045_v12 = vadd.f32 -1.0, %v754_v9  ;;  %v3059_v23 = vadd.f32 -1.0, %v1050_v17  ;;  %v3427_v17 = vld [vmem:[%s3384_s5 + $0x8] sm:$0xff] }
  0x18   : > { %v3352_v15 = vmul.f32 0.5, %v2983_v11  ;;  %v3354_v16 = vmul.f32 0.5, %v3045_v12  ;;  %v3365_v38 = vmul.f32 0.5, %v3059_v23  ;;  %v3421_v11 = vld [vmem:[%s3371_s25 + $0x8] sm:$0xff] }
  0x19   : > { %v3424_v12 = vld [vmem:[%s3378_s28 + $0x8] sm:$0xff] }
  0x1a   : > { %v361_v18 = vperm.slane %v3352_v15, 0  ;;  %v370_v19 = vperm.slane %v3352_v15, 1  ;;  %v757_v20 = vperm.slane %v3354_v16, 0  ;;  %v766_v42 = vperm.slane %v3354_v16, 1 }
  0x1b   : > { %v1053_v51 = vperm.slane %v3365_v38, 0 }
  0x1c   : > { %v362_v21 = vsub.f32 %v361_v18, %v3348_v13  ;;  %v363_v22 = vsub.f32 %v361_v18, %v3350_v14  ;;  %v371_v24 = vsub.f32 %v370_v19, %v3348_v13  ;;  %v372_v25 = vsub.f32 %v370_v19, %v3350_v14 }
  0x1d   : > { %v758_v26 = vsub.f32 %v757_v20, %v3348_v13  ;;  %v759_v27 = vsub.f32 %v757_v20, %v3350_v14  ;;  %v767_v54 = vsub.f32 %v766_v42, %v3348_v13  ;;  %v1054_v56 = vsub.f32 %v1053_v51, %v3348_v13 }
  0x1e   : > { %v364_v28 = vand.u32 2147483647, %v362_v21  ;;  %v365_v29 = vand.u32 2147483647, %v363_v22  ;;  %v373_v30 = vand.u32 2147483647, %v371_v24  ;;  %v1055_v57 = vsub.f32 %v1053_v51, %v3350_v14 }
  0x1f   : > { %v374_v31 = vand.u32 2147483647, %v372_v25  ;;  %v760_v34 = vand.u32 2147483647, %v758_v26  ;;  %v761_v37 = vand.u32 2147483647, %v759_v27  ;;  %v768_v60 = vsub.f32 %v766_v42, %v3350_v14 }
  0x20   : > { %v366_v32 = vsub.f32 1.0, %v364_v28  ;;  %v367_v33 = vsub.f32 1.0, %v365_v29  ;;  %v375_v35 = vsub.f32 1.0, %v373_v30  ;;  %v1056_v58 = vand.u32 2147483647, %v1054_v56  ;;  %v3441_v25 = vld [vmem:[%s3371_s25 + $0x10] sm:$0xff] }
  0x21   : > { %v376_v36 = vsub.f32 1.0, %v374_v31  ;;  %v762_v41 = vsub.f32 1.0, %v760_v34  ;;  %v763_v45 = vsub.f32 1.0, %v761_v37  ;;  %v1057_v59 = vand.u32 2147483647, %v1055_v57  ;;  %v3444_v26 = vld [vmem:[%s3378_s28 + $0x10] sm:$0xff] }
  0x22   : > { %v368_v39 = vmax.f32 %v366_v32, 0.0  ;;  %v369_v40 = vmax.f32 %v367_v33, 0.0  ;;  %v3386_v43 = vmax.f32 %v375_v35, 0.0  ;;  %v769_v61 = vand.u32 2147483647, %v767_v54  ;;  %v3447_v27 = vld [vmem:[%s3384_s5 + $0x10] sm:$0xff] }
  0x23   : > { %v3388_v44 = vmax.f32 %v376_v36, 0.0  ;;  %v764_v47 = vmax.f32 %v762_v41, 0.0  ;;  %v765_v49 = vmax.f32 %v763_v45, 0.0  ;;  %v1058_v62 = vsub.f32 1.0, %v1056_v58  ;;  %v3072_v30 = vld [vmem:[%s3337_s22 + $0xc] sm:$0xf] }
  0x24   : > { %v388_v46 = vpack.c.bf16 %v369_v40, %v368_v39  ;;  %v1059_v63 = vsub.f32 1.0, %v1057_v59  ;;  %v770_v0 = vand.u32 2147483647, %v768_v60  ;;  %v771_v1 = vsub.f32 1.0, %v769_v61  ;;  %v3467_v36 = vld [vmem:[%s3371_s25 + $0x18] sm:$0xff] }
  0x25   : > { %v584_v48 = vpack.c.bf16 %v3388_v44, %v3386_v43  ;;  %v784_v55 = vpack.c.bf16 %v765_v49, %v764_v47  ;;  %v1060_v4 = vmax.f32 %v1058_v62, 0.0  ;;  %v1062_v18 = vperm.slane %v3365_v38, 1  ;;  %v3472_v40 = vld [vmem:[%s3378_s28 + $0x18] sm:$0xff] }
  0x26   : > { %429 = vmatpush.bf16.msra.mxu0 %v388_v46  ;;  %526 = vmatpush.bf16.msra.mxu1 %v388_v46  ;;  %v1061_v5 = vmax.f32 %v1059_v63, 0.0  ;;  %v772_v6 = vsub.f32 1.0, %v770_v0  ;;  %v3414_v7 = vmax.f32 %v771_v1, 0.0  ;;  %v1345_v32 = vadd.f32 1.0, %v3072_v30  ;;  %v3475_v41 = vld [vmem:[%s3384_s5 + $0x18] sm:$0xff] }
  0x27   : > { %624 = vmatpush.bf16.msra.mxu2 %v584_v48  ;;  %792 = vmatpush.bf16.msra.mxu3 %v784_v55  ;;  %v1063_v19 = vsub.f32 %v1062_v18, %v3348_v13  ;;  %v1064_v20 = vsub.f32 %v1062_v18, %v3350_v14  ;;  %v3086_v1 = vld [vmem:[%s3337_s22 + $0x10] sm:$0xf] }
  0x28   : > { %v1080_v8 = vpack.c.bf16 %v1061_v5, %v1060_v4  ;;  %v3416_v9 = vmax.f32 %v772_v6, 0.0  ;;  %v1346_v33 = vmul.f32 16.0, %v1345_v32  ;;  %v3100_v4 = vld [vmem:[%s3337_s22 + $0x14] sm:$0xf]  ;;  %v1641_v5 = vadd.f32 1.0, %v3086_v1 }
  0x29   : > { %3000 = vmatmul.msk.bf16.vlgmr.msra.gmra.mxu0 %vm409_vm0, %v3393_v50  ;;  %3020 = vmatmul.msk.bf16.vlgmr.msra.gmra.mxu1 %vm409_vm0, %v3397_v52  ;;  %v1065_v21 = vand.u32 2147483647, %v1063_v19  ;;  %v1066_v22 = vand.u32 2147483647, %v1064_v20  ;;  %v1937_v6 = vadd.f32 1.0, %v3100_v4 }
  0x2a   : > { %3040 = vmatmul.msk.bf16.vlgmr.msra.gmra.mxu2 %vm409_vm0, %v3400_v53  ;;  %857 = vmatpush.bf16.msrb.mxu0 %v784_v55  ;;  %v915_v10 = vpack.c.bf16 %v3416_v9, %v3414_v7  ;;  %v3073_v34 = vadd.f32 -1.0, %v1346_v33 }
  0x2b   : > { %3046 = vmatmul.msk.bf16.vlgmr.msra.gmra.mxu3 %vm409_vm0, %v3393_v50  ;;  %1088 = vmatpush.bf16.msrb.mxu2 %v1080_v8  ;;  %v1067_v23 = vsub.f32 1.0, %v1065_v21  ;;  %v1068_v24 = vsub.f32 1.0, %v1066_v22 }
  0x2c   : > { %1153 = vmatpush.bf16.msrb.mxu3 %v1080_v8  ;;  %923 = vmatpush.bf16.msrb.mxu1 %v915_v10  ;;  %v3464_v35 = vmul.f32 0.5, %v3073_v34  ;;  %v1642_v8 = vmul.f32 16.0, %v1641_v5  ;;  %v1938_v10 = vmul.f32 16.0, %v1937_v6 }
  0x2d   : > { %v3449_v28 = vmax.f32 %v1067_v23, 0.0  ;;  %v3451_v29 = vmax.f32 %v1068_v24, 0.0 }
  0x2e   : > { %v1349_v37 = vperm.slane %v3464_v35, 0  ;;  %v1358_v39 = vperm.slane %v3464_v35, 1  ;;  %v3087_v18 = vadd.f32 -1.0, %v1642_v8  ;;  %v3101_v19 = vadd.f32 -1.0, %v1938_v10 }
  0x2f   : > { %v1211_v31 = vpack.c.bf16 %v3451_v29, %v3449_v28 }
  0x30   : > { %v1350_v42 = vsub.f32 %v1349_v37, %v3348_v13  ;;  %v1351_v45 = vsub.f32 %v1349_v37, %v3350_v14  ;;  %v1359_v46 = vsub.f32 %v1358_v39, %v3348_v13  ;;  %v1360_v47 = vsub.f32 %v1358_v39, %v3350_v14 }
  0x31   : > { %1219 = vmatpush.bf16.msra.mxu0 %v1211_v31  ;;  %v3521_v20 = vmul.f32 0.5, %v3087_v18  ;;  %v3523_v21 = vmul.f32 0.5, %v3101_v19 }
  0x32   : > { %v1352_v48 = vand.u32 2147483647, %v1350_v42  ;;  %v1353_v49 = vand.u32 2147483647, %v1351_v45  ;;  %v1361_v51 = vand.u32 2147483647, %v1359_v46 }
  0x33   : > { %v1362_v54 = vand.u32 2147483647, %v1360_v47  ;;  %v1654_v22 = vperm.slane %v3521_v20, 1  ;;  %v1645_v23 = vperm.slane %v3521_v20, 0  ;;  %v1941_v24 = vperm.slane %v3523_v21, 0 }
  0x34   : > { %v1354_v55 = vsub.f32 1.0, %v1352_v48  ;;  %v1355_v56 = vsub.f32 1.0, %v1353_v49  ;;  %v1363_v57 = vsub.f32 1.0, %v1361_v51 }
  0x35   : > { %v1364_v58 = vsub.f32 1.0, %v1362_v54  ;;  %v1655_v30 = vsub.f32 %v1654_v22, %v3348_v13  ;;  %v1656_v31 = vsub.f32 %v1654_v22, %v3350_v14  ;;  %v1646_v32 = vsub.f32 %v1645_v23, %v3348_v13 }
  0x36   : > { %v1356_v59 = vmax.f32 %v1354_v55, 0.0  ;;  %v1357_v60 = vmax.f32 %v1355_v56, 0.0  ;;  %v3489_v61 = vmax.f32 %v1363_v57, 0.0  ;;  %v1647_v33 = vsub.f32 %v1645_v23, %v3350_v14 }
  0x37   : > { %v3491_v62 = vmax.f32 %v1364_v58, 0.0  ;;  %v1942_v34 = vsub.f32 %v1941_v24, %v3348_v13  ;;  %v1943_v37 = vsub.f32 %v1941_v24, %v3350_v14  ;;  %v1657_v39 = vand.u32 2147483647, %v1655_v30 }
  0x38   : > { %v1376_v63 = vpack.c.bf16 %v1357_v60, %v1356_v59  ;;  %v1658_v42 = vand.u32 2147483647, %v1656_v31  ;;  %v1648_v45 = vand.u32 2147483647, %v1646_v32  ;;  %v1649_v46 = vand.u32 2147483647, %v1647_v33 }
  0x39   : > { %3001 = vmatmul.msk.bf16.gmra.mxu0 %vm409_vm0, %v3421_v11  ;;  %3021 = vmatmul.msk.bf16.gmra.mxu1 %vm409_vm0, %v3424_v12  ;;  %v1507_v0 = vpack.c.bf16 %v3491_v62, %v3489_v61  ;;  %v1944_v47 = vand.u32 2147483647, %v1942_v34  ;;  %v1945_v48 = vand.u32 2147483647, %v1943_v37  ;;  %v1659_v49 = vsub.f32 1.0, %v1657_v39 }
  0x3a   : > { %3041 = vmatmul.msk.bf16.gmra.mxu2 %vm409_vm0, %v3427_v17  ;;  %1384 = vmatpush.bf16.msra.mxu1 %v1376_v63  ;;  %v1660_v51 = vsub.f32 1.0, %v1658_v42  ;;  %v1650_v54 = vsub.f32 1.0, %v1648_v45  ;;  %v379_v55 = vperm.slane %v3352_v15, 2  ;;  %v1651_v56 = vsub.f32 1.0, %v1649_v46 }
  0x3b   : > { %3047 = vmatmul.msk.bf16.gmra.mxu3 %vm409_vm0, %v3421_v11  ;;  %1449 = vmatpush.bf16.msra.mxu2 %v1376_v63  ;;  %v1946_v57 = vsub.f32 1.0, %v1944_v47  ;;  %v1947_v58 = vsub.f32 1.0, %v1945_v48  ;;  %v3543_v59 = vmax.f32 %v1659_v49, 0.0 }
  0x3c   : > { %1515 = vmatpush.bf16.msra.mxu3 %v1507_v0  ;;  %v3545_v60 = vmax.f32 %v1660_v51, 0.0  ;;  %v1652_v63 = vmax.f32 %v1650_v54, 0.0  ;;  %v1653_v0 = vmax.f32 %v1651_v56, 0.0  ;;  %v380_v6 = vsub.f32 %v379_v55, %v3348_v13 }
  0x3d   : > { %v1948_v1 = vmax.f32 %v1946_v57, 0.0  ;;  %v1949_v4 = vmax.f32 %v1947_v58, 0.0  ;;  %v381_v15 = vsub.f32 %v379_v55, %v3350_v14  ;;  %v3283_v54 = vmov 1.0  }
  0x3e   : > { %v1803_v5 = vpack.c.bf16 %v3545_v60, %v3543_v59  ;;  %v1672_v8 = vpack.c.bf16 %v1653_v0, %v1652_v63  ;;  %v382_v18 = vand.u32 2147483647, %v380_v6  ;;  %320 = vst [vmem:[#allocation5] sm:$0x1] %v3283_v54 }
  0x3f   : > { %v1968_v10 = vpack.c.bf16 %v1949_v4, %v1948_v1  ;;  %v383_v19 = vand.u32 2147483647, %v381_v15  ;;  %321 = vst [vmem:[#allocation6] sm:$0x1] %v3283_v54 }
  0x40   : > { %v384_v24 = vsub.f32 1.0, %v382_v18 }
  0x41   : > { %v385_v30 = vsub.f32 1.0, %v383_v19 }
  0x42   : > { %v3557_v31 = vmax.f32 %v384_v24, 0.0 }
  0x43   : > { %v3559_v32 = vmax.f32 %v385_v30, 0.0 }
  0x49   : > { %3002 = vmatmul.msk.bf16.gmra.mxu0 %vm409_vm0, %v3441_v25  ;;  %3022 = vmatmul.msk.bf16.gmra.mxu1 %vm409_vm0, %v3444_v26 }
  0x4a   : > { %3042 = vmatmul.msk.bf16.gmra.mxu2 %vm409_vm0, %v3447_v27 }
  0x4b   : > { %3048 = vmatmul.msk.bf16.gmra.mxu3 %vm409_vm0, %v3441_v25 }
  0x59   : > { %3003 = vmatmul.msk.bf16.gmra.mxu0 %vm409_vm0, %v3467_v36  ;;  %3023 = vmatmul.msk.bf16.gmra.mxu1 %vm409_vm0, %v3472_v40 }
  0x5a   : > { %3043 = vmatmul.msk.bf16.gmra.mxu2 %vm409_vm0, %v3475_v41 }
  0x5b   : > { %3049 = vmatmul.msk.bf16.gmra.mxu3 %vm409_vm0, %v3467_v36 }
  0x69   : > { %3050 = vmatmul.msk.bf16.vlgmr.msrb.gmra.mxu0 %vm409_vm0, %v3397_v52  ;;  %3054 = vmatmul.msk.bf16.vlgmr.msrb.gmra.mxu1 %vm409_vm0, %v3400_v53 }
  0x6a   : > { %3060 = vmatmul.msk.bf16.vlgmr.msrb.gmra.mxu2 %vm409_vm0, %v3393_v50  ;;  %1680 = vmatpush.bf16.msrb.mxu0 %v1672_v8 }
  0x6b   : > { %3064 = vmatmul.msk.bf16.vlgmr.msrb.gmra.mxu3 %vm409_vm0, %v3397_v52  ;;  %1811 = vmatpush.bf16.msrb.mxu2 %v1803_v5 }
  0x6c   : > { %1976 = vmatpush.bf16.msrb.mxu3 %v1968_v10  ;;  %1745 = vmatpush.bf16.msrb.mxu1 %v1672_v8 }
  0x79   : > { %3051 = vmatmul.msk.bf16.gmra.mxu0 %vm409_vm0, %v3424_v12  ;;  %3055 = vmatmul.msk.bf16.gmra.mxu1 %vm409_vm0, %v3427_v17 }
  0x7a   : > { %3061 = vmatmul.msk.bf16.gmra.mxu2 %vm409_vm0, %v3421_v11 }
  0x7b   : > { %3065 = vmatmul.msk.bf16.gmra.mxu3 %vm409_vm0, %v3424_v12 }
  0x89   : > { %3052 = vmatmul.msk.bf16.gmra.mxu0 %vm409_vm0, %v3444_v26  ;;  %3056 = vmatmul.msk.bf16.gmra.mxu1 %vm409_vm0, %v3447_v27 }
  0x8a   : > { %3062 = vmatmul.msk.bf16.gmra.mxu2 %vm409_vm0, %v3441_v25 }
  0x8b   : > { %3066 = vmatmul.msk.bf16.gmra.mxu3 %vm409_vm0, %v3444_v26 }
  0x99   : > { %3053 = vmatmul.msk.bf16.gmra.mxu0 %vm409_vm0, %v3472_v40  ;;  %3057 = vmatmul.msk.bf16.gmra.mxu1 %vm409_vm0, %v3475_v41 }
  0x9a   : > { %3063 = vmatmul.msk.bf16.gmra.mxu2 %vm409_vm0, %v3467_v36 }
  0x9b   : > { %3067 = vmatmul.msk.bf16.gmra.mxu3 %vm409_vm0, %v3472_v40 }
  0xa6   : > { %v431_v22 = vpop.f32.mrf.mxu0  ;;  %v528_v23 = vpop.f32.mrf.mxu1 }
  0xa7   : > { %v548_v34 = vmul.f32 %v528_v23, %v3557_v31  ;;  %v451_v39 = vmul.f32 %v431_v22, %v3386_v43 }
  0xa9   : > { %3068 = vmatmul.msk.bf16.vlgmr.msra.gmra.mxu0 %vm409_vm0, %v3400_v53  ;;  %3074 = vmatmul.msk.bf16.vlgmr.msra.gmra.mxu1 %vm409_vm0, %v3393_v50 }
  0xaa   : > { %3078 = vmatmul.msk.bf16.vlgmr.msra.gmra.mxu2 %vm409_vm0, %v3397_v52  ;;  %2041 = vmatpush.bf16.msra.mxu0 %v1968_v10 }
  0xab   : > { %3082 = vmatmul.msk.bf16.vlgmr.msra.gmra.mxu3 %vm409_vm0, %v3400_v53 }
  0xad   : > { %v626_v33 = vpop.f32.mrf.mxu2 }
  0xae   : > { %v433_v37 = vpop.f32.mrf.mxu0  ;;  %v794_v42 = vpop.f32.mrf.mxu3  ;;  %v646_v58 = vmul.f32 %v626_v33, %v3557_v31 }
  0xaf   : > { %v452_v45 = vmul.f32 %v433_v37, %v3388_v44  ;;  %v530_v46 = vpop.f32.mrf.mxu1  ;;  %v814_v4 = vmul.f32 %v794_v42, %v3414_v7  ;;  %v682_v42 = vsub.f32 0.0, %v3340_v2 }
  0xb0   : > { %v549_v47 = vmul.f32 %v530_v46, %v3559_v32 }
  0xb1   : > { %v459_v48 = vadd.f32 %v452_v45, %v451_v39 }
  0xb2   : > { %v556_v49 = vadd.f32 %v549_v47, %v548_v34 }
  0xb3   : > { %v460_v51 = vrot.slane %v459_v48, 4 }
  0xb4   : > { %v557_v55 = vrot.slane %v556_v49, 4 }
  0xb5   : > { %v461_v56 = vadd.f32 %v460_v51, %v459_v48  ;;  %v628_v57 = vpop.f32.mrf.mxu2 }
  0xb6   : > { %v558_v63 = vadd.f32 %v557_v55, %v556_v49  ;;  %v647_v0 = vmul.f32 %v628_v57, %v3559_v32  ;;  %v436_v1 = vpop.f32.mrf.mxu0  ;;  %v796_v6 = vpop.f32.mrf.mxu3 }
  0xb7   : > { %v462_v5 = vrot.slane %v461_v56, 2  ;;  %v533_v15 = vpop.f32.mrf.mxu1  ;;  %v815_v18 = vmul.f32 %v796_v6, %v3416_v9 }
  0xb8   : > { %v559_v8 = vrot.slane %v558_v63, 2  ;;  %v654_v10 = vadd.f32 %v647_v0, %v646_v58  ;;  %v550_v19 = vmul.f32 %v533_v15, %v3557_v31 }
  0xb9   : > { %v463_v22 = vadd.f32 %v462_v5, %v461_v56  ;;  %3069 = vmatmul.msk.bf16.gmra.mxu0 %vm409_vm0, %v3427_v17  ;;  %v822_v30 = vadd.f32 %v815_v18, %v814_v4  ;;  %3075 = vmatmul.msk.bf16.gmra.mxu1 %vm409_vm0, %v3421_v11  ;;  %v453_v56 = vmul.f32 %v436_v1, %v3386_v43 }
  0xba   : > { %v560_v23 = vadd.f32 %v559_v8, %v558_v63  ;;  %v655_v24 = vrot.slane %v654_v10, 4  ;;  %3079 = vmatmul.msk.bf16.gmra.mxu2 %vm409_vm0, %v3424_v12 }
  0xbb   : > { %v464_v33 = vrot.slane %v463_v22, 1  ;;  %v823_v39 = vrot.slane %v822_v30, 4  ;;  %3083 = vmatmul.msk.bf16.gmra.mxu3 %vm409_vm0, %v3427_v17 }
  0xbc   : > { %v561_v34 = vrot.slane %v560_v23, 1  ;;  %v656_v37 = vadd.f32 %v655_v24, %v654_v10 }
  0xbd   : > { %v3581_v45 = vadd.f32 %v464_v33, %v463_v22  ;;  %v631_v46 = vpop.f32.mrf.mxu2  ;;  %v824_v49 = vadd.f32 %v823_v39, %v822_v30 }
  0xbe   : > { %v3583_v47 = vadd.f32 %v561_v34, %v560_v23  ;;  %v657_v48 = vrot.slane %v656_v37, 2  ;;  %v648_v51 = vmul.f32 %v631_v46, %v3557_v31  ;;  %v438_v54 = vpop.f32.mrf.mxu0  ;;  %v799_v57 = vpop.f32.mrf.mxu3  ;;  %v3594_v34 = vsub.f32 0.0, %v3343_v3 }
  0xbf   : > { %v683_v55 = vmax.f32 %v3581_v45, 0.0  ;;  %v454_v58 = vmul.f32 %v438_v54, %v3388_v44  ;;  %v535_v63 = vpop.f32.mrf.mxu1  ;;  %v825_v4 = vrot.slane %v824_v49, 2 }
  0xc0   : > { %v688_v2 = vmax.f32 %v3583_v47, 0.0  ;;  %v658_v0 = vadd.f32 %v657_v48, %v656_v37  ;;  %v551_v15 = vmul.f32 %v535_v63, %v3559_v32 }
  0xc1   : > { %v684_v5 = vmul.f32 %v683_v55, %v682_v42  ;;  %v466_v6 = vadd.f32 %v454_v58, %v453_v56  ;;  %v826_v18 = vadd.f32 %v825_v4, %v824_v49 }
  0xc2   : > { %v689_v8 = vmul.f32 %v688_v2, %v682_v42  ;;  %v659_v10 = vrot.slane %v658_v0, 1  ;;  %v563_v24 = vadd.f32 %v551_v15, %v550_v19  ;;  %v816_v19 = vmul.f32 %v799_v57, %v3414_v7 }
  0xc3   : > { %v685_v22 = vmul.f32 1.442695, %v684_v5  ;;  %v467_v23 = vrot.slane %v466_v6, 4  ;;  %v827_v33 = vrot.slane %v826_v18, 1 }
  0xc4   : > { %v690_v30 = vmul.f32 1.442695, %v689_v8  ;;  %v3591_v1 = vadd.f32 %v659_v10, %v658_v0  ;;  %v564_v39 = vrot.slane %v563_v24, 4 }
  0xc5   : > { %3188 = vpow2.f32 %v685_v22  ;;  %v468_v37 = vadd.f32 %v467_v23, %v466_v6  ;;  %v633_v46 = vpop.f32.mrf.mxu2  ;;  %v3597_v54 = vadd.f32 %v827_v33, %v826_v18 }
  0xc6   : > { %3190 = vpow2.f32 %v690_v30  ;;  %v694_v48 = vmax.f32 %v3591_v1, 0.0  ;;  %v649_v49 = vmul.f32 %v633_v46, %v3559_v32  ;;  %v441_v55 = vpop.f32.mrf.mxu0  ;;  %v565_v58 = vadd.f32 %v564_v39, %v563_v24  ;;  %v801_v63 = vpop.f32.mrf.mxu3 }
  0xc7   : > { %v469_v56 = vrot.slane %v468_v37, 2  ;;  %v538_v2 = vpop.f32.mrf.mxu1  ;;  %v982_v0 = vmax.f32 %v3597_v54, 0.0  ;;  %v817_v5 = vmul.f32 %v801_v63, %v3416_v9 }
  0xc8   : > { %v695_v3 = vmul.f32 %v694_v48, %v682_v42  ;;  %v661_v4 = vadd.f32 %v649_v49, %v648_v51  ;;  %v566_v15 = vrot.slane %v565_v58, 2  ;;  %v552_v8 = vmul.f32 %v538_v2, %v3557_v31 }
  0xc9   : > { %v470_v6 = vadd.f32 %v469_v56, %v468_v37  ;;  %3070 = vmatmul.msk.bf16.gmra.mxu0 %vm409_vm0, %v3447_v27  ;;  %v3607_v57 = vmul.f32 %v982_v0, %v3594_v34  ;;  %v829_v22 = vadd.f32 %v817_v5, %v816_v19  ;;  %3076 = vmatmul.msk.bf16.gmra.mxu1 %vm409_vm0, %v3441_v25  ;;  %v3284_v37 = vmov 0.0  }
  0xca   : > { %v696_v10 = vmul.f32 1.442695, %v695_v3  ;;  %v662_v18 = vrot.slane %v661_v4, 4  ;;  %3080 = vmatmul.msk.bf16.gmra.mxu2 %vm409_vm0, %v3444_v26  ;;  %v567_v23 = vadd.f32 %v566_v15, %v565_v58  ;;  %317 = vst [vmem:[#allocation2] sm:$0xf] %v3284_v37 }
  0xcb   : > { %v3189_v42 = vpop.eup %3188  ;;  %v471_v51 = vrot.slane %v470_v6, 1  ;;  %3084 = vmatmul.msk.bf16.gmra.mxu3 %vm409_vm0, %v3447_v27  ;;  %v830_v49 = vrot.slane %v829_v22, 4  ;;  %318 = vst [vmem:[#allocation3] sm:$0xf] %v3284_v37 }
  0xcc   : > { %v3191_v24 = vpop.eup %3190  ;;  %v687_v30 = vsub.f32 1.0, %v3189_v42  ;;  %3192 = vpow2.f32 %v696_v10  ;;  %v663_v33 = vadd.f32 %v662_v18, %v661_v4  ;;  %v568_v48 = vrot.slane %v567_v23, 1  ;;  %319 = vst [vmem:[#allocation4] sm:$0xf] %v3284_v37 }
  0xcd   : > { %v692_v39 = vsub.f32 1.0, %v3191_v24  ;;  %v472_v46 = vadd.f32 %v471_v51, %v470_v6  ;;  %v636_v19 = vpop.f32.mrf.mxu2  ;;  %v831_v0 = vadd.f32 %v830_v49, %v829_v22  ;;  %v455_v6 = vmul.f32 %v441_v55, %v3386_v43 }
  0xce   : > { %v664_v26 = vrot.slane %v663_v33, 2  ;;  %v650_v56 = vmul.f32 %v636_v19, %v3557_v31  ;;  %v443_v58 = vpop.f32.mrf.mxu0  ;;  %v569_v3 = vadd.f32 %v568_v48, %v567_v23  ;;  %v804_v4 = vpop.f32.mrf.mxu3  ;;  %v775_v22 = vperm.slane %v3354_v16, 2 }
  0xcf   : > { %v693_v63 = vadd.f32 %v692_v39, %v687_v30  ;;  %v3618_v2 = vsel %vm710_vm1, %v472_v46, %v3581_v45  ;;  %v540_v5 = vpop.f32.mrf.mxu1  ;;  %v456_v10 = vmul.f32 %v443_v58, %v3388_v44  ;;  %v832_v51 = vrot.slane %v831_v0, 2 }
  0xd0   : > { %v665_v15 = vadd.f32 %v664_v26, %v663_v33  ;;  %v553_v18 = vmul.f32 %v540_v5, %v3559_v32  ;;  %v3625_v42 = vsel %vm710_vm1, %v569_v3, %v3583_v47  ;;  %v776_v16 = vsub.f32 %v775_v22, %v3348_v13 }
  0xd1   : > { %v473_v45 = vadd.f32 %v456_v10, %v455_v6  ;;  %v833_v39 = vadd.f32 %v832_v51, %v831_v0 }
  0xd2   : > { %v3193_v24 = vpop.eup %3192  ;;  %v666_v30 = vrot.slane %v665_v15, 1  ;;  %v570_v37 = vadd.f32 %v553_v18, %v552_v8 }
  0xd3   : > { %v698_v23 = vsub.f32 1.0, %v3193_v24  ;;  %v474_v46 = vrot.slane %v473_v45, 4  ;;  %v834_v49 = vrot.slane %v833_v39, 1  ;;  %v777_v24 = vsub.f32 %v775_v22, %v3350_v14 }
  0xd4   : > { %v667_v33 = vadd.f32 %v666_v30, %v665_v15  ;;  %v571_v55 = vrot.slane %v570_v37, 4  ;;  %v818_v15 = vmul.f32 %v804_v4, %v3414_v7  ;;  %v3114_v4 = vld [vmem:[%s3337_s22 + $0x18] sm:$0xf]  ;;  %v778_v22 = vand.u32 2147483647, %v776_v16 }
  0xd5   : > { %v699_v48 = vadd.f32 %v698_v23, %v693_v63  ;;  %v638_v19 = vpop.f32.mrf.mxu2  ;;  %v475_v47 = vadd.f32 %v474_v46, %v473_v45  ;;  %v835_v0 = vadd.f32 %v834_v49, %v833_v39 }
  0xd6   : > { %v3630_v26 = vsel %vm710_vm1, %v667_v33, %v3591_v1  ;;  %v572_v58 = vadd.f32 %v571_v55, %v570_v37  ;;  %v651_v3 = vmul.f32 %v638_v19, %v3559_v32  ;;  %v446_v5 = vpop.f32.mrf.mxu0  ;;  %v806_v63 = vpop.f32.mrf.mxu3  ;;  %v779_v19 = vand.u32 2147483647, %v777_v24 }
  0xd7   : > { %v3634_v8 = vmul.f32 0.33333334, %v699_v48  ;;  %v543_v6 = vpop.f32.mrf.mxu1  ;;  %v476_v10 = vrot.slane %v475_v47, 2  ;;  %v819_v1 = vmul.f32 %v806_v63, %v3416_v9  ;;  %v3642_v45 = vsel %vm710_vm1, %v835_v0, %v3597_v54 }
  0xd8   : > { %v573_v18 = vrot.slane %v572_v58, 2  ;;  %v668_v51 = vadd.f32 %v651_v3, %v650_v56  ;;  %v554_v37 = vmul.f32 %v543_v6, %v3557_v31  ;;  %v2233_v54 = vadd.f32 1.0, %v3114_v4 }
  0xd9   : > { %v739_v30 = vsub.f32 1.0, %v3634_v8  ;;  %3071 = vmatmul.msk.bf16.gmra.mxu0 %vm409_vm0, %v3475_v41  ;;  %v477_v23 = vadd.f32 %v476_v10, %v475_v47  ;;  %v836_v56 = vadd.f32 %v819_v1, %v818_v15  ;;  %3077 = vmatmul.msk.bf16.gmra.mxu1 %vm409_vm0, %v3467_v36  ;;  %v1071_v47 = vperm.slane %v3365_v38, 2 }
  0xda   : > { %v574_v39 = vadd.f32 %v573_v18, %v572_v58  ;;  %v669_v33 = vrot.slane %v668_v51, 4  ;;  %3081 = vmatmul.msk.bf16.gmra.mxu2 %vm409_vm0, %v3472_v40  ;;  %v2234_v3 = vmul.f32 16.0, %v2233_v54  ;;  %v457_v63 = vmul.f32 %v446_v5, %v3386_v43 }
  0xdb   : > { %741 = vst [vmem:[#allocation1] sm:$0xff] %v739_v30  ;;  %v478_v46 = vrot.slane %v477_v23, 1  ;;  %v837_v49 = vrot.slane %v836_v56, 4  ;;  %3085 = vmatmul.msk.bf16.gmra.mxu3 %vm409_vm0, %v3475_v41 }
  0xdc   : > { %v575_v55 = vrot.slane %v574_v39, 1  ;;  %v670_v48 = vadd.f32 %v669_v33, %v668_v51  ;;  %v3115_v41 = vadd.f32 -1.0, %v2234_v3  ;;  %v1072_v33 = vsub.f32 %v1071_v47, %v3348_v13 }
  0xdd   : > { %v641_v58 = vpop.f32.mrf.mxu2  ;;  %v479_v36 = vadd.f32 %v478_v46, %v477_v23  ;;  %v838_v40 = vadd.f32 %v837_v49, %v836_v56  ;;  %v781_v46 = vsub.f32 1.0, %v779_v19 }
  0xde   : > { %v576_v0 = vadd.f32 %v575_v55, %v574_v39  ;;  %v671_v15 = vrot.slane %v670_v48, 2  ;;  %v448_v16 = vpop.f32.mrf.mxu0  ;;  %v652_v6 = vmul.f32 %v641_v58, %v3557_v31  ;;  %v809_v10 = vpop.f32.mrf.mxu3  ;;  %v3667_v5 = vmul.f32 0.5, %v3115_v41 }
  0xdf   : > { %v458_v18 = vmul.f32 %v448_v16, %v3388_v44  ;;  %v545_v51 = vpop.f32.mrf.mxu1  ;;  %v3660_v38 = vsel %vm712_vm2, %v479_v36, %v3618_v2  ;;  %v839_v4 = vrot.slane %v838_v40, 2  ;;  %v1074_v16 = vand.u32 2147483647, %v1072_v33 }
  0xe0   : > { %v3664_v1 = vsel %vm712_vm2, %v576_v0, %v3625_v42  ;;  %v672_v24 = vadd.f32 %v671_v15, %v670_v48  ;;  %v555_v43 = vmul.f32 %v545_v51, %v3559_v32  ;;  %4523 = vst [vmem:[#allocation7_spill] sm:$0xff] %v3667_v5  ;;  %v2237_v54 = vperm.slane %v3667_v5, 0 }
  0xe1   : > { %v480_v23 = vadd.f32 %v458_v18, %v457_v63  ;;  %v840_v39 = vadd.f32 %v839_v4, %v838_v40  ;;  %v780_v42 = vsub.f32 1.0, %v778_v22  ;;  %v1073_v15 = vsub.f32 %v1071_v47, %v3350_v14  ;;  %v3187_v40 = vld [vmem:[#allocation5] ss:$0 sm:$0xff] }
  0xe2   : > { %v3669_v31 = vld [vmem:[#allocation1 + $0x3] ss:$9 sm:$0xff]  ;;  %v673_v44 = vrot.slane %v672_v24, 1  ;;  %v577_v56 = vadd.f32 %v555_v43, %v554_v37  ;;  %v2238_v36 = vsub.f32 %v2237_v54, %v3348_v13  ;;  %v2239_v0 = vsub.f32 %v2237_v54, %v3350_v14 }
  0xe3   : > { %746 = vst [vmem:[#allocation1] sm:$0xff] %v739_v30  ;;  %v481_v2 = vrot.slane %v480_v23, 4  ;;  %v841_v48 = vrot.slane %v840_v39, 1  ;;  %v820_v47 = vmul.f32 %v809_v10, %v3414_v7  ;;  %v1075_v33 = vand.u32 2147483647, %v1073_v15 }
  0xe4   : > { %v674_v55 = vadd.f32 %v673_v44, %v672_v24  ;;  %v578_v58 = vrot.slane %v577_v56, 4  ;;  %v2240_v24 = vand.u32 2147483647, %v2238_v36  ;;  %v3694_v10 = vmax.f32 %v780_v42, 0.0 }
  0xe5   : > { %v482_v49 = vadd.f32 %v481_v2, %v480_v23  ;;  %v643_v3 = vpop.f32.mrf.mxu2  ;;  %v842_v37 = vadd.f32 %v841_v48, %v840_v39  ;;  %v704_v2 = vmul.f32 %v3187_v40, %v3634_v8  ;;  %v3698_v8 = vmax.f32 %v781_v46, 0.0 }
  0xe6   : > { %v3678_v30 = vsel %vm712_vm2, %v674_v55, %v3630_v26  ;;  %v653_v22 = vmul.f32 %v643_v3, %v3559_v32  ;;  %v859_v19 = vpop.f32.mrf.mxu0  ;;  %v579_v18 = vadd.f32 %v578_v58, %v577_v56  ;;  %v811_v51 = vpop.f32.mrf.mxu3  ;;  %v2241_v32 = vand.u32 2147483647, %v2239_v0 }
  0xe7   : > { %v483_v63 = vrot.slane %v482_v49, 2  ;;  %v925_v41 = vpop.f32.mrf.mxu1  ;;  %v3683_v4 = vsel %vm712_vm2, %v842_v37, %v3642_v45  ;;  %v821_v26 = vmul.f32 %v811_v51, %v3416_v9  ;;  %v2242_v39 = vsub.f32 1.0, %v2240_v24 }
  0xe8   : > { %v675_v23 = vadd.f32 %v653_v22, %v652_v6  ;;  %v580_v44 = vrot.slane %v579_v18, 2  ;;  %v2243_v45 = vsub.f32 1.0, %v2241_v32  ;;  %v1076_v36 = vsub.f32 1.0, %v1074_v16 }
  0xe9   : > { %v484_v43 = vadd.f32 %v483_v63, %v482_v49  ;;  %3088 = vmatmul.msk.bf16.vlgmr.msrb.gmra.mxu0 %vm409_vm0, %v3393_v50  ;;  %v843_v54 = vadd.f32 %v821_v26, %v820_v47  ;;  %3092 = vmatmul.msk.bf16.vlgmr.msrb.gmra.mxu1 %vm409_vm0, %v3397_v52  ;;  %v2244_v6 = vmax.f32 %v2242_v39, 0.0  ;;  %v1077_v40 = vsub.f32 1.0, %v1075_v33 }
  0xea   : > { %v676_v56 = vrot.slane %v675_v23, 4  ;;  %3096 = vmatmul.msk.bf16.vlgmr.msrb.gmra.mxu2 %vm409_vm0, %v3400_v53  ;;  %v581_v9 = vadd.f32 %v580_v44, %v579_v18  ;;  %v2245_v52 = vmax.f32 %v2243_v45, 0.0  ;;  %v705_v53 = vperm.slane %v704_v2, 3 }
  0xeb   : > { %v485_v7 = vrot.slane %v484_v43, 1  ;;  %v844_v48 = vrot.slane %v843_v54, 4  ;;  %3102 = vmatmul.msk.bf16.vlgmr.msrb.gmra.mxu3 %vm409_vm0, %v3393_v50  ;;  %v879_v47 = vmul.f32 %v859_v19, %v3694_v10  ;;  %v3714_v2 = vmax.f32 %v1077_v40, 0.0 }
  0xec   : > { %v677_v55 = vadd.f32 %v676_v56, %v675_v23  ;;  %v582_v58 = vrot.slane %v581_v9, 1  ;;  %v2264_v63 = vpack.c.bf16 %v2245_v52, %v2244_v6  ;;  %v945_v23 = vmul.f32 %v925_v41, %v3694_v10 }
  0xed   : > { %v486_v49 = vadd.f32 %v485_v7, %v484_v43  ;;  %v1090_v3 = vpop.f32.mrf.mxu2  ;;  %v845_v15 = vadd.f32 %v844_v48, %v843_v54 }
  0xee   : > { %v678_v0 = vrot.slane %v677_v55, 2  ;;  %v861_v37 = vpop.f32.mrf.mxu0  ;;  %v583_v22 = vadd.f32 %v582_v58, %v581_v9  ;;  %v1155_v18 = vpop.f32.mrf.mxu3  ;;  %2272 = vmatpush.bf16.msra.mxu2 %v2264_v63  ;;  %2337 = vmatpush.bf16.msra.mxu3 %v2264_v63 }
  0xef   : > { %v715_v42 = vsel %vm714_vm3, %v486_v49, %v3660_v38  ;;  %v927_v51 = vpop.f32.mrf.mxu1  ;;  %v846_v24 = vrot.slane %v845_v15, 2  ;;  %v880_v26 = vmul.f32 %v861_v37, %v3698_v8  ;;  %v3709_v38 = vmax.f32 %v1076_v36, 0.0 }
  0xf0   : > { %v3702_v50 = vmul.f32 %v715_v42, %v705_v53  ;;  %v679_v46 = vadd.f32 %v678_v0, %v677_v55  ;;  %v725_v16 = vsel %vm714_vm3, %v583_v22, %v3664_v1  ;;  %v946_v33 = vmul.f32 %v927_v51, %v3698_v8 }
  0xf1   : > { %v3711_v43 = vmul.f32 %v725_v16, %v705_v53  ;;  %v847_v32 = vadd.f32 %v846_v24, %v845_v15  ;;  %v887_v39 = vadd.f32 %v880_v26, %v879_v47  ;;  %v1110_v1 = vmul.f32 %v1090_v3, %v3449_v28  ;;  %v3236_v26 = vld [vmem:[%s3337_s22 + $0x8] sm:$0xf] }
  0xf2   : > { %v680_v44 = vrot.slane %v679_v46, 1  ;;  %v953_v54 = vadd.f32 %v946_v33, %v945_v23  ;;  %v1175_v6 = vmul.f32 %v1155_v18, %v3709_v38 }
  0xf3   : > { %v848_v56 = vrot.slane %v847_v32, 1  ;;  %v888_v41 = vrot.slane %v887_v39, 4 }
  0xf4   : > { %v681_v19 = vadd.f32 %v680_v44, %v679_v46  ;;  %v954_v52 = vrot.slane %v953_v54, 4  ;;  %v1950_v46 = vperm.slane %v3523_v21, 1  ;;  %v3741_v44 = vsub.f32 0.0, %v3236_v26 }
  0xf5   : > { %v1092_v7 = vpop.f32.mrf.mxu2  ;;  %v849_v45 = vadd.f32 %v848_v56, %v847_v32  ;;  %v889_v58 = vadd.f32 %v888_v41, %v887_v39 }
  0xf6   : > { %v735_v9 = vsel %vm714_vm3, %v681_v19, %v3678_v30  ;;  %v1111_v55 = vmul.f32 %v1092_v7, %v3451_v29  ;;  %v864_v48 = vpop.f32.mrf.mxu0  ;;  %v1157_v36 = vpop.f32.mrf.mxu3  ;;  %v955_v22 = vadd.f32 %v954_v52, %v953_v54  ;;  %v1952_v54 = vsub.f32 %v1950_v46, %v3350_v14 }
  0xf7   : > { %v3721_v49 = vmul.f32 %v735_v9, %v705_v53  ;;  %v881_v0 = vmul.f32 %v864_v48, %v3694_v10  ;;  %v930_v3 = vpop.f32.mrf.mxu1  ;;  %v3726_v15 = vsel %vm714_vm3, %v849_v45, %v3683_v4  ;;  %v1176_v30 = vmul.f32 %v1157_v36, %v3714_v2 }
  0xf8   : > { %v1118_v37 = vadd.f32 %v1111_v55, %v1110_v1  ;;  %v947_v40 = vmul.f32 %v930_v3, %v3694_v10  ;;  %v890_v42 = vrot.slane %v889_v58, 2  ;;  %v984_v53 = vmul.f32 1.442695, %v3607_v57 }
  0xf9   : > { %3089 = vmatmul.msk.bf16.gmra.mxu0 %vm409_vm0, %v3421_v11  ;;  %v1183_v18 = vadd.f32 %v1176_v30, %v1175_v6  ;;  %3093 = vmatmul.msk.bf16.gmra.mxu1 %vm409_vm0, %v3424_v12  ;;  %v956_v51 = vrot.slane %v955_v22, 2  ;;  %v1954_v52 = vand.u32 2147483647, %v1952_v54 }
  0xfa   : > { %v1119_v63 = vrot.slane %v1118_v37, 4  ;;  %3097 = vmatmul.msk.bf16.gmra.mxu2 %vm409_vm0, %v3427_v17  ;;  %v891_v4 = vadd.f32 %v890_v42, %v889_v58  ;;  %3194 = vpow2.f32 %v984_v53 }
  0xfb   : > { %v1184_v47 = vrot.slane %v1183_v18, 4  ;;  %3103 = vmatmul.msk.bf16.gmra.mxu3 %vm409_vm0, %v3421_v11  ;;  %v957_v23 = vadd.f32 %v956_v51, %v955_v22  ;;  %v1951_v11 = vsub.f32 %v1950_v46, %v3348_v13 }
  0xfc   : > { %v1120_v24 = vadd.f32 %v1119_v63, %v1118_v37  ;;  %v892_v16 = vrot.slane %v891_v4, 1 }
  0xfd   : > { %v1095_v57 = vpop.f32.mrf.mxu2  ;;  %v1185_v32 = vadd.f32 %v1184_v47, %v1183_v18  ;;  %v958_v33 = vrot.slane %v957_v23, 1  ;;  %v1953_v58 = vand.u32 2147483647, %v1951_v11  ;;  %v1956_v18 = vsub.f32 1.0, %v1954_v52 }
  0xfe   : > { %v1121_v12 = vrot.slane %v1120_v24, 2  ;;  %v866_v39 = vpop.f32.mrf.mxu0  ;;  %v3743_v17 = vadd.f32 %v892_v16, %v891_v4  ;;  %v1112_v19 = vmul.f32 %v1095_v57, %v3449_v28  ;;  %v1160_v56 = vpop.f32.mrf.mxu3 }
  0xff   : > { %v882_v1 = vmul.f32 %v866_v39, %v3698_v8  ;;  %v932_v41 = vpop.f32.mrf.mxu1  ;;  %v1186_v9 = vrot.slane %v1185_v32, 2  ;;  %v3750_v6 = vadd.f32 %v958_v33, %v957_v23  ;;  %v1177_v55 = vmul.f32 %v1160_v56, %v3709_v38 }
 0x100   : > { %v1122_v7 = vadd.f32 %v1121_v12, %v1120_v24  ;;  %v987_v45 = vmax.f32 %v3743_v17, 0.0  ;;  %v948_v22 = vmul.f32 %v932_v41, %v3698_v8  ;;  %v3756_v53 = vpop.eup %3194  ;;  %v1955_v63 = vsub.f32 1.0, %v1953_v58 }
 0x101   : > { %v894_v48 = vadd.f32 %v882_v1, %v881_v0  ;;  %v1187_v3 = vadd.f32 %v1186_v9, %v1185_v32  ;;  %v993_v30 = vmax.f32 %v3750_v6, 0.0  ;;  %v3763_v57 = vmax.f32 %v1956_v18, 0.0 }
 0x102   : > { %v1123_v36 = vrot.slane %v1122_v7, 1  ;;  %v988_v37 = vmul.f32 %v987_v45, %v3594_v34  ;;  %v960_v47 = vadd.f32 %v948_v22, %v947_v40  ;;  %v3761_v23 = vmax.f32 %v1955_v63, 0.0  ;;  %v3782_v63 = vld [vmem:[%s3378_s28 + $0x10] sm:$0xff] }
 0x103   : > { %v895_v42 = vrot.slane %v894_v48, 4  ;;  %v1188_v51 = vrot.slane %v1187_v3, 1  ;;  %v994_v0 = vmul.f32 %v993_v30, %v3594_v34 }
 0x104   : > { %v3758_v4 = vadd.f32 %v1123_v36, %v1122_v7  ;;  %v989_v46 = vmul.f32 1.442695, %v988_v37  ;;  %v961_v56 = vrot.slane %v960_v47, 4  ;;  %v2099_v34 = vpack.c.bf16 %v3763_v57, %v3761_v23 }
 0x105   : > { %v896_v24 = vadd.f32 %v895_v42, %v894_v48  ;;  %v1097_v16 = vpop.f32.mrf.mxu2  ;;  %v3766_v12 = vadd.f32 %v1188_v51, %v1187_v3  ;;  %v995_v39 = vmul.f32 1.442695, %v994_v0  ;;  %v351_v3 = vld [vmem:[#allocation5] sm:$0x1] }
 0x106   : > { %v1278_v26 = vmax.f32 %v3758_v4, 0.0  ;;  %v869_v32 = vpop.f32.mrf.mxu0  ;;  %3196 = vpow2.f32 %v989_v46  ;;  %v1162_v1 = vpop.f32.mrf.mxu3  ;;  %v1113_v54 = vmul.f32 %v1097_v16, %v3451_v29  ;;  %v962_v9 = vadd.f32 %v961_v56, %v960_v47  ;;  %2107 = vmatpush.bf16.msra.mxu1 %v2099_v34  ;;  %v3788_v51 = vld [vmem:[%s3371_s25 + $0x10] sm:$0xff] }
 0x107   : > { %v897_v33 = vrot.slane %v896_v24, 2  ;;  %v935_v41 = vpop.f32.mrf.mxu1  ;;  %v1283_v11 = vmax.f32 %v3766_v12, 0.0  ;;  %3198 = vpow2.f32 %v995_v39  ;;  %v1178_v45 = vmul.f32 %v1162_v1, %v3714_v2 }
 0x108   : > { %v1279_v40 = vmul.f32 %v1278_v26, %v3741_v44  ;;  %v1125_v52 = vadd.f32 %v1113_v54, %v1112_v19  ;;  %v883_v36 = vmul.f32 %v869_v32, %v3694_v10  ;;  %v963_v30 = vrot.slane %v962_v9, 2 }
 0x109   : > { %v898_v7 = vadd.f32 %v897_v33, %v896_v24  ;;  %3090 = vmatmul.msk.bf16.gmra.mxu0 %vm409_vm0, %v3441_v25  ;;  %v1284_v58 = vmul.f32 %v1283_v11, %v3741_v44  ;;  %v1190_v42 = vadd.f32 %v1178_v45, %v1177_v55  ;;  %v949_v22 = vmul.f32 %v935_v41, %v3694_v10 }
 0x10a   : > { %v1280_v48 = vmul.f32 1.442695, %v1279_v40  ;;  %3098 = vmatmul.msk.bf16.gmra.mxu2 %vm409_vm0, %v3447_v27  ;;  %3094 = vmatmul.msk.bf16.gmra.mxu1 %vm409_vm0, %v3782_v63  ;;  %v1367_v25 = vperm.slane %v3464_v35, 2  ;;  %v1126_v18 = vrot.slane %v1125_v52, 4  ;;  %v986_v55 = vsub.f32 1.0, %v3756_v53 }
 0x10b   : > { %v899_v37 = vrot.slane %v898_v7, 1  ;;  %v1285_v19 = vmul.f32 1.442695, %v1284_v58  ;;  %3104 = vmatmul.msk.bf16.gmra.mxu3 %vm409_vm0, %v3788_v51  ;;  %v964_v0 = vadd.f32 %v963_v30, %v962_v9  ;;  %v1191_v24 = vrot.slane %v1190_v42, 4 }
 0x10c   : > { %3200 = vpow2.f32 %v1280_v48  ;;  %v3197_v27 = vpop.eup %3196  ;;  %v1127_v26 = vadd.f32 %v1126_v18, %v1125_v52  ;;  %v3794_v39 = vmul.f32 %v3669_v31, %v351_v3  ;;  %v3804_v11 = vsub.f32 %v1367_v25, %v3348_v13 }
 0x10d   : > { %v900_v46 = vadd.f32 %v899_v37, %v898_v7  ;;  %v1100_v47 = vpop.f32.mrf.mxu2  ;;  %v991_v16 = vsub.f32 1.0, %v3197_v27  ;;  %3202 = vpow2.f32 %v1285_v19  ;;  %v3199_v33 = vpop.eup %3198  ;;  %v965_v1 = vrot.slane %v964_v0, 1 }
 0x10e   : > { %v871_v32 = vpop.f32.mrf.mxu0  ;;  %v1192_v41 = vadd.f32 %v1191_v24, %v1190_v42  ;;  %v1165_v34 = vpop.f32.mrf.mxu3  ;;  %v997_v7 = vsub.f32 1.0, %v3199_v33  ;;  %v1128_v31 = vrot.slane %v1127_v26, 2  ;;  %v2246_v52 = vperm.slane %v3667_v5, 1 }
 0x10f   : > { %v3798_v56 = vsel %vm710_vm1, %v900_v46, %v3743_v17  ;;  %v884_v53 = vmul.f32 %v871_v32, %v3698_v8  ;;  %v937_v40 = vpop.f32.mrf.mxu1  ;;  %v992_v54 = vadd.f32 %v991_v16, %v986_v55  ;;  %v966_v9 = vadd.f32 %v965_v1, %v964_v0 }
 0x110   : > { %v1193_v45 = vrot.slane %v1192_v41, 2  ;;  %v950_v17 = vmul.f32 %v937_v40, %v3698_v8  ;;  %v1129_v37 = vadd.f32 %v1128_v31, %v1127_v26  ;;  %v1001_v30 = vperm.slane %v3794_v39, 0 }
 0x111   : > { %v901_v48 = vadd.f32 %v884_v53, %v883_v36  ;;  %v998_v3 = vadd.f32 %v997_v7, %v992_v54  ;;  %v3811_v19 = vsel %vm710_vm1, %v966_v9, %v3750_v6  ;;  %v1114_v0 = vmul.f32 %v1100_v47, %v3449_v28  ;;  %v3819_v7 = vld [vmem:[#allocation1 + $0x3] ss:$9 sm:$0xff] }
 0x112   : > { %v3201_v58 = vpop.eup %3200  ;;  %v1194_v18 = vadd.f32 %v1193_v45, %v1192_v41  ;;  %v1130_v36 = vrot.slane %v1129_v37, 1  ;;  %v967_v24 = vadd.f32 %v950_v17, %v949_v22  ;;  %v1179_v26 = vmul.f32 %v1165_v34, %v3709_v38  ;;  %4524 = vst [vmem:[#allocation8_spill] sm:$0xff] %v3819_v7 }
 0x113   : > { %v1282_v42 = vsub.f32 1.0, %v3201_v58  ;;  %v902_v27 = vrot.slane %v901_v48, 4  ;;  %v3203_v55 = vpop.eup %3202  ;;  %v3813_v46 = vmul.f32 0.33333334, %v998_v3 }
 0x114   : > { %v1287_v16 = vsub.f32 1.0, %v3203_v55  ;;  %v1195_v32 = vrot.slane %v1194_v18, 1  ;;  %v1131_v40 = vadd.f32 %v1130_v36, %v1129_v37  ;;  %v968_v6 = vrot.slane %v967_v24, 4  ;;  %v3128_v37 = vld [vmem:[%s3337_s22 + $0x1c] sm:$0xf] }
 0x115   : > { %v903_v33 = vadd.f32 %v902_v27, %v901_v48  ;;  %v1102_v1 = vpop.f32.mrf.mxu2  ;;  %v1035_v53 = vsub.f32 1.0, %v3813_v46  ;;  %v3836_v55 = vld [vmem:[%s3371_s25 + $0x18] sm:$0xff] }
 0x116   : > { %v1115_v41 = vmul.f32 %v1102_v1, %v3451_v29  ;;  %v874_v54 = vpop.f32.mrf.mxu0  ;;  %v3821_v31 = vadd.f32 %v1287_v16, %v1282_v42  ;;  %v1196_v22 = vadd.f32 %v1195_v32, %v1194_v18  ;;  %v1167_v9 = vpop.f32.mrf.mxu3  ;;  %v3826_v48 = vsel %vm710_vm1, %v1131_v40, %v3758_v4  ;;  %v3842_v16 = vld [vmem:[%s3384_s5 + $0x18] sm:$0xff] }
 0x117   : > { %v904_v47 = vrot.slane %v903_v33, 2  ;;  %v885_v34 = vmul.f32 %v874_v54, %v3694_v10  ;;  %v940_v45 = vpop.f32.mrf.mxu1  ;;  %1037 = vst [vmem:[#allocation1] sm:$0xff] %v1035_v53  ;;  %v969_v17 = vadd.f32 %v968_v6, %v967_v24  ;;  %v1180_v3 = vmul.f32 %v1167_v9, %v3714_v2 }
 0x118   : > { %v1132_v58 = vadd.f32 %v1115_v41, %v1114_v0  ;;  %v3832_v42 = vsel %vm710_vm1, %v1196_v22, %v3766_v12  ;;  %v951_v27 = vmul.f32 %v940_v45, %v3694_v10  ;;  %v1003_v4 = vmul.f32 %v1001_v30, %v3813_v46 }
 0x119   : > { %v905_v18 = vadd.f32 %v904_v47, %v903_v33  ;;  %3091 = vmatmul.msk.bf16.gmra.mxu0 %vm409_vm0, %v3836_v55  ;;  %v970_v36 = vrot.slane %v969_v17, 2  ;;  %v1197_v24 = vadd.f32 %v1180_v3, %v1179_v26  ;;  %v2529_v12 = vadd.f32 1.0, %v3128_v37  ;;  %v3847_v33 = vld [vmem:[%s3378_s28 + $0x18] sm:$0xff] }
 0x11a   : > { %v1133_v0 = vrot.slane %v1132_v58, 4  ;;  %3099 = vmatmul.msk.bf16.gmra.mxu2 %vm409_vm0, %v3842_v16  ;;  %3095 = vmatmul.msk.bf16.gmra.mxu1 %vm409_vm0, %v3847_v33  ;;  %v3851_v10 = vperm.slane %v1003_v4, 3  ;;  %v2247_v1 = vsub.f32 %v2246_v52, %v3348_v13  ;;  %v2248_v30 = vsub.f32 %v2246_v52, %v3350_v14 }
 0x11b   : > { %v906_v32 = vrot.slane %v905_v18, 1  ;;  %v971_v46 = vadd.f32 %v970_v36, %v969_v17  ;;  %v1198_v40 = vrot.slane %v1197_v24, 4  ;;  %3105 = vmatmul.msk.bf16.gmra.mxu3 %vm409_vm0, %v3836_v55  ;;  %v2530_v6 = vmul.f32 16.0, %v2529_v12 }
 0x11c   : > { %v1134_v26 = vadd.f32 %v1133_v0, %v1132_v58  ;;  %v3860_v41 = vsub.f32 %v1367_v25, %v3350_v14  ;;  %v3864_v47 = vmul.f32 %v3726_v15, %v3851_v10  ;;  %v1370_v52 = vand.u32 2147483647, %v3804_v11 }
 0x11d   : > { %v907_v54 = vadd.f32 %v906_v32, %v905_v18  ;;  %v1105_v22 = vpop.f32.mrf.mxu2  ;;  %v972_v9 = vrot.slane %v971_v46, 1  ;;  %v1199_v17 = vadd.f32 %v1198_v40, %v1197_v24  ;;  %v3129_v4 = vadd.f32 -1.0, %v2530_v6 }
 0x11e   : > { %v1135_v45 = vrot.slane %v1134_v26, 2  ;;  %v876_v58 = vpop.f32.mrf.mxu0  ;;  %v3867_v3 = vld [vmem:[#allocation1 + $0x3] ss:$9 sm:$0xff]  ;;  %v1170_v35 = vpop.f32.mrf.mxu3  ;;  %v2249_v36 = vand.u32 2147483647, %v2247_v1 }
 0x11f   : > { %v3871_v37 = vsel %vm712_vm2, %v907_v54, %v3798_v56  ;;  %v886_v25 = vmul.f32 %v876_v58, %v3698_v8  ;;  %v942_v18 = vpop.f32.mrf.mxu1  ;;  %1042 = vst [vmem:[#allocation1] sm:$0xff] %v1035_v53  ;;  %v973_v15 = vadd.f32 %v972_v9, %v971_v46  ;;  %v1200_v11 = vrot.slane %v1199_v17, 2 }
 0x120   : > { %v1136_v0 = vadd.f32 %v1135_v45, %v1134_v26  ;;  %v2250_v12 = vand.u32 2147483647, %v2248_v30  ;;  %v1371_v24 = vand.u32 2147483647, %v3860_v41  ;;  %v952_v40 = vmul.f32 %v942_v18, %v3698_v8 }
 0x121   : > { %v908_v32 = vadd.f32 %v886_v25, %v885_v34  ;;  %v3876_v7 = vmul.f32 0.5, %v3129_v4  ;;  %v1372_v56 = vsub.f32 1.0, %v1370_v52  ;;  %v3880_v54 = vsel %vm712_vm2, %v973_v15, %v3811_v19 }
 0x122   : > { %v1137_v58 = vrot.slane %v1136_v0, 1  ;;  %v1201_v6 = vadd.f32 %v1200_v11, %v1199_v17  ;;  %v974_v53 = vadd.f32 %v952_v40, %v951_v27  ;;  %v2251_v26 = vsub.f32 1.0, %v2249_v36 }
 0x123   : > { %4525 = vst [vmem:[#allocation9_spill] sm:$0xff] %v3876_v7  ;;  %v909_v1 = vrot.slane %v908_v32, 4  ;;  %v2533_v46 = vperm.slane %v3876_v7, 0  ;;  %v1116_v34 = vmul.f32 %v1105_v22, %v3449_v28  ;;  %v2252_v41 = vsub.f32 1.0, %v2250_v12 }
 0x124   : > { %v1138_v30 = vadd.f32 %v1137_v58, %v1136_v0  ;;  %v1202_v9 = vrot.slane %v1201_v6, 1  ;;  %v975_v45 = vrot.slane %v974_v53, 4  ;;  %v1181_v18 = vmul.f32 %v1170_v35, %v3709_v38 }
 0x125   : > { %v910_v8 = vadd.f32 %v909_v1, %v908_v32  ;;  %v1107_v25 = vpop.f32.mrf.mxu2  ;;  %v2534_v52 = vsub.f32 %v2533_v46, %v3348_v13  ;;  %v2535_v19 = vsub.f32 %v2533_v46, %v3350_v14  ;;  %v3894_v12 = vmax.f32 %v2251_v26, 0.0 }
 0x126   : > { %v3888_v17 = vsel %vm712_vm2, %v1138_v30, %v3826_v48  ;;  %v1203_v27 = vadd.f32 %v1202_v9, %v1201_v6  ;;  %v1117_v4 = vmul.f32 %v1107_v25, %v3451_v29  ;;  %v3892_v36 = vpop.f32.mrf.mxu0  ;;  %v976_v22 = vadd.f32 %v975_v45, %v974_v53  ;;  %v1172_v15 = vpop.f32.mrf.mxu3  ;;  %v3904_v6 = vld [vmem:[%s3378_s28] sm:$0xff] }
 0x127   : > { %v911_v28 = vrot.slane %v910_v8, 2  ;;  %v1386_v0 = vpop.f32.mrf.mxu1  ;;  %v2536_v11 = vand.u32 2147483647, %v2534_v52  ;;  %4526 = vst [vmem:[#allocation10_spill] sm:$0xff] %v3894_v12  ;;  %v1182_v40 = vmul.f32 %v1172_v15, %v3714_v2  ;;  %v3901_v35 = vmax.f32 %v2252_v41, 0.0  ;;  %v3915_v45 = vld [vmem:[%s3384_s5] sm:$0xff] }
 0x128   : > { %v3898_v48 = vsel %vm712_vm2, %v1203_v27, %v3832_v42  ;;  %v1139_v32 = vadd.f32 %v1117_v4, %v1116_v34  ;;  %v977_v58 = vrot.slane %v976_v22, 2  ;;  %v2537_v1 = vand.u32 2147483647, %v2535_v19  ;;  %v3909_v42 = vld [vmem:[%s3371_s25] sm:$0xff]  ;;  %v354_v34 = vld [vmem:[#allocation3] sm:$0xf] }
 0x129   : > { %4527 = vst [vmem:[#allocation11_spill] sm:$0xff] %v3901_v35  ;;  %v912_v29 = vadd.f32 %v911_v28, %v910_v8  ;;  %3106 = vmatmul.msk.bf16.vlgmr.msra.gmra.mxu0 %vm409_vm0, %v3904_v6  ;;  %v2538_v53 = vsub.f32 1.0, %v2536_v11  ;;  %v1373_v46 = vsub.f32 1.0, %v1371_v24  ;;  %v1204_v30 = vadd.f32 %v1182_v40, %v1181_v18  ;;  %v355_v18 = vld [vmem:[#allocation4] sm:$0xf] }
 0x12a   : > { %v1140_v26 = vrot.slane %v1139_v32, 4  ;;  %3116 = vmatmul.msk.bf16.vlgmr.msra.gmra.mxu2 %vm409_vm0, %v3909_v42  ;;  %v2542_v9 = vperm.slane %v3876_v7, 1  ;;  %v978_v8 = vadd.f32 %v977_v58, %v976_v22  ;;  %3110 = vmatmul.msk.bf16.vlgmr.msra.gmra.mxu1 %vm409_vm0, %v3915_v45  ;;  %v2539_v25 = vsub.f32 1.0, %v2537_v1 }
 0x12b   : > { %v913_v41 = vrot.slane %v912_v29, 1  ;;  %v2540_v52 = vmax.f32 %v2538_v53, 0.0  ;;  %v3919_v24 = vmax.f32 %v1372_v56, 0.0  ;;  %v1205_v27 = vrot.slane %v1204_v30, 4  ;;  %3120 = vmatmul.msk.bf16.vlgmr.msra.gmra.mxu3 %vm409_vm0, %v3904_v6 }
 0x12c   : > { %v1141_v19 = vadd.f32 %v1140_v26, %v1139_v32  ;;  %v979_v28 = vrot.slane %v978_v8, 1  ;;  %v2541_v15 = vmax.f32 %v2539_v25, 0.0  ;;  %v2395_v22 = vpack.c.bf16 %v3901_v35, %v3894_v12 }
 0x12d   : > { %v914_v4 = vadd.f32 %v913_v41, %v912_v29  ;;  %v1451_v11 = vpop.f32.mrf.mxu2  ;;  %v3925_v40 = vmax.f32 %v1373_v46, 0.0  ;;  %v728_v58 = vadd.f32 %v3711_v43, %v354_v34  ;;  %v1206_v56 = vadd.f32 %v1205_v27, %v1204_v30 }
 0x12e   : > { %v1142_v1 = vrot.slane %v1141_v19, 2  ;;  %v1223_v53 = vpop.f32.mrf.mxu0  ;;  %v980_v26 = vadd.f32 %v979_v28, %v978_v8  ;;  %v2560_v7 = vpack.c.bf16 %v2541_v15, %v2540_v52  ;;  %2403 = vmatpush.bf16.msrb.mxu0 %v2395_v22  ;;  %v2543_v29 = vsub.f32 %v2542_v9, %v3348_v13  ;;  %v1517_v41 = vpop.f32.mrf.mxu3  ;;  %v353_v28 = vld [vmem:[#allocation2] sm:$0xf] }
 0x12f   : > { %v1021_v32 = vsel %vm714_vm3, %v914_v4, %v3871_v37  ;;  %v1388_v25 = vpop.f32.mrf.mxu1  ;;  %v738_v12 = vadd.f32 %v3721_v49, %v355_v18  ;;  %v1207_v5 = vrot.slane %v1206_v56, 2  ;;  %v1406_v30 = vmul.f32 %v1386_v0, %v3489_v61 }
 0x130   : > { %v1023_v46 = vmul.f32 %v1021_v32, %v3851_v10  ;;  %v1143_v35 = vadd.f32 %v1142_v1, %v1141_v19  ;;  %v1031_v43 = vsel %vm714_vm3, %v980_v26, %v3880_v54  ;;  %2633 = vmatpush.bf16.msrb.mxu2 %v2560_v7  ;;  %v2544_v37 = vsub.f32 %v2542_v9, %v3350_v14 }
 0x131   : > { %v2545_v34 = vand.u32 2147483647, %v2543_v29  ;;  %2568 = vmatpush.bf16.msrb.mxu1 %v2560_v7  ;;  %v1033_v52 = vmul.f32 %v1031_v43, %v3851_v10  ;;  %v1208_v49 = vadd.f32 %v1207_v5, %v1206_v56  ;;  %v1241_v19 = vmul.f32 %v3892_v36, %v3709_v38 }
 0x132   : > { %v3937_v8 = vadd.f32 %v1023_v46, %v728_v58  ;;  %v1144_v27 = vrot.slane %v1143_v35, 1  ;;  %v2546_v18 = vand.u32 2147483647, %v2544_v37  ;;  %v1242_v54 = vmul.f32 %v1223_v53, %v3714_v2 }
 0x133   : > { %v2547_v4 = vsub.f32 1.0, %v2545_v34  ;;  %v3943_v0 = vadd.f32 %v1033_v52, %v738_v12  ;;  %v1209_v9 = vrot.slane %v1208_v49, 1  ;;  %v1407_v7 = vmul.f32 %v1388_v25, %v3491_v62  ;;  %v3966_v52 = vld [vmem:[%s3378_s28 + $0x8] sm:$0xff] }
 0x134   : > { %v1145_v15 = vadd.f32 %v1144_v27, %v1143_v35  ;;  %v2548_v22 = vsub.f32 1.0, %v2546_v18  ;;  %v1471_v10 = vmul.f32 %v1451_v11, %v3919_v24  ;;  %v1249_v5 = vadd.f32 %v1242_v54, %v1241_v19  ;;  %v3971_v19 = vld [vmem:[%s3371_s25 + $0x8] sm:$0xff] }
 0x135   : > { %v3946_v58 = vmax.f32 %v2547_v4, 0.0  ;;  %v1453_v1 = vpop.f32.mrf.mxu2  ;;  %v1210_v56 = vadd.f32 %v1209_v9, %v1208_v49  ;;  %v1414_v53 = vadd.f32 %v1407_v7, %v1406_v30  ;;  %v718_v32 = vadd.f32 %v3702_v50, %v353_v28  ;;  %v3979_v4 = vld [vmem:[%s3384_s5 + $0x8] sm:$0xff] }
 0x136   : > { %v3951_v36 = vsel %vm714_vm3, %v1145_v15, %v3888_v17  ;;  %v1472_v12 = vmul.f32 %v1453_v1, %v3925_v40  ;;  %v1226_v35 = vpop.f32.mrf.mxu0  ;;  %v3955_v26 = vmax.f32 %v2548_v22, 0.0  ;;  %v1537_v29 = vmul.f32 %v1517_v41, %v3919_v24  ;;  %v1519_v25 = vpop.f32.mrf.mxu3 }
 0x137   : > { %v1250_v11 = vrot.slane %v1249_v5, 4  ;;  %v1391_v46 = vpop.f32.mrf.mxu1  ;;  %v3960_v17 = vsel %vm714_vm3, %v1210_v56, %v3898_v48  ;;  %v1415_v43 = vrot.slane %v1414_v53, 4  ;;  %v1538_v37 = vmul.f32 %v1519_v25, %v3925_v40 }
 0x138   : > { %4528 = vst [vmem:[#allocation12_spill] sm:$0xff] %v3955_v26  ;;  %v1479_v30 = vadd.f32 %v1472_v12, %v1471_v10  ;;  %v2691_v50 = vpack.c.bf16 %v3955_v26, %v3946_v58  ;;  %v3976_v48 = vadd.f32 %v3864_v47, %v718_v32  ;;  %v1408_v12 = vmul.f32 %v1391_v46, %v3489_v61 }
 0x139   : > { %v1251_v34 = vadd.f32 %v1250_v11, %v1249_v5  ;;  %3107 = vmatmul.msk.bf16.gmra.mxu0 %vm409_vm0, %v3966_v52  ;;  %v1416_v41 = vadd.f32 %v1415_v43, %v1414_v53  ;;  %v1545_v49 = vadd.f32 %v1538_v37, %v1537_v29  ;;  %v1243_v53 = vmul.f32 %v1226_v35, %v3709_v38 }
 0x13a   : > { %v1480_v27 = vrot.slane %v1479_v30, 4  ;;  %3117 = vmatmul.msk.bf16.gmra.mxu2 %vm409_vm0, %v3971_v19  ;;  %2699 = vmatpush.bf16.msrb.mxu3 %v2691_v50 }
 0x13b   : > { %v1252_v18 = vrot.slane %v1251_v34, 2  ;;  %3111 = vmatmul.msk.bf16.gmra.mxu1 %vm409_vm0, %v3979_v4  ;;  %v1417_v54 = vrot.slane %v1416_v41, 2  ;;  %v1546_v15 = vrot.slane %v1545_v49, 4  ;;  %3121 = vmatmul.msk.bf16.gmra.mxu3 %vm409_vm0, %v3966_v52 }
 0x13c   : > { %v1481_v28 = vadd.f32 %v1480_v27, %v1479_v30 }
 0x13d   : > { %v1253_v9 = vadd.f32 %v1252_v18, %v1251_v34  ;;  %v1456_v7 = vpop.f32.mrf.mxu2  ;;  %v1418_v22 = vadd.f32 %v1417_v54, %v1416_v41  ;;  %v1547_v5 = vadd.f32 %v1546_v15, %v1545_v49  ;;  %v3248_v49 = vld [vmem:[%s3337_s22 + $0xc] sm:$0xf] }
 0x13e   : > { %v1482_v10 = vrot.slane %v1481_v28, 2  ;;  %v1473_v47 = vmul.f32 %v1456_v7, %v3919_v24  ;;  %v1228_v1 = vpop.f32.mrf.mxu0  ;;  %v1522_v32 = vpop.f32.mrf.mxu3  ;;  %v1573_v35 = vsub.f32 0.0, %v3248_v49 }
 0x13f   : > { %v1254_v56 = vrot.slane %v1253_v9, 1  ;;  %v1244_v29 = vmul.f32 %v1228_v1, %v3714_v2  ;;  %v1393_v11 = vpop.f32.mrf.mxu1  ;;  %v1419_v25 = vrot.slane %v1418_v22, 1  ;;  %v1548_v30 = vrot.slane %v1547_v5, 2 }
 0x140   : > { %v1483_v43 = vadd.f32 %v1482_v10, %v1481_v28  ;;  %v1539_v37 = vmul.f32 %v1522_v32, %v3919_v24  ;;  %v1409_v41 = vmul.f32 %v1393_v11, %v3491_v62 }
 0x141   : > { %v3990_v50 = vadd.f32 %v1254_v56, %v1253_v9  ;;  %v1256_v34 = vadd.f32 %v1244_v29, %v1243_v53  ;;  %v3993_v27 = vadd.f32 %v1419_v25, %v1418_v22  ;;  %v1549_v46 = vadd.f32 %v1548_v30, %v1547_v5 }
 0x142   : > { %v1484_v18 = vrot.slane %v1483_v43, 1  ;;  %v1421_v7 = vadd.f32 %v1409_v41, %v1408_v12 }
 0x143   : > { %v1289_v54 = vmax.f32 %v3990_v50, 0.0  ;;  %v1257_v15 = vrot.slane %v1256_v34, 4  ;;  %v1574_v28 = vmax.f32 %v3993_v27, 0.0  ;;  %v1550_v1 = vrot.slane %v1549_v46, 1 }
 0x144   : > { %v3998_v10 = vadd.f32 %v1484_v18, %v1483_v43  ;;  %v1422_v53 = vrot.slane %v1421_v7, 4 }
 0x145   : > { %v1290_v9 = vmul.f32 %v1289_v54, %v3741_v44  ;;  %v1258_v56 = vadd.f32 %v1257_v15, %v1256_v34  ;;  %v1458_v32 = vpop.f32.mrf.mxu2  ;;  %v1575_v22 = vmul.f32 %v1574_v28, %v1573_v35  ;;  %v4002_v11 = vadd.f32 %v1550_v1, %v1549_v46 }
 0x146   : > { %v1579_v29 = vmax.f32 %v3998_v10, 0.0  ;;  %v1474_v5 = vmul.f32 %v1458_v32, %v3925_v40  ;;  %v1231_v25 = vpop.f32.mrf.mxu0  ;;  %v1423_v41 = vadd.f32 %v1422_v53, %v1421_v7  ;;  %v1524_v49 = vpop.f32.mrf.mxu3 }
 0x147   : > { %v1291_v30 = vmul.f32 1.442695, %v1290_v9  ;;  %v1259_v12 = vrot.slane %v1258_v56, 2  ;;  %v1396_v43 = vpop.f32.mrf.mxu1  ;;  %v1576_v18 = vmul.f32 1.442695, %v1575_v22  ;;  %v1585_v44 = vmax.f32 %v4002_v11, 0.0 }
 0x148   : > { %v1580_v26 = vmul.f32 %v1579_v29, %v1573_v35  ;;  %v1486_v34 = vadd.f32 %v1474_v5, %v1473_v47  ;;  %v1424_v15 = vrot.slane %v1423_v41, 2  ;;  %v1540_v46 = vmul.f32 %v1524_v49, %v3925_v40  ;;  %v4012_v22 = vld [vmem:[%s3384_s5 + $0x10] sm:$0xff] }
 0x149   : > { %3204 = vpow2.f32 %v1291_v30  ;;  %v1260_v54 = vadd.f32 %v1259_v12, %v1258_v56  ;;  %3108 = vmatmul.msk.bf16.gmra.mxu0 %vm409_vm0, %v3782_v63  ;;  %v1586_v1 = vmul.f32 %v1585_v44, %v1573_v35 }
 0x14a   : > { %v1581_v28 = vmul.f32 1.442695, %v1580_v26  ;;  %v1487_v9 = vrot.slane %v1486_v34, 4  ;;  %3118 = vmatmul.msk.bf16.gmra.mxu2 %vm409_vm0, %v3788_v51  ;;  %3206 = vpow2.f32 %v1576_v18  ;;  %v1425_v53 = vadd.f32 %v1424_v15, %v1423_v41 }
 0x14b   : > { %v1261_v7 = vrot.slane %v1260_v54, 1  ;;  %v1552_v32 = vadd.f32 %v1540_v46, %v1539_v37  ;;  %3112 = vmatmul.msk.bf16.gmra.mxu1 %vm409_vm0, %v4012_v22  ;;  %v1587_v47 = vmul.f32 1.442695, %v1586_v1  ;;  %3122 = vmatmul.msk.bf16.gmra.mxu3 %vm409_vm0, %v3782_v63  ;;  %v1245_v51 = vmul.f32 %v1231_v25, %v3709_v38 }
 0x14c   : > { %3208 = vpow2.f32 %v1581_v28  ;;  %v1488_v56 = vadd.f32 %v1487_v9, %v1486_v34  ;;  %v1426_v35 = vrot.slane %v1425_v53, 1  ;;  %v1410_v37 = vmul.f32 %v1396_v43, %v3489_v61 }
 0x14d   : > { %v1262_v26 = vadd.f32 %v1261_v7, %v1260_v54  ;;  %v1553_v29 = vrot.slane %v1552_v32, 4  ;;  %v1461_v5 = vpop.f32.mrf.mxu2  ;;  %3210 = vpow2.f32 %v1587_v47 }
 0x14e   : > { %v1489_v30 = vrot.slane %v1488_v56, 2  ;;  %v1475_v12 = vmul.f32 %v1461_v5, %v3919_v24  ;;  %v1233_v41 = vpop.f32.mrf.mxu0  ;;  %v1427_v44 = vadd.f32 %v1426_v35, %v1425_v53  ;;  %v1527_v34 = vpop.f32.mrf.mxu3 }
 0x14f   : > { %v3205_v49 = vpop.eup %3204  ;;  %v4023_v18 = vsel %vm710_vm1, %v1262_v26, %v3990_v50  ;;  %v1554_v63 = vadd.f32 %v1553_v29, %v1552_v32  ;;  %v1246_v54 = vmul.f32 %v1233_v41, %v3714_v2  ;;  %v1398_v15 = vpop.f32.mrf.mxu1  ;;  %v1541_v28 = vmul.f32 %v1527_v34, %v3919_v24 }
 0x150   : > { %v1293_v25 = vsub.f32 1.0, %v3205_v49  ;;  %v1490_v46 = vadd.f32 %v1489_v30, %v1488_v56  ;;  %v1411_v43 = vmul.f32 %v1398_v15, %v3491_v62  ;;  %v3207_v1 = vpop.eup %3206  ;;  %v4030_v9 = vsel %vm710_vm1, %v1427_v44, %v3993_v27 }
 0x151   : > { %v1555_v7 = vrot.slane %v1554_v63, 2  ;;  %v1263_v50 = vadd.f32 %v1246_v54, %v1245_v51  ;;  %v4035_v56 = vmul.f32 %v3867_v3, %v3794_v39  ;;  %v1578_v27 = vsub.f32 1.0, %v3207_v1 }
 0x152   : > { %v3209_v47 = vpop.eup %3208  ;;  %v1294_v53 = vadd.f32 %v1293_v25, %v3821_v31  ;;  %v1491_v32 = vrot.slane %v1490_v46, 1  ;;  %v1428_v26 = vadd.f32 %v1411_v43, %v1410_v37  ;;  %v4042_v43 = vld [vmem:[#allocation1 + $0x3] ss:$9 sm:$0xff] }
 0x153   : > { %v1583_v35 = vsub.f32 1.0, %v3209_v47  ;;  %v1556_v29 = vadd.f32 %v1555_v7, %v1554_v63  ;;  %v1264_v5 = vrot.slane %v1263_v50, 4  ;;  %v3211_v30 = vpop.eup %3210  ;;  %v1297_v1 = vperm.slane %v4035_v56, 0 }
 0x154   : > { %v1295_v41 = vmul.f32 0.33333334, %v1294_v53  ;;  %v1492_v49 = vadd.f32 %v1491_v32, %v1490_v46  ;;  %v1429_v34 = vrot.slane %v1428_v26, 4 }
 0x155   : > { %v1557_v44 = vrot.slane %v1556_v29, 1  ;;  %v1265_v15 = vadd.f32 %v1264_v5, %v1263_v50  ;;  %v1463_v51 = vpop.f32.mrf.mxu2  ;;  %v1584_v39 = vadd.f32 %v1583_v35, %v1578_v27  ;;  %v1663_v50 = vperm.slane %v3521_v20, 2 }
 0x156   : > { %v1331_v54 = vsub.f32 1.0, %v1295_v41  ;;  %v4039_v31 = vsel %vm710_vm1, %v1492_v49, %v3998_v10  ;;  %v1430_v37 = vadd.f32 %v1429_v34, %v1428_v26  ;;  %v1476_v63 = vmul.f32 %v1463_v51, %v3925_v40  ;;  %v1236_v25 = vpop.f32.mrf.mxu0  ;;  %v1529_v46 = vpop.f32.mrf.mxu3 }
 0x157   : > { %v1558_v3 = vadd.f32 %v1557_v44, %v1556_v29  ;;  %v1266_v7 = vrot.slane %v1265_v15, 2  ;;  %v1401_v47 = vpop.f32.mrf.mxu1  ;;  %v1542_v10 = vmul.f32 %v1529_v46, %v3925_v40  ;;  %v1589_v26 = vsub.f32 1.0, %v3211_v30 }
 0x158   : > { %1333 = vst [vmem:[#allocation1] sm:$0xff] %v1331_v54  ;;  %v1431_v53 = vrot.slane %v1430_v37, 2  ;;  %v1493_v32 = vadd.f32 %v1476_v63, %v1475_v12  ;;  %v1299_v35 = vmul.f32 %v1297_v1, %v1295_v41  ;;  %v1247_v51 = vmul.f32 %v1236_v25, %v3709_v38 }
 0x159   : > { %v4049_v5 = vsel %vm710_vm1, %v1558_v3, %v4002_v11  ;;  %v1267_v49 = vadd.f32 %v1266_v7, %v1265_v15  ;;  %3109 = vmatmul.msk.bf16.gmra.mxu0 %vm409_vm0, %v3847_v33  ;;  %v1559_v27 = vadd.f32 %v1542_v10, %v1541_v28  ;;  %v1590_v44 = vadd.f32 %v1589_v26, %v1584_v39 }
 0x15a   : > { %v1432_v29 = vadd.f32 %v1431_v53, %v1430_v37  ;;  %v1494_v34 = vrot.slane %v1493_v32, 4  ;;  %3119 = vmatmul.msk.bf16.gmra.mxu2 %vm409_vm0, %v3836_v55  ;;  %v4058_v11 = vperm.slane %v1299_v35, 3  ;;  %v1412_v41 = vmul.f32 %v1401_v47, %v3489_v61 }
 0x15b   : > { %v1268_v12 = vrot.slane %v1267_v49, 1  ;;  %3113 = vmatmul.msk.bf16.gmra.mxu1 %vm409_vm0, %v3842_v16  ;;  %v1560_v63 = vrot.slane %v1559_v27, 4  ;;  %3123 = vmatmul.msk.bf16.gmra.mxu3 %vm409_vm0, %v3847_v33  ;;  %v1664_v16 = vsub.f32 %v1663_v50, %v3348_v13 }
 0x15c   : > { %v1433_v30 = vrot.slane %v1432_v29, 1  ;;  %v1495_v15 = vadd.f32 %v1494_v34, %v1493_v32  ;;  %v1309_v55 = vmul.f32 %v3951_v36, %v4058_v11  ;;  %v1319_v38 = vmul.f32 %v3960_v17, %v4058_v11 }
 0x15d   : > { %v1269_v28 = vadd.f32 %v1268_v12, %v1267_v49  ;;  %v1466_v37 = vpop.f32.mrf.mxu2  ;;  %v1561_v3 = vadd.f32 %v1560_v63, %v1559_v27  ;;  %v1666_v12 = vand.u32 2147483647, %v1664_v16 }
 0x15e   : > { %v1434_v25 = vadd.f32 %v1433_v30, %v1432_v29  ;;  %v1496_v39 = vrot.slane %v1495_v15, 2  ;;  %v1477_v61 = vmul.f32 %v1466_v37, %v3919_v24  ;;  %v1238_v7 = vpop.f32.mrf.mxu0  ;;  %v1532_v47 = vpop.f32.mrf.mxu3  ;;  %v4077_v17 = vadd.f32 %v1309_v55, %v3976_v48 }
 0x15f   : > { %v1335_v46 = vld [vmem:[#allocation1 + $0x3] ss:$9 sm:$0xff]  ;;  %v4073_v33 = vsel %vm712_vm2, %v1269_v28, %v4023_v18  ;;  %v1248_v36 = vmul.f32 %v1238_v7, %v3714_v2  ;;  %v1403_v1 = vpop.f32.mrf.mxu1  ;;  %v4080_v53 = vadd.f32 %v1319_v38, %v3937_v8  ;;  %v1562_v26 = vrot.slane %v1561_v3, 2 }
 0x160   : > { %1338 = vst [vmem:[#allocation1] sm:$0xff] %v1331_v54  ;;  %v4084_v32 = vsel %vm712_vm2, %v1434_v25, %v4030_v9  ;;  %v1497_v10 = vadd.f32 %v1496_v39, %v1495_v15  ;;  %v1543_v18 = vmul.f32 %v1532_v47, %v3919_v24  ;;  %v1413_v35 = vmul.f32 %v1403_v1, %v3491_v62 }
 0x161   : > { %v1270_v49 = vadd.f32 %v1248_v36, %v1247_v51  ;;  %v1591_v2 = vmul.f32 0.33333334, %v1590_v44  ;;  %v1563_v48 = vadd.f32 %v1562_v26, %v1561_v3  ;;  %v4089_v54 = vmul.f32 %v1335_v46, %v4035_v56 }
 0x162   : > { %v1498_v29 = vrot.slane %v1497_v10, 1  ;;  %v1435_v27 = vadd.f32 %v1413_v35, %v1412_v41  ;;  %v1668_v16 = vsub.f32 1.0, %v1666_v12  ;;  %v1665_v47 = vsub.f32 %v1663_v50, %v3350_v14 }
 0x163   : > { %v1271_v34 = vrot.slane %v1270_v49, 4  ;;  %v1564_v30 = vrot.slane %v1563_v48, 1  ;;  %v1627_v28 = vsub.f32 1.0, %v1591_v2  ;;  %v1593_v39 = vperm.slane %v4089_v54, 0 }
 0x164   : > { %v1499_v8 = vadd.f32 %v1498_v29, %v1497_v10  ;;  %v1436_v63 = vrot.slane %v1435_v27, 4  ;;  %v4113_v35 = vmax.f32 %v1668_v16, 0.0 }
 0x165   : > { %v1272_v9 = vadd.f32 %v1271_v34, %v1270_v49  ;;  %v1468_v15 = vpop.f32.mrf.mxu2  ;;  %v1565_v62 = vadd.f32 %v1564_v30, %v1563_v48 }
 0x166   : > { %v4093_v24 = vsel %vm712_vm2, %v1499_v8, %v4039_v31  ;;  %v1478_v44 = vmul.f32 %v1468_v15, %v3925_v40  ;;  %v1682_v51 = vpop.f32.mrf.mxu0  ;;  %v1437_v55 = vadd.f32 %v1436_v63, %v1435_v27  ;;  %v1534_v38 = vpop.f32.mrf.mxu3 }
 0x167   : > { %v4096_v37 = vld [vmem:[#allocation1 + $0x3] ss:$9 sm:$0xff]  ;;  %v1273_v41 = vrot.slane %v1272_v9, 2  ;;  %v1747_v56 = vpop.f32.mrf.mxu1  ;;  %v4100_v25 = vsel %vm712_vm2, %v1565_v62, %v4049_v5  ;;  %v1544_v3 = vmul.f32 %v1534_v38, %v3925_v40  ;;  %v1667_v40 = vand.u32 2147483647, %v1665_v47 }
 0x168   : > { %1629 = vst [vmem:[#allocation1] sm:$0xff] %v1627_v28  ;;  %v1500_v31 = vadd.f32 %v1478_v44, %v1477_v61  ;;  %v1438_v46 = vrot.slane %v1437_v55, 2  ;;  %v1595_v61 = vmul.f32 %v1593_v39, %v1591_v2  ;;  %v1702_v34 = vmul.f32 %v1682_v51, %v3543_v59 }
 0x169   : > { %v1274_v7 = vadd.f32 %v1273_v41, %v1272_v9  ;;  %3124 = vmatmul.msk.bf16.vlgmr.msrb.gmra.mxu0 %vm409_vm0, %v3915_v45  ;;  %v1566_v1 = vadd.f32 %v1544_v3, %v1543_v18  ;;  %v1669_v29 = vsub.f32 1.0, %v1667_v40  ;;  %v1767_v27 = vmul.f32 %v1747_v56, %v4113_v35 }
 0x16a   : > { %v1501_v36 = vrot.slane %v1500_v31, 4  ;;  %3134 = vmatmul.msk.bf16.vlgmr.msrb.gmra.mxu2 %vm409_vm0, %v3904_v6  ;;  %v1439_v10 = vadd.f32 %v1438_v46, %v1437_v55  ;;  %v1596_v62 = vperm.slane %v1595_v61, 3 }
 0x16b   : > { %v1275_v5 = vrot.slane %v1274_v7, 1  ;;  %3130 = vmatmul.msk.bf16.vlgmr.msrb.gmra.mxu1 %vm409_vm0, %v3909_v42  ;;  %v1567_v49 = vrot.slane %v1566_v1, 4  ;;  %3138 = vmatmul.msk.bf16.vlgmr.msrb.gmra.mxu3 %vm409_vm0, %v3915_v45  ;;  %v4124_v9 = vmax.f32 %v1669_v29, 0.0 }
 0x16c   : > { %v1502_v26 = vadd.f32 %v1501_v36, %v1500_v31  ;;  %v1440_v50 = vrot.slane %v1439_v10, 1 }
 0x16d   : > { %v1276_v20 = vadd.f32 %v1275_v5, %v1274_v7  ;;  %v1813_v18 = vpop.f32.mrf.mxu2  ;;  %v1568_v6 = vadd.f32 %v1567_v49, %v1566_v1 }
 0x16e   : > { %v1503_v48 = vrot.slane %v1502_v26, 2  ;;  %v1684_v42 = vpop.f32.mrf.mxu0  ;;  %v1441_v8 = vadd.f32 %v1440_v50, %v1439_v10  ;;  %v1978_v30 = vpop.f32.mrf.mxu3  ;;  %v1833_v5 = vmul.f32 %v1813_v18, %v4113_v35 }
 0x16f   : > { %v4119_v12 = vld [vmem:[#allocation1 + $0x3] ss:$9 sm:$0xff]  ;;  %v1327_v2 = vsel %vm714_vm3, %v1276_v20, %v4073_v33  ;;  %v1703_v45 = vmul.f32 %v1684_v42, %v3545_v60  ;;  %v1749_v63 = vpop.f32.mrf.mxu1  ;;  %v1569_v51 = vrot.slane %v1568_v6, 2 }
 0x170   : > { %1634 = vst [vmem:[#allocation1] sm:$0xff] %v1627_v28  ;;  %v1329_v15 = vmul.f32 %v1327_v2, %v4058_v11  ;;  %v1504_v44 = vadd.f32 %v1503_v48, %v1502_v26  ;;  %v1603_v41 = vsel %vm714_vm3, %v1441_v8, %v4084_v32  ;;  %v1768_v38 = vmul.f32 %v1749_v63, %v4124_v9 }
 0x171   : > { %v1710_v55 = vadd.f32 %v1703_v45, %v1702_v34  ;;  %v1605_v16 = vmul.f32 %v1603_v41, %v1596_v62  ;;  %v1570_v39 = vadd.f32 %v1569_v51, %v1568_v6  ;;  %v1998_v34 = vmul.f32 %v1978_v30, %v3761_v23  ;;  %v3250_v30 = vld [vmem:[%s3337_s22 + $0x10] sm:$0xf] }
 0x172   : > { %v1330_v33 = vadd.f32 %v1329_v15, %v3943_v0  ;;  %v1505_v56 = vrot.slane %v1504_v44, 1  ;;  %v1775_v3 = vadd.f32 %v1768_v38, %v1767_v27  ;;  %v1869_v15 = vsub.f32 0.0, %v3250_v30 }
 0x173   : > { %v1711_v31 = vrot.slane %v1710_v55, 4  ;;  %v4132_v28 = vadd.f32 %v1605_v16, %v4077_v17  ;;  %v1571_v7 = vrot.slane %v1570_v39, 1 }
 0x174   : > { %v1506_v11 = vadd.f32 %v1505_v56, %v1504_v44  ;;  %v1776_v47 = vrot.slane %v1775_v3, 4 }
 0x175   : > { %v1712_v46 = vadd.f32 %v1711_v31, %v1710_v55  ;;  %v1815_v36 = vpop.f32.mrf.mxu2  ;;  %v1572_v1 = vadd.f32 %v1571_v7, %v1570_v39 }
 0x176   : > { %v1613_v32 = vsel %vm714_vm3, %v1506_v11, %v4093_v24  ;;  %v1834_v0 = vmul.f32 %v1815_v36, %v4124_v9  ;;  %v1687_v10 = vpop.f32.mrf.mxu0  ;;  %v1777_v26 = vadd.f32 %v1776_v47, %v1775_v3  ;;  %v1980_v49 = vpop.f32.mrf.mxu3 }
 0x177   : > { %v1615_v40 = vmul.f32 %v1613_v32, %v1596_v62  ;;  %v1713_v61 = vrot.slane %v1712_v46, 2  ;;  %v1752_v17 = vpop.f32.mrf.mxu1  ;;  %v1623_v20 = vsel %vm714_vm3, %v1572_v1, %v4100_v25  ;;  %v1999_v29 = vmul.f32 %v1980_v49, %v3763_v57 }
 0x178   : > { %v1841_v50 = vadd.f32 %v1834_v0, %v1833_v5  ;;  %v1625_v24 = vmul.f32 %v1623_v20, %v1596_v62  ;;  %v1778_v6 = vrot.slane %v1777_v26, 2  ;;  %v1769_v45 = vmul.f32 %v1752_v17, %v4113_v35 }
 0x179   : > { %v4142_v48 = vadd.f32 %v1615_v40, %v4080_v53  ;;  %v1714_v18 = vadd.f32 %v1713_v61, %v1712_v46  ;;  %3125 = vmatmul.msk.bf16.gmra.mxu0 %vm409_vm0, %v3979_v4  ;;  %v2006_v8 = vadd.f32 %v1999_v29, %v1998_v34  ;;  %v1704_v38 = vmul.f32 %v1687_v10, %v3543_v59 }
 0x17a   : > { %v1842_v27 = vrot.slane %v1841_v50, 4  ;;  %3135 = vmatmul.msk.bf16.gmra.mxu2 %vm409_vm0, %v3966_v52  ;;  %v4149_v25 = vadd.f32 %v1625_v24, %v1330_v33  ;;  %v1779_v2 = vadd.f32 %v1778_v6, %v1777_v26 }
 0x17b   : > { %v1715_v42 = vrot.slane %v1714_v18, 1  ;;  %3131 = vmatmul.msk.bf16.gmra.mxu1 %vm409_vm0, %v3971_v19  ;;  %3139 = vmatmul.msk.bf16.gmra.mxu3 %vm409_vm0, %v3979_v4  ;;  %v2007_v39 = vrot.slane %v2006_v8, 4 }
 0x17c   : > { %v1843_v53 = vadd.f32 %v1842_v27, %v1841_v50  ;;  %v1780_v62 = vrot.slane %v1779_v2, 1 }
 0x17d   : > { %v4156_v63 = vadd.f32 %v1715_v42, %v1714_v18  ;;  %v1818_v52 = vpop.f32.mrf.mxu2  ;;  %v2008_v0 = vadd.f32 %v2007_v39, %v2006_v8 }
 0x17e   : > { %v1844_v44 = vrot.slane %v1843_v53, 2  ;;  %v1835_v51 = vmul.f32 %v1818_v52, %v4113_v35  ;;  %v1689_v41 = vpop.f32.mrf.mxu0  ;;  %v4161_v19 = vadd.f32 %v1780_v62, %v1779_v2  ;;  %v1983_v33 = vpop.f32.mrf.mxu3 }
 0x17f   : > { %v1870_v55 = vmax.f32 %v4156_v63, 0.0  ;;  %v1705_v16 = vmul.f32 %v1689_v41, %v3545_v60  ;;  %v1754_v4 = vpop.f32.mrf.mxu1  ;;  %v2009_v6 = vrot.slane %v2008_v0, 2  ;;  %v2000_v2 = vmul.f32 %v1983_v33, %v3761_v23 }
 0x180   : > { %v1845_v56 = vadd.f32 %v1844_v44, %v1843_v53  ;;  %v1770_v31 = vmul.f32 %v1754_v4, %v4124_v9  ;;  %v1875_v11 = vmax.f32 %v4161_v19, 0.0  ;;  %v3251_v44 = vld [vmem:[%s3378_s28 + $0x10] sm:$0xff] }
 0x181   : > { %v1871_v3 = vmul.f32 %v1870_v55, %v1869_v15  ;;  %v1717_v7 = vadd.f32 %v1705_v16, %v1704_v38  ;;  %v3252_v55 = vld [vmem:[%s3371_s25 + $0x10] sm:$0xff]  ;;  %v2010_v38 = vadd.f32 %v2009_v6, %v2008_v0 }
 0x182   : > { %v1846_v46 = vrot.slane %v1845_v56, 1  ;;  %v1782_v47 = vadd.f32 %v1770_v31, %v1769_v45  ;;  %v1876_v32 = vmul.f32 %v1875_v11, %v1869_v15 }
 0x183   : > { %v1872_v36 = vmul.f32 1.442695, %v1871_v3  ;;  %v1718_v1 = vrot.slane %v1717_v7, 4 }
 0x184   : > { %v4167_v5 = vadd.f32 %v1846_v46, %v1845_v56  ;;  %v1783_v10 = vrot.slane %v1782_v47, 4  ;;  %v1877_v40 = vmul.f32 1.442695, %v1876_v32 }
 0x185   : > { %3212 = vpow2.f32 %v1872_v36  ;;  %v1719_v61 = vadd.f32 %v1718_v1, %v1717_v7  ;;  %v1820_v26 = vpop.f32.mrf.mxu2 }
 0x186   : > { %v1881_v49 = vmax.f32 %v4167_v5, 0.0  ;;  %v1784_v17 = vadd.f32 %v1783_v10, %v1782_v47  ;;  %v1836_v20 = vmul.f32 %v1820_v26, %v4124_v9  ;;  %v1692_v50 = vpop.f32.mrf.mxu0  ;;  %3214 = vpow2.f32 %v1877_v40  ;;  %v1985_v24 = vpop.f32.mrf.mxu3 }
 0x187   : > { %v1720_v29 = vrot.slane %v1719_v61, 2  ;;  %v1757_v42 = vpop.f32.mrf.mxu1  ;;  %v2001_v8 = vmul.f32 %v1985_v24, %v3763_v57  ;;  %v1706_v31 = vmul.f32 %v1692_v50, %v3543_v59  ;;  %v2011_v24 = vrot.slane %v2010_v38, 1 }
 0x188   : > { %v1882_v18 = vmul.f32 %v1881_v49, %v1869_v15  ;;  %v1785_v34 = vrot.slane %v1784_v17, 2  ;;  %v1848_v27 = vadd.f32 %v1836_v20, %v1835_v51  ;;  %v1771_v45 = vmul.f32 %v1757_v42, %v4113_v35 }
 0x189   : > { %v1721_v53 = vadd.f32 %v1720_v29, %v1719_v61  ;;  %3126 = vmatmul.msk.bf16.gmra.mxu0 %vm409_vm0, %v4012_v22  ;;  %v2013_v51 = vadd.f32 %v2001_v8, %v2000_v2 }
 0x18a   : > { %v1883_v30 = vmul.f32 1.442695, %v1882_v18  ;;  %v1786_v62 = vadd.f32 %v1785_v34, %v1784_v17  ;;  %v1849_v52 = vrot.slane %v1848_v27, 4  ;;  %3136 = vmatmul.msk.bf16.gmra.mxu2 %vm409_vm0, %v3251_v44 }
 0x18b   : > { %v3213_v15 = vpop.eup %3212  ;;  %v1722_v41 = vrot.slane %v1721_v53, 1  ;;  %3132 = vmatmul.msk.bf16.gmra.mxu1 %vm409_vm0, %v3252_v55  ;;  %3140 = vmatmul.msk.bf16.gmra.mxu3 %vm409_vm0, %v4012_v22  ;;  %v2014_v39 = vrot.slane %v2013_v51, 4 }
 0x18c   : > { %3216 = vpow2.f32 %v1883_v30  ;;  %v1787_v33 = vrot.slane %v1786_v62, 1  ;;  %v3215_v16 = vpop.eup %3214  ;;  %v1850_v56 = vadd.f32 %v1849_v52, %v1848_v27  ;;  %v1874_v11 = vsub.f32 1.0, %v3213_v15 }
 0x18d   : > { %v1723_v4 = vadd.f32 %v1722_v41, %v1721_v53  ;;  %v1823_v3 = vpop.f32.mrf.mxu2  ;;  %v1879_v7 = vsub.f32 1.0, %v3215_v16  ;;  %v2015_v0 = vadd.f32 %v2014_v39, %v2013_v51  ;;  %v1959_v39 = vperm.slane %v3523_v21, 2  ;;  %v3255_v21 = vld [vmem:[%s3371_s25 + $0x18] sm:$0xff] }
 0x18e   : > { %v1788_v46 = vadd.f32 %v1787_v33, %v1786_v62  ;;  %v1837_v47 = vmul.f32 %v1823_v3, %v4113_v35  ;;  %v1694_v36 = vpop.f32.mrf.mxu0  ;;  %v1851_v1 = vrot.slane %v1850_v56, 2  ;;  %v1988_v22 = vpop.f32.mrf.mxu3 }
 0x18f   : > { %v4186_v32 = vsel %vm710_vm1, %v1723_v4, %v4156_v63  ;;  %v1707_v10 = vmul.f32 %v1694_v36, %v3545_v60  ;;  %v1759_v61 = vpop.f32.mrf.mxu1  ;;  %v2016_v49 = vrot.slane %v2015_v0, 2  ;;  %v1880_v29 = vadd.f32 %v1879_v7, %v1874_v11  ;;  %v3253_v11 = vld [vmem:[%s3384_s5 + $0x18] sm:$0xff] }
 0x190   : > { %v4191_v40 = vsel %vm710_vm1, %v1788_v46, %v4161_v19  ;;  %v1852_v26 = vadd.f32 %v1851_v1, %v1850_v56  ;;  %v1772_v20 = vmul.f32 %v1759_v61, %v4124_v9  ;;  %v4194_v19 = vadd.f32 %v2011_v24, %v2010_v38  ;;  %v4214_v7 = vld [vmem:[#allocation1 + $0x3] ss:$9 sm:$0xff] }
 0x191   : > { %v1724_v17 = vadd.f32 %v1707_v10, %v1706_v31  ;;  %v2017_v6 = vadd.f32 %v2016_v49, %v2015_v0  ;;  %v3254_v0 = vld [vmem:[%s3378_s28 + $0x18] sm:$0xff]  ;;  %v1960_v49 = vsub.f32 %v1959_v39, %v3348_v13 }
 0x192   : > { %v3217_v50 = vpop.eup %3216  ;;  %v1853_v18 = vrot.slane %v1852_v26, 1  ;;  %v1789_v27 = vadd.f32 %v1772_v20, %v1771_v45  ;;  %v2002_v45 = vmul.f32 %v1988_v22, %v3761_v23 }
 0x193   : > { %v1885_v63 = vsub.f32 1.0, %v3217_v50  ;;  %v1725_v34 = vrot.slane %v1724_v17, 4  ;;  %v2018_v53 = vrot.slane %v2017_v6, 1 }
 0x194   : > { %v1854_v2 = vadd.f32 %v1853_v18, %v1852_v26  ;;  %v1790_v62 = vrot.slane %v1789_v27, 4 }
 0x195   : > { %v1886_v42 = vadd.f32 %v1885_v63, %v1880_v29  ;;  %v1825_v8 = vpop.f32.mrf.mxu2  ;;  %v1726_v30 = vadd.f32 %v1725_v34, %v1724_v17  ;;  %v2019_v51 = vadd.f32 %v2018_v53, %v2017_v6  ;;  %v1961_v17 = vsub.f32 %v1959_v39, %v3350_v14 }
 0x196   : > { %v1838_v52 = vmul.f32 %v1825_v8, %v4124_v9  ;;  %v1697_v44 = vpop.f32.mrf.mxu0  ;;  %v4201_v41 = vsel %vm710_vm1, %v1854_v2, %v4167_v5  ;;  %v1990_v55 = vpop.f32.mrf.mxu3  ;;  %v1791_v38 = vadd.f32 %v1790_v62, %v1789_v27 }
 0x197   : > { %v4197_v15 = vmul.f32 0.33333334, %v1886_v42  ;;  %v1727_v33 = vrot.slane %v1726_v30, 2  ;;  %v2003_v4 = vmul.f32 %v1990_v55, %v3763_v57  ;;  %v1762_v56 = vpop.f32.mrf.mxu1  ;;  %v4209_v5 = vsel %vm710_vm1, %v2019_v51, %v4194_v19 }
 0x198   : > { %v1855_v16 = vadd.f32 %v1838_v52, %v1837_v47  ;;  %v1773_v3 = vmul.f32 %v1762_v56, %v4113_v35  ;;  %v1792_v47 = vrot.slane %v1791_v38, 2  ;;  %v1708_v6 = vmul.f32 %v1697_v44, %v3543_v59 }
 0x199   : > { %v1923_v31 = vsub.f32 1.0, %v4197_v15  ;;  %3127 = vmatmul.msk.bf16.gmra.mxu0 %vm409_vm0, %v3253_v11  ;;  %v1728_v46 = vadd.f32 %v1727_v33, %v1726_v30  ;;  %v2020_v1 = vadd.f32 %v2003_v4, %v2002_v45  ;;  %v1962_v52 = vand.u32 2147483647, %v1960_v49 }
 0x19a   : > { %v1856_v36 = vrot.slane %v1855_v16, 4  ;;  %3137 = vmatmul.msk.bf16.gmra.mxu2 %vm409_vm0, %v3254_v0  ;;  %v1793_v10 = vadd.f32 %v1792_v47, %v1791_v38  ;;  %v1963_v55 = vand.u32 2147483647, %v1961_v17 }
 0x19b   : > { %1925 = vst [vmem:[#allocation1] sm:$0xff] %v1923_v31  ;;  %3133 = vmatmul.msk.bf16.gmra.mxu1 %vm409_vm0, %v3255_v21  ;;  %v1729_v22 = vrot.slane %v1728_v46, 1  ;;  %v2021_v26 = vrot.slane %v2020_v1, 4  ;;  %3141 = vmatmul.msk.bf16.gmra.mxu3 %vm409_vm0, %v3253_v11  ;;  %v1964_v56 = vsub.f32 1.0, %v1962_v52 }
 0x19c   : > { %v1857_v61 = vadd.f32 %v1856_v36, %v1855_v16  ;;  %v1794_v29 = vrot.slane %v1793_v10, 1  ;;  %v1965_v47 = vsub.f32 1.0, %v1963_v55 }
 0x19d   : > { %v1828_v20 = vpop.f32.mrf.mxu2  ;;  %v1730_v50 = vadd.f32 %v1729_v22, %v1728_v46  ;;  %v2022_v63 = vadd.f32 %v2021_v26, %v2020_v1 }
 0x19e   : > { %v1858_v24 = vrot.slane %v1857_v61, 2  ;;  %v1699_v18 = vpop.f32.mrf.mxu0  ;;  %v1839_v34 = vmul.f32 %v1828_v20, %v4113_v35  ;;  %v1993_v27 = vpop.f32.mrf.mxu3  ;;  %v1795_v53 = vadd.f32 %v1794_v29, %v1793_v10 }
 0x19f   : > { %v1709_v42 = vmul.f32 %v1699_v18, %v3545_v60  ;;  %v1898_v2 = vsel %vm712_vm2, %v1730_v50, %v4186_v32  ;;  %v2023_v30 = vrot.slane %v2022_v63, 2  ;;  %v1764_v62 = vpop.f32.mrf.mxu1  ;;  %v4237_v60 = vmul.f32 %v4119_v12, %v4089_v54  ;;  %v4529_v54 = vld [vmem:[#allocation7_spill] sm:$0xff] }
 0x1a0   : > { %v1859_v8 = vadd.f32 %v1858_v24, %v1857_v61  ;;  %v1774_v45 = vmul.f32 %v1764_v62, %v4124_v9  ;;  %v4231_v59 = vsel %vm712_vm2, %v1795_v53, %v4191_v40  ;;  %v2255_v12 = vperm.slane %v4529_v54, 2 }
 0x1a1   : > { %v1731_v51 = vadd.f32 %v1709_v42, %v1708_v6  ;;  %v2024_v44 = vadd.f32 %v2023_v30, %v2022_v63  ;;  %v2004_v61 = vmul.f32 %v1993_v27, %v3761_v23  ;;  %v4253_v50 = vmax.f32 %v1964_v56, 0.0 }
 0x1a2   : > { %v1860_v35 = vrot.slane %v1859_v8, 1  ;;  %v4233_v33 = vld [vmem:[#allocation1 + $0x3] ss:$9 sm:$0xff]  ;;  %v1796_v38 = vadd.f32 %v1774_v45, %v1773_v3  ;;  %v4256_v18 = vmax.f32 %v1965_v47, 0.0  ;;  %v2256_v23 = vsub.f32 %v2255_v12, %v3348_v13 }
 0x1a3   : > { %v1732_v32 = vrot.slane %v1731_v51, 4  ;;  %1930 = vst [vmem:[#allocation1] sm:$0xff] %v1923_v31  ;;  %v2025_v4 = vrot.slane %v2024_v44, 1  ;;  %v1889_v31 = vperm.slane %v4237_v60, 0 }
 0x1a4   : > { %v1861_v16 = vadd.f32 %v1860_v35, %v1859_v8  ;;  %v1797_v11 = vrot.slane %v1796_v38, 4 }
 0x1a5   : > { %v1733_v39 = vadd.f32 %v1732_v32, %v1731_v51  ;;  %v1830_v46 = vpop.f32.mrf.mxu2  ;;  %v2026_v36 = vadd.f32 %v2025_v4, %v2024_v44  ;;  %v1891_v29 = vmul.f32 %v1889_v31, %v4197_v15 }
 0x1a6   : > { %v4241_v40 = vsel %vm712_vm2, %v1861_v16, %v4201_v41  ;;  %v1840_v1 = vmul.f32 %v1830_v46, %v4124_v9  ;;  %v2043_v0 = vpop.f32.mrf.mxu0  ;;  %v1798_v3 = vadd.f32 %v1797_v11, %v1796_v38  ;;  %v1995_v22 = vpop.f32.mrf.mxu3  ;;  %v2257_v9 = vsub.f32 %v2255_v12, %v3350_v14 }
 0x1a7   : > { %v1734_v21 = vrot.slane %v1733_v39, 2  ;;  %v4248_v10 = vsel %vm712_vm2, %v2026_v36, %v4209_v5  ;;  %v2005_v41 = vmul.f32 %v1995_v22, %v3763_v57  ;;  %v2109_v49 = vpop.f32.mrf.mxu1  ;;  %v1892_v30 = vperm.slane %v1891_v29, 3 }
 0x1a8   : > { %v1862_v26 = vadd.f32 %v1840_v1, %v1839_v34  ;;  %v1799_v20 = vrot.slane %v1798_v3, 2  ;;  %v2259_v57 = vand.u32 2147483647, %v2257_v9  ;;  %v2063_v15 = vmul.f32 %v2043_v0, %v4253_v50  ;;  %v3256_v9 = vld [vmem:[%s3337_s22 + $0x14] sm:$0xf] }
 0x1a9   : > { %v1735_v17 = vadd.f32 %v1734_v21, %v1733_v39  ;;  %v2027_v63 = vadd.f32 %v2005_v41, %v2004_v61  ;;  %v2129_v35 = vmul.f32 %v2109_v49, %v4253_v50  ;;  %v2258_v38 = vand.u32 2147483647, %v2256_v23 }
 0x1aa   : > { %v1863_v24 = vrot.slane %v1862_v26, 4  ;;  %v1800_v6 = vadd.f32 %v1799_v20, %v1798_v3  ;;  %v2261_v11 = vsub.f32 1.0, %v2259_v57 }
 0x1ab   : > { %v1736_v5 = vrot.slane %v1735_v17, 1  ;;  %v2028_v27 = vrot.slane %v2027_v63, 4  ;;  %v2260_v31 = vsub.f32 1.0, %v2258_v38 }
 0x1ac   : > { %v1864_v34 = vadd.f32 %v1863_v24, %v1862_v26  ;;  %v1801_v53 = vrot.slane %v1800_v6, 1  ;;  %v4274_v26 = vmax.f32 %v2261_v11, 0.0 }
 0x1ad   : > { %v1737_v42 = vadd.f32 %v1736_v5, %v1735_v17  ;;  %v4259_v8 = vpop.f32.mrf.mxu2  ;;  %v2029_v52 = vadd.f32 %v2028_v27, %v2027_v63  ;;  %v2165_v17 = vsub.f32 0.0, %v3256_v9 }
 0x1ae   : > { %v1865_v62 = vrot.slane %v1864_v34, 2  ;;  %v2045_v51 = vpop.f32.mrf.mxu0  ;;  %v1802_v55 = vadd.f32 %v1801_v53, %v1800_v6  ;;  %v2339_v44 = vpop.f32.mrf.mxu3 }
 0x1af   : > { %v1899_v45 = vsel %vm714_vm3, %v1737_v42, %v1898_v2  ;;  %v2064_v32 = vmul.f32 %v2045_v51, %v4256_v18  ;;  %v2030_v56 = vrot.slane %v2029_v52, 2  ;;  %v2111_v39 = vpop.f32.mrf.mxu1 }
 0x1b0   : > { %v1901_v16 = vmul.f32 %v1899_v45, %v1892_v30  ;;  %v1866_v4 = vadd.f32 %v1865_v62, %v1864_v34  ;;  %v1909_v46 = vsel %vm714_vm3, %v1802_v55, %v4231_v59  ;;  %v2130_v36 = vmul.f32 %v2111_v39, %v4256_v18 }
 0x1b1   : > { %v2071_v47 = vadd.f32 %v2064_v32, %v2063_v15  ;;  %v1911_v1 = vmul.f32 %v1909_v46, %v1892_v30  ;;  %v2031_v54 = vadd.f32 %v2030_v56, %v2029_v52  ;;  %v4281_v34 = vmax.f32 %v2260_v31, 0.0  ;;  %v4530_v31 = vld [vmem:[#allocation11_spill] sm:$0xff] }
 0x1b2   : > { %v4269_v2 = vadd.f32 %v1901_v16, %v4132_v28  ;;  %v1867_v0 = vrot.slane %v1866_v4, 1  ;;  %v2137_v21 = vadd.f32 %v2130_v36, %v2129_v35  ;;  %v2166_v28 = vmax.f32 %v4194_v19, 0.0 }
 0x1b3   : > { %v2072_v12 = vrot.slane %v2071_v47, 4  ;;  %v4272_v3 = vadd.f32 %v1911_v1, %v4142_v48  ;;  %v2032_v61 = vrot.slane %v2031_v54, 1  ;;  %v2359_v51 = vmul.f32 %v2339_v44, %v4281_v34 }
 0x1b4   : > { %v1868_v22 = vadd.f32 %v1867_v0, %v1866_v4  ;;  %v2138_v41 = vrot.slane %v2137_v21, 4 }
 0x1b5   : > { %v2073_v59 = vadd.f32 %v2072_v12, %v2071_v47  ;;  %v2276_v49 = vpop.f32.mrf.mxu2  ;;  %v2033_v29 = vadd.f32 %v2032_v61, %v2031_v54 }
 0x1b6   : > { %v1919_v20 = vsel %vm714_vm3, %v1868_v22, %v4241_v40  ;;  %v2048_v24 = vpop.f32.mrf.mxu0  ;;  %v2139_v48 = vadd.f32 %v2138_v41, %v2137_v21  ;;  %v2341_v6 = vpop.f32.mrf.mxu3  ;;  %v2295_v22 = vmul.f32 %v2276_v49, %v4530_v31 }
 0x1b7   : > { %v1921_v63 = vmul.f32 %v1919_v20, %v1892_v30  ;;  %v2074_v5 = vrot.slane %v2073_v59, 2  ;;  %v2065_v23 = vmul.f32 %v2048_v24, %v4253_v50  ;;  %v4285_v27 = vsel %vm714_vm3, %v2033_v29, %v4248_v10 }
 0x1b8   : > { %v2114_v57 = vpop.f32.mrf.mxu1  ;;  %v2140_v40 = vrot.slane %v2139_v48, 2  ;;  %v2167_v30 = vmul.f32 %v2166_v28, %v2165_v17  ;;  %v2360_v62 = vmul.f32 %v2341_v6, %v4274_v26  ;;  %v4531_v28 = vld [vmem:[#allocation10_spill] sm:$0xff] }
 0x1b9   : > { %v4288_v19 = vadd.f32 %v1921_v63, %v4149_v25  ;;  %v2075_v42 = vadd.f32 %v2074_v5, %v2073_v59  ;;  %v2131_v53 = vmul.f32 %v2114_v57, %v4253_v50  ;;  %v2294_v20 = vmul.f32 %v4259_v8, %v4531_v28 }
 0x1ba   : > { %v2141_v15 = vadd.f32 %v2140_v40, %v2139_v48  ;;  %v2168_v35 = vmul.f32 1.442695, %v2167_v30  ;;  %v2367_v32 = vadd.f32 %v2360_v62, %v2359_v51 }
 0x1bb   : > { %v2076_v52 = vrot.slane %v2075_v42, 1  ;;  %v2302_v57 = vadd.f32 %v2295_v22, %v2294_v20 }
 0x1bc   : > { %v2142_v55 = vrot.slane %v2141_v15, 1  ;;  %3218 = vpow2.f32 %v2168_v35  ;;  %v2368_v1 = vrot.slane %v2367_v32, 4 }
 0x1bd   : > { %v4293_v45 = vadd.f32 %v2076_v52, %v2075_v42  ;;  %v2279_v10 = vpop.f32.mrf.mxu2 }
 0x1be   : > { %v2050_v38 = vpop.f32.mrf.mxu0  ;;  %v4296_v16 = vadd.f32 %v2142_v55, %v2141_v15  ;;  %v2344_v4 = vpop.f32.mrf.mxu3  ;;  %v2369_v29 = vadd.f32 %v2368_v1, %v2367_v32  ;;  %v2296_v24 = vmul.f32 %v2279_v10, %v4531_v28 }
 0x1bf   : > { %v2171_v25 = vmax.f32 %v4293_v45, 0.0  ;;  %v2066_v56 = vmul.f32 %v2050_v38, %v4256_v18  ;;  %v2361_v39 = vmul.f32 %v2344_v4, %v4281_v34  ;;  %v2303_v38 = vrot.slane %v2302_v57, 4 }
 0x1c0   : > { %v2116_v11 = vpop.f32.mrf.mxu1  ;;  %v2177_v44 = vmax.f32 %v4296_v16, 0.0  ;;  %v2370_v51 = vrot.slane %v2369_v29, 2 }
 0x1c1   : > { %v2172_v46 = vmul.f32 %v2171_v25, %v2165_v17  ;;  %v2078_v47 = vadd.f32 %v2066_v56, %v2065_v23  ;;  %v2132_v36 = vmul.f32 %v2116_v11, %v4256_v18 }
 0x1c2   : > { %v2178_v54 = vmul.f32 %v2177_v44, %v2165_v17  ;;  %v3219_v23 = vpop.eup %3218 }
 0x1c3   : > { %v2173_v0 = vmul.f32 1.442695, %v2172_v46  ;;  %v2079_v12 = vrot.slane %v2078_v47, 4  ;;  %v2144_v21 = vadd.f32 %v2132_v36, %v2131_v53  ;;  %v2170_v35 = vsub.f32 1.0, %v3219_v23  ;;  %v4532_v23 = vld [vmem:[#allocation9_spill] sm:$0xff] }
 0x1c4   : > { %v2179_v61 = vmul.f32 1.442695, %v2178_v54 }
 0x1c5   : > { %3220 = vpow2.f32 %v2173_v0  ;;  %v2080_v59 = vadd.f32 %v2079_v12, %v2078_v47  ;;  %v2145_v41 = vrot.slane %v2144_v21, 4  ;;  %v2281_v9 = vpop.f32.mrf.mxu2  ;;  %v4312_v0 = vmul.f32 %v4233_v33, %v4237_v60 }
 0x1c6   : > { %v2297_v63 = vmul.f32 %v2281_v9, %v4530_v31  ;;  %v2053_v5 = vpop.f32.mrf.mxu0  ;;  %3222 = vpow2.f32 %v2179_v61  ;;  %v2346_v6 = vpop.f32.mrf.mxu3 }
 0x1c7   : > { %v2081_v17 = vrot.slane %v2080_v59, 2  ;;  %v2146_v48 = vadd.f32 %v2145_v41, %v2144_v21  ;;  %v2067_v49 = vmul.f32 %v2053_v5, %v4253_v50  ;;  %v2362_v40 = vmul.f32 %v2346_v6, %v4274_v26 }
 0x1c8   : > { %v2309_v42 = vadd.f32 %v2297_v63, %v2296_v24  ;;  %v2119_v53 = vpop.f32.mrf.mxu1  ;;  %v2185_v5 = vperm.slane %v4312_v0, 0 }
 0x1c9   : > { %v2082_v30 = vadd.f32 %v2081_v17, %v2080_v59  ;;  %v2147_v8 = vrot.slane %v2146_v48, 2  ;;  %v2133_v62 = vmul.f32 %v2119_v53, %v4253_v50  ;;  %v2374_v52 = vadd.f32 %v2362_v40, %v2361_v39 }
 0x1ca   : > { %v2310_v11 = vrot.slane %v2309_v42, 4  ;;  %v2371_v39 = vadd.f32 %v2370_v51, %v2369_v29  ;;  %v2304_v59 = vadd.f32 %v2303_v38, %v2302_v57  ;;  %v2551_v57 = vperm.slane %v4532_v23, 2  ;;  %v4327_v51 = vld [vmem:[#allocation1 + $0x3] ss:$9 sm:$0xff] }
 0x1cb   : > { %v3221_v15 = vpop.eup %3220  ;;  %v2083_v55 = vrot.slane %v2082_v30, 1  ;;  %v2148_v10 = vadd.f32 %v2147_v8, %v2146_v48  ;;  %v2375_v46 = vrot.slane %v2374_v52, 4 }
 0x1cc   : > { %v2175_v32 = vsub.f32 1.0, %v3221_v15  ;;  %v3223_v25 = vpop.eup %3222  ;;  %v2311_v33 = vadd.f32 %v2310_v11, %v2309_v42  ;;  %v2372_v17 = vrot.slane %v2371_v39, 1  ;;  %v2305_v8 = vrot.slane %v2304_v59, 2 }
 0x1cd   : > { %v2084_v4 = vadd.f32 %v2083_v55, %v2082_v30  ;;  %v2149_v56 = vrot.slane %v2148_v10, 1  ;;  %v2284_v44 = vpop.f32.mrf.mxu2  ;;  %v2181_v36 = vsub.f32 1.0, %v3223_v25  ;;  %v2376_v21 = vadd.f32 %v2375_v46, %v2374_v52 }
 0x1ce   : > { %v2176_v47 = vadd.f32 %v2175_v32, %v2170_v35  ;;  %v2055_v1 = vpop.f32.mrf.mxu0  ;;  %v2349_v22 = vpop.f32.mrf.mxu3  ;;  %v2312_v52 = vrot.slane %v2311_v33, 2  ;;  %v2298_v55 = vmul.f32 %v2284_v44, %v4531_v28 }
 0x1cf   : > { %v4316_v54 = vsel %vm710_vm1, %v2084_v4, %v4293_v45  ;;  %v2150_v12 = vadd.f32 %v2149_v56, %v2148_v10  ;;  %v2363_v41 = vmul.f32 %v2349_v22, %v4281_v34  ;;  %v2068_v9 = vmul.f32 %v2055_v1, %v4256_v18 }
 0x1d0   : > { %v2182_v61 = vadd.f32 %v2181_v36, %v2176_v47  ;;  %v2121_v20 = vpop.f32.mrf.mxu1  ;;  %v2377_v60 = vrot.slane %v2376_v21, 2  ;;  %v2313_v1 = vadd.f32 %v2312_v52, %v2311_v33 }
 0x1d1   : > { %v4322_v24 = vsel %vm710_vm1, %v2150_v12, %v4296_v16  ;;  %v2134_v29 = vmul.f32 %v2121_v20, %v4256_v18  ;;  %v2085_v63 = vadd.f32 %v2068_v9, %v2067_v49 }
 0x1d2   : > { %v2183_v45 = vmul.f32 0.33333334, %v2182_v61  ;;  %v2378_v48 = vadd.f32 %v2377_v60, %v2376_v21  ;;  %v2306_v60 = vadd.f32 %v2305_v8, %v2304_v59 }
 0x1d3   : > { %v2151_v6 = vadd.f32 %v2134_v29, %v2133_v62  ;;  %v2086_v53 = vrot.slane %v2085_v63, 4  ;;  %v4333_v62 = vadd.f32 %v2372_v17, %v2371_v39  ;;  %v2314_v17 = vrot.slane %v2313_v1, 1 }
 0x1d4   : > { %v2219_v40 = vsub.f32 1.0, %v2183_v45  ;;  %v2187_v30 = vmul.f32 %v2185_v5, %v2183_v45  ;;  %v2379_v16 = vrot.slane %v2378_v48, 1 }
 0x1d5   : > { %v2152_v15 = vrot.slane %v2151_v6, 4  ;;  %v2286_v42 = vpop.f32.mrf.mxu2  ;;  %v2087_v49 = vadd.f32 %v2086_v53, %v2085_v63 }
 0x1d6   : > { %v2299_v10 = vmul.f32 %v2286_v42, %v4530_v31  ;;  %v2058_v35 = vpop.f32.mrf.mxu0  ;;  %v4331_v32 = vperm.slane %v2187_v30, 3  ;;  %2221 = vst [vmem:[#allocation1] sm:$0xff] %v2219_v40  ;;  %v2380_v38 = vadd.f32 %v2379_v16, %v2378_v48  ;;  %v2351_v4 = vpop.f32.mrf.mxu3 }
 0x1d7   : > { %v2153_v25 = vadd.f32 %v2152_v15, %v2151_v6  ;;  %v2069_v56 = vmul.f32 %v2058_v35, %v4253_v50  ;;  %v2088_v11 = vrot.slane %v2087_v49, 2  ;;  %v2364_v47 = vmul.f32 %v2351_v4, %v4274_v26 }
 0x1d8   : > { %v2316_v46 = vadd.f32 %v2299_v10, %v2298_v55  ;;  %v2124_v36 = vpop.f32.mrf.mxu1  ;;  %v2197_v44 = vmul.f32 %v4285_v27, %v4331_v32  ;;  %v2499_v12 = vsel %vm710_vm1, %v2380_v38, %v4333_v62  ;;  %v2552_v6 = vsub.f32 %v2551_v57, %v3348_v13 }
 0x1d9   : > { %v2154_v21 = vrot.slane %v2153_v25, 2  ;;  %v2135_v39 = vmul.f32 %v2124_v36, %v4253_v50  ;;  %v2089_v22 = vadd.f32 %v2088_v11, %v2087_v49  ;;  %v2381_v9 = vadd.f32 %v2364_v47, %v2363_v41 }
 0x1da   : > { %v2317_v61 = vrot.slane %v2316_v46, 4  ;;  %v4343_v20 = vadd.f32 %v2197_v44, %v4269_v2  ;;  %v2553_v2 = vsub.f32 %v2551_v57, %v3350_v14  ;;  %v2307_v41 = vrot.slane %v2306_v60, 1 }
 0x1db   : > { %v2155_v29 = vadd.f32 %v2154_v21, %v2153_v25  ;;  %v2090_v45 = vrot.slane %v2089_v22, 1  ;;  %v2382_v5 = vrot.slane %v2381_v9, 4  ;;  %v2315_v49 = vadd.f32 %v2314_v17, %v2313_v1 }
 0x1dc   : > { %v2318_v63 = vadd.f32 %v2317_v61, %v2316_v46  ;;  %v4356_v38 = vadd.f32 %v2307_v41, %v2306_v60  ;;  %v2554_v11 = vand.u32 2147483647, %v2552_v6  ;;  %v2555_v47 = vand.u32 2147483647, %v2553_v2 }
 0x1dd   : > { %v2156_v27 = vrot.slane %v2155_v29, 1  ;;  %v2289_v33 = vpop.f32.mrf.mxu2  ;;  %v4345_v48 = vld [vmem:[#allocation1 + $0x3] ss:$9 sm:$0xff]  ;;  %v2091_v23 = vadd.f32 %v2090_v45, %v2089_v22  ;;  %v2383_v53 = vadd.f32 %v2382_v5, %v2381_v9 }
 0x1de   : > { %v2319_v50 = vrot.slane %v2318_v63, 2  ;;  %v2060_v30 = vpop.f32.mrf.mxu0  ;;  %2226 = vst [vmem:[#allocation1] sm:$0xff] %v2219_v40  ;;  %v2354_v8 = vpop.f32.mrf.mxu3  ;;  %v2489_v36 = vsel %vm710_vm1, %v2315_v49, %v4356_v38  ;;  %v2556_v17 = vsub.f32 1.0, %v2554_v11 }
 0x1df   : > { %v2157_v59 = vadd.f32 %v2156_v27, %v2155_v29  ;;  %v2070_v52 = vmul.f32 %v2060_v30, %v4256_v18  ;;  %v2204_v16 = vsel %vm712_vm2, %v2091_v23, %v4316_v54  ;;  %v2384_v42 = vrot.slane %v2383_v53, 2 }
 0x1e0   : > { %v2320_v15 = vadd.f32 %v2319_v50, %v2318_v63  ;;  %v2365_v55 = vmul.f32 %v2354_v8, %v4281_v34  ;;  %v2126_v13 = vpop.f32.mrf.mxu1  ;;  %v2557_v23 = vsub.f32 1.0, %v2555_v47  ;;  %v4365_v2 = vmax.f32 %v2556_v17, 0.0 }
 0x1e1   : > { %v2214_v10 = vsel %vm712_vm2, %v2157_v59, %v4322_v24  ;;  %v2092_v40 = vadd.f32 %v2070_v52, %v2069_v56  ;;  %v2136_v14 = vmul.f32 %v2126_v13, %v4256_v18  ;;  %v2385_v35 = vadd.f32 %v2384_v42, %v2383_v53 }
 0x1e2   : > { %v2321_v57 = vrot.slane %v2320_v15, 1  ;;  %v2300_v18 = vmul.f32 %v2289_v33, %v4531_v28  ;;  %v4367_v8 = vmax.f32 %v2557_v23, 0.0  ;;  %v2462_v47 = vmax.f32 %v4356_v38, 0.0 }
 0x1e3   : > { %v2093_v25 = vrot.slane %v2092_v40, 4  ;;  %v2158_v4 = vadd.f32 %v2136_v14, %v2135_v39  ;;  %v2386_v46 = vrot.slane %v2385_v35, 1 }
 0x1e4   : > { %v2322_v54 = vadd.f32 %v2321_v57, %v2320_v15 }
 0x1e5   : > { %v2094_v44 = vadd.f32 %v2093_v25, %v2092_v40  ;;  %v2159_v1 = vrot.slane %v2158_v4, 4  ;;  %v2291_v21 = vpop.f32.mrf.mxu2  ;;  %v2387_v56 = vadd.f32 %v2386_v46, %v2385_v35  ;;  %v3257_v35 = vld [vmem:[%s3337_s22 + $0x18] sm:$0xf] }
 0x1e6   : > { %v2490_v24 = vsel %vm712_vm2, %v2322_v54, %v2489_v36  ;;  %v2301_v22 = vmul.f32 %v2291_v21, %v4530_v31  ;;  %v2405_v61 = vpop.f32.mrf.mxu0  ;;  %v2356_v60 = vpop.f32.mrf.mxu3  ;;  %v4374_v25 = vsub.f32 0.0, %v3257_v35 }
 0x1e7   : > { %v2095_v9 = vrot.slane %v2094_v44, 2  ;;  %v2160_v39 = vadd.f32 %v2159_v1, %v2158_v4  ;;  %v2500_v29 = vsel %vm712_vm2, %v2387_v56, %v2499_v12  ;;  %v2366_v63 = vmul.f32 %v2356_v60, %v4274_v26 }
 0x1e8   : > { %v2323_v45 = vadd.f32 %v2301_v22, %v2300_v18  ;;  %v2570_v5 = vpop.f32.mrf.mxu1  ;;  %v2425_v42 = vmul.f32 %v2405_v61, %v4281_v34  ;;  %v2467_v61 = vmax.f32 %v4333_v62, 0.0 }
 0x1e9   : > { %v2096_v27 = vadd.f32 %v2095_v9, %v2094_v44  ;;  %v2161_v6 = vrot.slane %v2160_v39, 2  ;;  %v2388_v53 = vadd.f32 %v2366_v63, %v2365_v55  ;;  %v2590_v40 = vmul.f32 %v2570_v5, %v3946_v58 }
 0x1ea   : > { %v2324_v50 = vrot.slane %v2323_v45, 4  ;;  %v2468_v23 = vmul.f32 %v2467_v61, %v4374_v25 }
 0x1eb   : > { %v2097_v30 = vrot.slane %v2096_v27, 1  ;;  %v2162_v28 = vadd.f32 %v2161_v6, %v2160_v39  ;;  %v2389_v31 = vrot.slane %v2388_v53, 4 }
 0x1ec   : > { %v2325_v33 = vadd.f32 %v2324_v50, %v2323_v45 }
 0x1ed   : > { %v2098_v41 = vadd.f32 %v2097_v30, %v2096_v27  ;;  %v2163_v59 = vrot.slane %v2162_v28, 1  ;;  %v2635_v12 = vpop.f32.mrf.mxu2  ;;  %v2390_v15 = vadd.f32 %v2389_v31, %v2388_v53 }
 0x1ee   : > { %v2326_v52 = vrot.slane %v2325_v33, 2  ;;  %v2407_v13 = vpop.f32.mrf.mxu0  ;;  %v2701_v14 = vpop.f32.mrf.mxu3  ;;  %v2655_v27 = vmul.f32 %v2635_v12, %v4365_v2 }
 0x1ef   : > { %v2205_v49 = vsel %vm714_vm3, %v2098_v41, %v2204_v16  ;;  %v2164_v55 = vadd.f32 %v2163_v59, %v2162_v28  ;;  %v2426_v57 = vmul.f32 %v2407_v13, %v4274_v26  ;;  %v2391_v54 = vrot.slane %v2390_v15, 2  ;;  %v4533_v16 = vld [vmem:[#allocation12_spill] sm:$0xff] }
 0x1f0   : > { %v2207_v4 = vmul.f32 %v2205_v49, %v4331_v32  ;;  %v2327_v11 = vadd.f32 %v2326_v52, %v2325_v33  ;;  %v2572_v46 = vpop.f32.mrf.mxu1  ;;  %v2721_v28 = vmul.f32 %v2701_v14, %v4365_v2 }
 0x1f1   : > { %v2215_v36 = vsel %vm714_vm3, %v2164_v55, %v2214_v10  ;;  %v2433_v44 = vadd.f32 %v2426_v57, %v2425_v42  ;;  %v2591_v1 = vmul.f32 %v2572_v46, %v4533_v16  ;;  %v2392_v22 = vadd.f32 %v2391_v54, %v2390_v15 }
 0x1f2   : > { %v4381_v21 = vadd.f32 %v2207_v4, %v4272_v3  ;;  %v2217_v56 = vmul.f32 %v2215_v36, %v4331_v32  ;;  %v2328_v18 = vrot.slane %v2327_v11, 1  ;;  %v2463_v10 = vmul.f32 %v2462_v47, %v4374_v25  ;;  %v3258_v47 = vld [vmem:[%s3337_s22 + $0x1c] sm:$0xf] }
 0x1f3   : > { %v2434_v9 = vrot.slane %v2433_v44, 4  ;;  %v2598_v39 = vadd.f32 %v2591_v1, %v2590_v40  ;;  %v2393_v45 = vrot.slane %v2392_v22, 1  ;;  %v2469_v42 = vmul.f32 1.442695, %v2468_v23 }
 0x1f4   : > { %v4386_v60 = vadd.f32 %v2217_v56, %v4288_v19  ;;  %v2329_v38 = vadd.f32 %v2328_v18, %v2327_v11  ;;  %v2464_v12 = vmul.f32 1.442695, %v2463_v10  ;;  %v2757_v36 = vsub.f32 0.0, %v3258_v47 }
 0x1f5   : > { %v2435_v63 = vadd.f32 %v2434_v9, %v2433_v44  ;;  %v2599_v5 = vrot.slane %v2598_v39, 4  ;;  %v2637_v17 = vpop.f32.mrf.mxu2  ;;  %v2394_v32 = vadd.f32 %v2393_v45, %v2392_v22 }
 0x1f6   : > { %v4390_v3 = vsel %vm714_vm3, %v2329_v38, %v2490_v24  ;;  %v2656_v62 = vmul.f32 %v2637_v17, %v4367_v8  ;;  %v2410_v6 = vpop.f32.mrf.mxu0  ;;  %v2703_v53 = vpop.f32.mrf.mxu3  ;;  %3224 = vpow2.f32 %v2464_v12 }
 0x1f7   : > { %v2436_v19 = vrot.slane %v2435_v63, 2  ;;  %v2600_v50 = vadd.f32 %v2599_v5, %v2598_v39  ;;  %v4396_v30 = vsel %vm714_vm3, %v2394_v32, %v2500_v29  ;;  %v2722_v24 = vmul.f32 %v2703_v53, %v4367_v8 }
 0x1f8   : > { %v2663_v33 = vadd.f32 %v2656_v62, %v2655_v27  ;;  %v2575_v31 = vpop.f32.mrf.mxu1  ;;  %3226 = vpow2.f32 %v2469_v42  ;;  %v2427_v27 = vmul.f32 %v2410_v6, %v4281_v34 }
 0x1f9   : > { %v2437_v41 = vadd.f32 %v2436_v19, %v2435_v63  ;;  %v2601_v59 = vrot.slane %v2600_v50, 2  ;;  %v2729_v15 = vadd.f32 %v2722_v24, %v2721_v28  ;;  %v2592_v62 = vmul.f32 %v2575_v31, %v3946_v58 }
 0x1fa   : > { %v2664_v52 = vrot.slane %v2663_v33, 4 }
 0x1fb   : > { %v2438_v13 = vrot.slane %v2437_v41, 1  ;;  %v2602_v49 = vadd.f32 %v2601_v59, %v2600_v50  ;;  %v2730_v40 = vrot.slane %v2729_v15, 4 }
 0x1fc   : > { %v2665_v55 = vadd.f32 %v2664_v52, %v2663_v33  ;;  %v3225_v63 = vpop.eup %3224 }
 0x1fd   : > { %v4400_v57 = vadd.f32 %v2438_v13, %v2437_v41  ;;  %v2603_v29 = vrot.slane %v2602_v49, 1  ;;  %v4402_v35 = vpop.f32.mrf.mxu2  ;;  %v2731_v4 = vadd.f32 %v2730_v40, %v2729_v15  ;;  %v2466_v41 = vsub.f32 1.0, %v3225_v63 }
 0x1fe   : > { %v2666_v14 = vrot.slane %v2665_v55, 2  ;;  %v2412_v11 = vpop.f32.mrf.mxu0  ;;  %v4408_v44 = vpop.f32.mrf.mxu3 }
 0x1ff   : > { %v2473_v54 = vmax.f32 %v4400_v57, 0.0  ;;  %v4405_v46 = vadd.f32 %v2603_v29, %v2602_v49  ;;  %v2732_v56 = vrot.slane %v2731_v4, 2  ;;  %v2428_v10 = vmul.f32 %v2412_v11, %v4274_v26  ;;  %v3227_v32 = vpop.eup %3226 }
 0x200   : > { %v2667_v1 = vadd.f32 %v2666_v14, %v2665_v55  ;;  %v2577_v18 = vpop.f32.mrf.mxu1  ;;  %v2471_v59 = vsub.f32 1.0, %v3227_v32  ;;  %v4424_v55 = vmul.f32 %v4345_v48, %v4312_v0 }
 0x201   : > { %v2474_v22 = vmul.f32 %v2473_v54, %v4374_v25  ;;  %v2758_v61 = vmax.f32 %v4405_v46, 0.0  ;;  %v2733_v39 = vadd.f32 %v2732_v56, %v2731_v4  ;;  %v2593_v25 = vmul.f32 %v2577_v18, %v4533_v16 }
 0x202   : > { %v2668_v9 = vrot.slane %v2667_v1, 1  ;;  %v2440_v33 = vadd.f32 %v2428_v10, %v2427_v27  ;;  %v2472_v40 = vadd.f32 %v2471_v59, %v2466_v41  ;;  %v2481_v18 = vperm.slane %v4424_v55, 0 }
 0x203   : > { %v2475_v38 = vmul.f32 1.442695, %v2474_v22  ;;  %v2759_v45 = vmul.f32 %v2758_v61, %v2757_v36  ;;  %v2734_v17 = vrot.slane %v2733_v39, 1  ;;  %v2605_v6 = vadd.f32 %v2593_v25, %v2592_v62 }
 0x204   : > { %v4413_v5 = vadd.f32 %v2668_v9, %v2667_v1  ;;  %v2441_v49 = vrot.slane %v2440_v33, 4 }
 0x205   : > { %3228 = vpow2.f32 %v2475_v38  ;;  %v2642_v23 = vpop.f32.mrf.mxu2  ;;  %v4419_v50 = vadd.f32 %v2734_v17, %v2733_v39  ;;  %v2760_v28 = vmul.f32 1.442695, %v2759_v45  ;;  %v2606_v4 = vrot.slane %v2605_v6, 4 }
 0x206   : > { %v2763_v19 = vmax.f32 %v4413_v5, 0.0  ;;  %v2415_v53 = vpop.f32.mrf.mxu0  ;;  %v2708_v24 = vpop.f32.mrf.mxu3  ;;  %v2442_v1 = vadd.f32 %v2441_v49, %v2440_v33  ;;  %v2658_v61 = vmul.f32 %v2642_v23, %v4367_v8  ;;  %v2657_v17 = vmul.f32 %v4402_v35, %v4365_v2  ;;  %v4434_v23 = vld [vmem:[#allocation1 + $0x3] ss:$9 sm:$0xff] }
 0x207   : > { %v2769_v52 = vmax.f32 %v4419_v50, 0.0  ;;  %3230 = vpow2.f32 %v2760_v28  ;;  %v2429_v0 = vmul.f32 %v2415_v53, %v4281_v34  ;;  %v2607_v38 = vadd.f32 %v2606_v4, %v2605_v6 }
 0x208   : > { %v2764_v12 = vmul.f32 %v2763_v19, %v2757_v36  ;;  %v2580_v15 = vpop.f32.mrf.mxu1  ;;  %v2443_v25 = vrot.slane %v2442_v1, 2  ;;  %v2670_v28 = vadd.f32 %v2658_v61, %v2657_v17  ;;  %v2723_v49 = vmul.f32 %v4408_v44, %v4365_v2 }
 0x209   : > { %v2770_v31 = vmul.f32 %v2769_v52, %v2757_v36  ;;  %v2594_v56 = vmul.f32 %v2580_v15, %v3946_v58  ;;  %v2608_v59 = vrot.slane %v2607_v38, 2 }
 0x20a   : > { %v2765_v42 = vmul.f32 1.442695, %v2764_v12  ;;  %v2724_v12 = vmul.f32 %v2708_v24, %v4367_v8  ;;  %v2671_v24 = vrot.slane %v2670_v28, 4 }
 0x20b   : > { %v3229_v13 = vpop.eup %3228  ;;  %v2771_v14 = vmul.f32 1.442695, %v2770_v31 }
 0x20c   : > { %v2477_v29 = vsub.f32 1.0, %v3229_v13  ;;  %3232 = vpow2.f32 %v2765_v42  ;;  %v352_v13 = vld [vmem:[#allocation6] sm:$0x1] }
 0x20d   : > { %v2645_v11 = vpop.f32.mrf.mxu2  ;;  %3234 = vpow2.f32 %v2771_v14  ;;  %v3231_v39 = vpop.eup %3230 }
 0x20e   : > { %v2478_v54 = vadd.f32 %v2477_v29, %v2472_v40  ;;  %v2417_v47 = vpop.f32.mrf.mxu0  ;;  %v2711_v36 = vpop.f32.mrf.mxu3  ;;  %v2762_v53 = vsub.f32 1.0, %v3231_v39  ;;  %v2444_v40 = vadd.f32 %v2443_v25, %v2442_v1  ;;  %v2659_v29 = vmul.f32 %v2645_v11, %v4365_v2 }
 0x20f   : > { %v2430_v48 = vmul.f32 %v2417_v47, %v4274_v26  ;;  %v2609_v1 = vadd.f32 %v2608_v59, %v2607_v38 }
 0x210   : > { %v2479_v22 = vmul.f32 0.33333334, %v2478_v54  ;;  %v2582_v9 = vpop.f32.mrf.mxu1 }
 0x211   : > { %v2595_v45 = vmul.f32 %v2582_v9, %v4533_v16  ;;  %v2447_v32 = vadd.f32 %v2430_v48, %v2429_v0  ;;  %v4534_v0 = vld [vmem:[#allocation8_spill] sm:$0xff] }
 0x212   : > { %v3233_v10 = vpop.eup %3232  ;;  %v2515_v63 = vsub.f32 1.0, %v2479_v22  ;;  %v2483_v27 = vmul.f32 %v2481_v18, %v2479_v22  ;;  %v2736_v22 = vadd.f32 %v2724_v12, %v2723_v49  ;;  %v750_v48 = vmul.f32 %v4534_v0, %v352_v13 }
 0x213   : > { %v2767_v62 = vsub.f32 1.0, %v3233_v10  ;;  %v2612_v19 = vadd.f32 %v2595_v45, %v2594_v56  ;;  %v3235_v41 = vpop.eup %3234  ;;  %v2448_v6 = vrot.slane %v2447_v32, 4 }
 0x214   : > { %v4436_v33 = vperm.slane %v2483_v27, 3  ;;  %2517 = vst [vmem:[#allocation1] sm:$0xff] %v2515_v63  ;;  %v2773_v54 = vsub.f32 1.0, %v3235_v41  ;;  %v1046_v17 = vmul.f32 %v4042_v43, %v750_v48  ;;  %v2445_v27 = vrot.slane %v2444_v40, 1 }
 0x215   : > { %v2647_v52 = vpop.f32.mrf.mxu2  ;;  %v2768_v15 = vadd.f32 %v2767_v62, %v2762_v53  ;;  %v2613_v14 = vrot.slane %v2612_v19, 4  ;;  %v2449_v9 = vadd.f32 %v2448_v6, %v2447_v32  ;;  %v2737_v62 = vrot.slane %v2736_v22, 4 }
 0x216   : > { %v2660_v35 = vmul.f32 %v2647_v52, %v4367_v8  ;;  %v2420_v42 = vpop.f32.mrf.mxu0  ;;  %v2493_v31 = vmul.f32 %v4390_v3, %v4436_v33  ;;  %v2713_v4 = vpop.f32.mrf.mxu3  ;;  %v2725_v3 = vmul.f32 %v2711_v36, %v4365_v2  ;;  %v2503_v11 = vmul.f32 %v4396_v30, %v4436_v33 }
 0x217   : > { %v2726_v47 = vmul.f32 %v2713_v4, %v4367_v8  ;;  %v2774_v44 = vadd.f32 %v2773_v54, %v2768_v15  ;;  %v2614_v39 = vadd.f32 %v2613_v14, %v2612_v19  ;;  %v1342_v38 = vmul.f32 %v4096_v37, %v1046_v17 }
 0x218   : > { %v2585_v56 = vpop.f32.mrf.mxu1  ;;  %v4447_v18 = vadd.f32 %v2493_v31, %v4343_v20  ;;  %v2677_v61 = vadd.f32 %v2660_v35, %v2659_v29  ;;  %v2672_v20 = vadd.f32 %v2671_v24, %v2670_v28  ;;  %v4455_v53 = vadd.f32 %v2503_v11, %v4381_v21 }
 0x219   : > { %v2743_v45 = vadd.f32 %v2726_v47, %v2725_v3  ;;  %v4458_v32 = vmul.f32 0.33333334, %v2774_v44  ;;  %v2610_v41 = vrot.slane %v2609_v1, 1  ;;  %v2450_v30 = vrot.slane %v2449_v9, 2 }
 0x21a   : > { %v2678_v25 = vrot.slane %v2677_v61, 4  ;;  %v2431_v19 = vmul.f32 %v2420_v42, %v4281_v34  ;;  %v2615_v12 = vrot.slane %v2614_v39, 2  ;;  %v2596_v28 = vmul.f32 %v2585_v56, %v3946_v58 }
 0x21b   : > { %v2519_v10 = vld [vmem:[#allocation1 + $0x3] ss:$9 sm:$0xff]  ;;  %v2744_v43 = vrot.slane %v2743_v45, 4  ;;  %v2446_v15 = vadd.f32 %v2445_v27, %v2444_v40  ;;  %v2673_v6 = vrot.slane %v2672_v20, 2  ;;  %v1638_v35 = vmul.f32 %v4214_v7, %v1342_v38 }
 0x21c   : > { %2522 = vst [vmem:[#allocation1] sm:$0xff] %v2515_v63  ;;  %v2738_v37 = vadd.f32 %v2737_v62, %v2736_v22  ;;  %v2679_v31 = vadd.f32 %v2678_v25, %v2677_v61  ;;  %v2811_v34 = vsub.f32 1.0, %v4458_v32  ;;  %v2611_v42 = vadd.f32 %v2610_v41, %v2609_v1 }
 0x21d   : > { %v2650_v36 = vpop.f32.mrf.mxu2  ;;  %v2451_v29 = vadd.f32 %v2450_v30, %v2449_v9  ;;  %v1934_v14 = vmul.f32 %v4327_v51, %v1638_v35  ;;  %v2616_v58 = vadd.f32 %v2615_v12, %v2614_v39  ;;  %v2745_v4 = vadd.f32 %v2744_v43, %v2743_v45 }
 0x21e   : > { %v2422_v59 = vpop.f32.mrf.mxu0  ;;  %v2716_v63 = vpop.f32.mrf.mxu3  ;;  %v2509_v7 = vsel %vm710_vm1, %v2446_v15, %v4400_v57  ;;  %v2674_v24 = vadd.f32 %v2673_v6, %v2672_v20  ;;  %v2521_v47 = vmul.f32 %v2519_v10, %v4424_v55  ;;  %v2739_v56 = vrot.slane %v2738_v37, 2 }
 0x21f   : > { %v2432_v52 = vmul.f32 %v2422_v59, %v4274_v26  ;;  %v2680_v22 = vrot.slane %v2679_v31, 2  ;;  %v2785_v0 = vsel %vm710_vm1, %v2611_v42, %v4405_v46  ;;  %v2452_v48 = vrot.slane %v2451_v29, 1 }
 0x220   : > { %v2587_v21 = vpop.f32.mrf.mxu1  ;;  %v2661_v44 = vmul.f32 %v2650_v36, %v4365_v2  ;;  %v2617_v57 = vrot.slane %v2616_v58, 1  ;;  %v2746_v9 = vrot.slane %v2745_v4, 2  ;;  %v2777_v45 = vperm.slane %v2521_v47, 0 }
 0x221   : > { %v2454_v13 = vadd.f32 %v2432_v52, %v2431_v19  ;;  %v2597_v49 = vmul.f32 %v2587_v21, %v4533_v16  ;;  %v2230_v16 = vmul.f32 %v4434_v23, %v1934_v14  ;;  %v2727_v23 = vmul.f32 %v2716_v63, %v4365_v2 }
 0x222   : > { %v2740_v27 = vadd.f32 %v2739_v56, %v2738_v37  ;;  %v2681_v20 = vadd.f32 %v2680_v22, %v2679_v31  ;;  %v2675_v25 = vrot.slane %v2674_v24, 1  ;;  %v2453_v38 = vadd.f32 %v2452_v48, %v2451_v29 }
 0x223   : > { %v2455_v54 = vrot.slane %v2454_v13, 4  ;;  %v4467_v26 = vld [vmem:[#allocation1 + $0x3] ss:$9 sm:$0xff]  ;;  %v2619_v40 = vadd.f32 %v2597_v49, %v2596_v28  ;;  %v2618_v30 = vadd.f32 %v2617_v57, %v2616_v58  ;;  %v2747_v19 = vadd.f32 %v2746_v9, %v2745_v4 }
 0x224   : > { %2813 = vst [vmem:[#allocation1] sm:$0xff] %v2811_v34  ;;  %v2779_v28 = vmul.f32 %v2777_v45, %v4458_v32  ;;  %v2682_v15 = vrot.slane %v2681_v20, 1  ;;  %v2676_v35 = vadd.f32 %v2675_v25, %v2674_v24  ;;  %v2510_v37 = vsel %vm712_vm2, %v2453_v38, %v2509_v7 }
 0x225   : > { %v2456_v3 = vadd.f32 %v2455_v54, %v2454_v13  ;;  %v2620_v61 = vrot.slane %v2619_v40, 4  ;;  %v2652_v51 = vpop.f32.mrf.mxu2  ;;  %v2786_v49 = vsel %vm712_vm2, %v2618_v30, %v2785_v0  ;;  %v2748_v42 = vrot.slane %v2747_v19, 1 }
 0x226   : > { %v2662_v1 = vmul.f32 %v2652_v51, %v4367_v8  ;;  %v2718_v39 = vpop.f32.mrf.mxu3  ;;  %v2780_v14 = vperm.slane %v2779_v28, 3  ;;  %v2526_v7 = vmul.f32 %v4467_v26, %v2230_v16 }
 0x227   : > { %v2457_v11 = vrot.slane %v2456_v3, 2  ;;  %v2621_v55 = vadd.f32 %v2620_v61, %v2619_v40  ;;  %v2728_v17 = vmul.f32 %v2718_v39, %v4367_v8  ;;  %v2741_v8 = vrot.slane %v2740_v27, 1 }
 0x228   : > { %v2684_v10 = vadd.f32 %v2662_v1, %v2661_v44  ;;  %v2683_v40 = vadd.f32 %v2682_v15, %v2681_v20  ;;  %v2795_v61 = vsel %vm710_vm1, %v2676_v35, %v4413_v5  ;;  %v2749_v51 = vadd.f32 %v2748_v42, %v2747_v19 }
 0x229   : > { %v2458_v62 = vadd.f32 %v2457_v11, %v2456_v3  ;;  %v2622_v46 = vrot.slane %v2621_v55, 2  ;;  %v2750_v41 = vadd.f32 %v2728_v17, %v2727_v23  ;;  %v2742_v54 = vadd.f32 %v2741_v8, %v2740_v27 }
 0x22a   : > { %v2685_v36 = vrot.slane %v2684_v10, 4  ;;  %v2796_v57 = vsel %vm712_vm2, %v2683_v40, %v2795_v61 }
 0x22b   : > { %v2459_v59 = vrot.slane %v2458_v62, 1  ;;  %v2623_v12 = vadd.f32 %v2622_v46, %v2621_v55  ;;  %v2815_v43 = vld [vmem:[#allocation1 + $0x3] ss:$9 sm:$0xff]  ;;  %v2751_v52 = vrot.slane %v2750_v41, 4  ;;  %v2805_v26 = vsel %vm710_vm1, %v2742_v54, %v4419_v50 }
 0x22c   : > { %v2817_v2 = vmul.f32 %v2815_v43, %v2521_v47  ;;  %2818 = vst [vmem:[#allocation1] sm:$0xff] %v2811_v34  ;;  %v2686_v63 = vadd.f32 %v2685_v36, %v2684_v10  ;;  %v2806_v5 = vsel %vm712_vm2, %v2749_v51, %v2805_v26 }
 0x22d   : > { %v2460_v6 = vadd.f32 %v2459_v59, %v2458_v62  ;;  %v2624_v21 = vrot.slane %v2623_v12, 1  ;;  %v2752_v13 = vadd.f32 %v2751_v52, %v2750_v41 }
 0x22e   : > { %2826 = vst [vmem:[#allocation5] sm:$0x1] %v2817_v2  ;;  %v2687_v31 = vrot.slane %v2686_v63, 2 }
 0x22f   : > { %v2511_v29 = vsel %vm714_vm3, %v2460_v6, %v2510_v37  ;;  %v2625_v32 = vadd.f32 %v2624_v21, %v2623_v12  ;;  %v2753_v4 = vrot.slane %v2752_v13, 2 }
 0x230   : > { %v2513_v34 = vmul.f32 %v2511_v29, %v4436_v33  ;;  %v2688_v58 = vadd.f32 %v2687_v31, %v2686_v63 }
 0x231   : > { %v2787_v24 = vsel %vm714_vm3, %v2625_v32, %v2786_v49  ;;  %v2754_v3 = vadd.f32 %v2753_v4, %v2752_v13 }
 0x232   : > { %v2514_v47 = vadd.f32 %v2513_v34, %v4386_v60  ;;  %v2789_v56 = vmul.f32 %v2787_v24, %v2780_v14  ;;  %v2689_v22 = vrot.slane %v2688_v58, 1 }
 0x233   : > { %v2820_v0 = vld [vmem:[#allocation1 + $0x3] ss:$9 sm:$0xff]  ;;  %v2755_v44 = vrot.slane %v2754_v3, 1 }
 0x234   : > { %v2790_v33 = vadd.f32 %v2789_v56, %v4447_v18  ;;  %v2690_v48 = vadd.f32 %v2689_v22, %v2688_v58  ;;  %v2822_v1 = vmul.f32 %v2820_v0, %v2526_v7 }
 0x235   : > { %v2756_v16 = vadd.f32 %v2755_v44, %v2754_v3 }
 0x236   : > { %2823 = vst [vmem:[#allocation2] sm:$0xf] %v2790_v33  ;;  %v2797_v60 = vsel %vm714_vm3, %v2690_v48, %v2796_v57  ;;  %v2831_v9 = vsub.f32 1.0, %v2822_v1 }
 0x237   : > { %v2799_v11 = vmul.f32 %v2797_v60, %v2780_v14  ;;  %2827 = vst [vmem:[#allocation6] sm:$0x1] %v2822_v1  ;;  %v2807_v55 = vsel %vm714_vm3, %v2756_v16, %v2806_v5 }
 0x238   : > { %v2809_v39 = vmul.f32 %v2807_v55, %v2780_v14  ;;  %v2836_v23 = vperm.slane %v2831_v9, 0 }
 0x239   : > { %v2800_v18 = vadd.f32 %v2799_v11, %v4455_v53 }
 0x23a   : > { %v2810_v50 = vadd.f32 %v2809_v39, %v2514_v47 }
 0x23b   : > { %2824 = vst [vmem:[#allocation3] sm:$0xf] %v2800_v18  ;;  %v2833_v45 = vrot.slane %v2800_v18, 4 }
 0x23c   : > { %2825 = vst [vmem:[#allocation4] sm:$0xf] %v2810_v50  ;;  %v2840_v17 = vsel %vm2838_vm4, %v2810_v50, %v2836_v23 }
 0x23d   : > { %v2839_v10 = vsel %vm2838_vm4, %v2790_v33, %v2833_v45  ;;  %2842 = vst [vmem:[%s311_s9 + $0x8] sm:$0x1f] %v2840_v17 }
 0x23e   : > { %2841 = vst [vmem:[%s311_s9] sm:$0xff] %v2839_v10 }
 0x23f PF: > { %s14_s17 = sadd.s32 1, %s3281_s17   ;;  %s4535_s15 = smov %s3277_s16 }
 0x240   : > { %p11_p5 = scmp.ge.s32.totalorder %s14_s17, 4   ;;  %s4536_s16 = smov %s4538_s18 }
 0x242   :  { %13 = sbr.rel (!%p11_p5) target bundleno = 2 (0x2), region = 106 }

</bundles_post_ra>
